<compile_context>
chip_gen: v6e
topology: v6e:2x2x1
jax: 0.10.0
libtpu: 0.0.40
codegen_flags: <defaults>
</compile_context>

<pallas_src>
import functools

import jax
import jax.numpy as jnp
from jax.experimental import pallas as pl
from jax.experimental.pallas import tpu as pltpu


def _round_up(x, m):
    return (x + m - 1) // m * m


# ----------------------------------------------------------------------------
# Pallas kernels
# ----------------------------------------------------------------------------
def _conv_kernel(p_ref, w_ref, b_ref, *rest, relu, with_residual):
    """Fused im2col-matmul conv + folded-BN bias + optional residual + ReLU.

    Refs: patches (tm, K) bf16, weights (K, N) bf16 (BN scale folded),
    bias (1, N) f32, [residual (tm, N) bf16], output (tm, N) bf16.
    Single K/N block -> no K grid axis / accumulator scratch; f32 accumulation
    via preferred_element_type; bf16 writeback.
    """
    if with_residual:
        r_ref, o_ref = rest
    else:
        (o_ref,) = rest

    acc = jnp.dot(p_ref[...], w_ref[...], preferred_element_type=jnp.float32)
    out = acc + b_ref[...]
    if with_residual:
        out = out + r_ref[...].astype(jnp.float32)
    if relu:
        out = jnp.maximum(out, 0.0)
    o_ref[...] = out.astype(o_ref.dtype)


def _maxpool_kernel(*refs):
    """Elementwise max over the kh*kw shifted-view inputs (lane-dense Wo*C layout)."""
    o_ref = refs[-1]
    m = refs[0][...]
    for r in refs[1:-1]:
        m = jnp.maximum(m, r[...])
    o_ref[...] = m


# ----------------------------------------------------------------------------
# Wrappers
# ----------------------------------------------------------------------------
def conv_bn_pallas(patches, w_mat, bias, residual=None, relu=True):
    """patches: [M, K] bf16, w_mat: [K, N] bf16 (BN scale folded), bias: [N] f32,
    residual: [M, N] (any float dtype) or None.  Returns [M, N] bf16."""
    M, K = patches.shape
    _, N = w_mat.shape

    # Tile over M only (K <= 9*Cin and N = Cout are small in this model).
    # bf16 packs 16 rows per sublane group -> round tm to 16.
    tm = min(1024, _round_up(M, 16))
    # Guarantee >=2 parallel M blocks when there is enough work so both
    # TensorCores participate on v7x (negligible extra step on v5e/v6e).
    if tm >= M and M >= 256:
        tm = _round_up((M + 1) // 2, 16)
    Mp = _round_up(M, tm)

    if Mp != M:
        patches = jnp.pad(patches, ((0, Mp - M), (0, 0)))
    b = bias.reshape(1, N).astype(jnp.float32)

    in_specs = [
        pl.BlockSpec((tm, K), lambda i: (i, 0)),
        pl.BlockSpec((K, N), lambda i: (0, 0)),   # stays resident across M blocks
        pl.BlockSpec((1, N), lambda i: (0, 0)),
    ]
    args = [patches, w_mat, b]
    if residual is not None:
        r = residual.astype(jnp.bfloat16)
        if Mp != M:
            r = jnp.pad(r, ((0, Mp - M), (0, 0)))
        in_specs.append(pl.BlockSpec((tm, N), lambda i: (i, 0)))
        args.append(r)

    bytes_accessed = 2 * (Mp * K + K * N + Mp * N) + 4 * N
    if residual is not None:
        bytes_accessed += 2 * Mp * N

    out = pl.pallas_call(
        functools.partial(_conv_kernel, relu=relu,
                          with_residual=residual is not None),
        out_shape=jax.ShapeDtypeStruct((Mp, N), jnp.bfloat16),
        grid=(Mp // tm,),
        in_specs=in_specs,
        out_specs=pl.BlockSpec((tm, N), lambda i: (i, 0)),
        compiler_params=pltpu.CompilerParams(
            dimension_semantics=("parallel",)),
        cost_estimate=pl.CostEstimate(flops=2 * M * K * N, transcendentals=0,
                                      bytes_accessed=bytes_accessed),
    )(*args)
    return out[:M] if Mp != M else out


def _im2col(x, kh, kw, sh, sw, ph, pw):
    """x: NHWC bf16 -> ([N*Ho*Wo, kh*kw*C], (N, Ho, Wo)) with K ordered (i, j, c)."""
    Nb, H, W, C = x.shape
    xp = jnp.pad(x, ((0, 0), (ph, ph), (pw, pw), (0, 0))) if (ph or pw) else x
    Ho = (H + 2 * ph - kh) // sh + 1
    Wo = (W + 2 * pw - kw) // sw + 1
    cols = []
    for i in range(kh):
        for j in range(kw):
            cols.append(xp[:, i:i + (Ho - 1) * sh + 1:sh,
                           j:j + (Wo - 1) * sw + 1:sw, :])
    patches = jnp.concatenate(cols, axis=-1)          # (N, Ho, Wo, kh*kw*C)
    return patches.reshape(Nb * Ho * Wo, kh * kw * C), (Nb, Ho, Wo)


def conv_bn(x, w, scale, bias, stride=(1, 1), padding=(1, 1), relu=True, residual=None):
    """x: NHWC (cast to bf16), w: PyTorch conv weight (Cout, Cin, kh, kw) f32."""
    Cout, Cin, kh, kw = w.shape
    patches, (Nb, Ho, Wo) = _im2col(x.astype(jnp.bfloat16), kh, kw,
                                    stride[0], stride[1], padding[0], padding[1])
    # Match im2col (i, j, c) ordering of K; fold BN scale into the weights.
    w_mat = (jnp.transpose(w, (2, 3, 1, 0)).reshape(kh * kw * Cin, Cout)
             * scale[None, :]).astype(jnp.bfloat16)
    res_flat = None if residual is None else residual.reshape(Nb * Ho * Wo, Cout)
    out = conv_bn_pallas(patches, w_mat, bias, residual=res_flat, relu=relu)
    return out.reshape(Nb, Ho, Wo, Cout)


def maxpool2d_pallas(x, kh, kw, sh, sw, ph, pw):
    """x: NHWC bf16. PyTorch MaxPool2d semantics (implicit -inf padding).
    Lane-dense layout: rows = Nb*Ho, lanes = Wo*C (no 128-lane channel padding)."""
    Nb, H, W, C = x.shape
    if ph or pw:
        xp = jnp.pad(x, ((0, 0), (ph, ph), (pw, pw), (0, 0)),
                     constant_values=-jnp.inf)
    else:
        xp = x
    Ho = (H + 2 * ph - kh) // sh + 1
    Wo = (W + 2 * pw - kw) // sw + 1
    R = Nb * Ho
    L = Wo * C

    views = []
    for i in range(kh):
        for j in range(kw):
            v = xp[:, i:i + (Ho - 1) * sh + 1:sh,
                   j:j + (Wo - 1) * sw + 1:sw, :].reshape(R, L)
            views.append(v)

    tr = min(512, _round_up(R, 16))
    Rp = _round_up(R, tr)
    if Rp != R:
        views = [jnp.pad(v, ((0, Rp - R), (0, 0))) for v in views]

    out = pl.pallas_call(
        _maxpool_kernel,
        out_shape=jax.ShapeDtypeStruct((Rp, L), x.dtype),
        grid=(Rp // tr,),
        in_specs=[pl.BlockSpec((tr, L), lambda i: (i, 0)) for _ in views],
        out_specs=pl.BlockSpec((tr, L), lambda i: (i, 0)),
        compiler_params=pltpu.CompilerParams(dimension_semantics=("parallel",)),
        cost_estimate=pl.CostEstimate(
            flops=(len(views) - 1) * Rp * L, transcendentals=0,
            bytes_accessed=2 * (len(views) + 1) * Rp * L),
    )(*views)
    return out[:R].reshape(Nb, Ho, Wo, C)


# ----------------------------------------------------------------------------
# Deterministic parameter init (shapes dictated by ResNet.__init__)
# ----------------------------------------------------------------------------
class _ParamGen:
    def __init__(self, key):
        self.key = key

    def _next(self):
        self.key, k = jax.random.split(self.key)
        return k

    def conv(self, cout, cin, kh, kw):
        return 0.1 * jax.random.normal(self._next(), (cout, cin, kh, kw), jnp.float32)

    def bn(self, c):
        eps = 1e-5
        gamma = 1.0 + 0.1 * jax.random.normal(self._next(), (c,), jnp.float32)
        beta = 0.1 * jax.random.normal(self._next(), (c,), jnp.float32)
        mean = 0.1 * jax.random.normal(self._next(), (c,), jnp.float32)
        var = 1.0 + 0.1 * jax.random.uniform(self._next(), (c,), jnp.float32)
        scale = gamma / jnp.sqrt(var + eps)
        bias = beta - mean * scale
        return scale, bias


def init_params(key, input_channel, output_channel):
    g = _ParamGen(key)
    oc = output_channel
    ocb = [oc // 4, oc // 2, oc, oc]
    p = {}
    p["conv0_1"] = g.conv(oc // 16, input_channel, 3, 3); p["bn0_1"] = g.bn(oc // 16)
    p["conv0_2"] = g.conv(oc // 8, oc // 16, 3, 3);        p["bn0_2"] = g.bn(oc // 8)
    inplanes = oc // 8

    def make_layer(planes, blocks):
        nonlocal inplanes
        layer = []
        for bi in range(blocks):
            blk = {}
            if bi == 0 and inplanes != planes:  # stride is always 1 in this model
                blk["downsample"] = (g.conv(planes, inplanes, 1, 1), g.bn(planes))
            blk["conv1"] = g.conv(planes, inplanes, 3, 3); blk["bn1"] = g.bn(planes)
            blk["conv2"] = g.conv(planes, planes, 3, 3);   blk["bn2"] = g.bn(planes)
            layer.append(blk)
            inplanes = planes
        return layer

    p["layer1"] = make_layer(ocb[0], 1)
    p["conv1"] = g.conv(ocb[0], ocb[0], 3, 3); p["bn1"] = g.bn(ocb[0])
    p["layer2"] = make_layer(ocb[1], 2)
    p["conv2"] = g.conv(ocb[1], ocb[1], 3, 3); p["bn2"] = g.bn(ocb[1])
    p["layer3"] = make_layer(ocb[2], 5)
    p["conv3"] = g.conv(ocb[2], ocb[2], 3, 3); p["bn3"] = g.bn(ocb[2])
    p["layer4"] = make_layer(ocb[3], 3)
    p["conv4_1"] = g.conv(ocb[3], ocb[3], 2, 2); p["bn4_1"] = g.bn(ocb[3])
    return p


# ----------------------------------------------------------------------------
# Forward pass (mirrors ResNet.forward / BasicBlock.forward)
# ----------------------------------------------------------------------------
def basic_block(x, blk):
    residual = x
    if "downsample" in blk:
        wd, (sd, bd) = blk["downsample"]
        residual = conv_bn(x, wd, sd, bd, stride=(1, 1), padding=(0, 0), relu=False)
    out = conv_bn(x, blk["conv1"], *blk["bn1"], relu=True)
    # conv2 + bn2 + residual-add + relu fused in one kernel
    out = conv_bn(out, blk["conv2"], *blk["bn2"], relu=True, residual=residual)
    return out


def resnet_feature_extractor(x_nchw, p):
    x = jnp.transpose(x_nchw, (0, 2, 3, 1))              # NCHW -> NHWC
    x = conv_bn(x, p["conv0_1"], *p["bn0_1"])
    x = conv_bn(x, p["conv0_2"], *p["bn0_2"])
    x = maxpool2d_pallas(x, 2, 2, 2, 2, 0, 0)            # maxpool1
    for blk in p["layer1"]:
        x = basic_block(x, blk)
    x = conv_bn(x, p["conv1"], *p["bn1"])
    x = maxpool2d_pallas(x, 2, 2, 2, 2, 0, 0)            # maxpool2
    for blk in p["layer2"]:
        x = basic_block(x, blk)
    x = conv_bn(x, p["conv2"], *p["bn2"])
    x = maxpool2d_pallas(x, 2, 2, 2, 1, 0, 1)            # maxpool3: stride (2,1), pad (0,1)
    for blk in p["layer3"]:
        x = basic_block(x, blk)
    x = conv_bn(x, p["conv3"], *p["bn3"])
    for blk in p["layer4"]:
        x = basic_block(x, blk)
    x = conv_bn(x, p["conv4_1"], *p["bn4_1"], stride=(2, 1), padding=(0, 0))
    # NHWC -> NCHW, back to the module's f32 interface dtype.
    return jnp.transpose(x, (0, 3, 1, 2)).astype(jnp.float32)


if __name__ == "__main__":
    key = jax.random.PRNGKey(0)
    kx, kp = jax.random.split(key)

    # Small shapes consistent with the module: batch=2, input_channel=4,
    # spatial 16x16, output_channel=32 (divisible by 16 as required by ResNet).
    x = jax.random.normal(kx, (2, 4, 16, 16), jnp.float32)
    params = init_params(kp, input_channel=4, output_channel=32)

    fwd = jax.jit(lambda inp: resnet_feature_extractor(inp, params))
    out = fwd(x)
    jax.block_until_ready(out)

    # Expected output: NCHW (2, 32, 1, 4) for a 16x16 input with output_channel=32.
    assert out.shape == (2, 32, 1, 4), out.shape
    assert out.dtype == jnp.float32
    assert bool(jnp.all(jnp.isfinite(out)))
    print("KERNEL_OK")
</pallas_src>

<mosaic_0001>
module attributes {stable_mosaic.version = 11 : i64} {
  func.func @_conv_kernel(%arg0: i32, %arg1: memref<256x36xbf16, #tpu.memory_space<vmem>>, %arg2: memref<36x2xbf16, #tpu.memory_space<vmem>>, %arg3: memref<1x2xf32, #tpu.memory_space<vmem>>, %arg4: memref<256x2xbf16, #tpu.memory_space<vmem>>) attributes {dimension_semantics = [#tpu.dimension_semantics<parallel>], iteration_bounds = array<i64: 2>, scalar_prefetch = 0 : i64, scratch_operands = 0 : i64, tpu.core_type = #tpu.core_type<tc>, window_params = [{transform_indices = @transform_0, window_bounds = array<i64: 256, 36>}, {pipeline_mode = #tpu.pipeline_mode<synchronous>, transform_indices = @transform_1, window_bounds = array<i64: 36, 2>}, {pipeline_mode = #tpu.pipeline_mode<synchronous>, transform_indices = @transform_2, window_bounds = array<i64: 1, 2>}, {transform_indices = @transform_3, window_bounds = array<i64: 256, 2>}]} {
    %c0 = arith.constant 0 : index
    %c0_0 = arith.constant 0 : index
    %0 = vector.load %arg1[%c0, %c0_0] : memref<256x36xbf16, #tpu.memory_space<vmem>>, vector<256x36xbf16>
    %c0_1 = arith.constant 0 : index
    %c0_2 = arith.constant 0 : index
    %1 = vector.load %arg2[%c0_1, %c0_2] : memref<36x2xbf16, #tpu.memory_space<vmem>>, vector<36x2xbf16>
    %cst = arith.constant dense<0.000000e+00> : vector<256x2xf32>
    %2 = tpu.matmul %0, %1, %cst {dimension_numbers = #tpu.dot_dimension_numbers<[1], [0], [0], [1], [0, 0, 1, 1], [], []>} : vector<256x36xbf16>, vector<36x2xbf16>, vector<256x2xf32> -> vector<256x2xf32>
    %c0_3 = arith.constant 0 : index
    %c0_4 = arith.constant 0 : index
    %3 = vector.load %arg3[%c0_3, %c0_4] : memref<1x2xf32, #tpu.memory_space<vmem>>, vector<1x2xf32>
    %4 = vector.broadcast %3 : vector<1x2xf32> to vector<256x2xf32>
    %5 = arith.addf %2, %4 : vector<256x2xf32>
    %cst_5 = arith.constant 0.000000e+00 : f32
    %6 = vector.broadcast %cst_5 : f32 to vector<256x2xf32>
    %7 = arith.maximumf %5, %6 : vector<256x2xf32>
    %8 = arith.truncf %7 : vector<256x2xf32> to vector<256x2xbf16>
    %c0_6 = arith.constant 0 : index
    %c0_7 = arith.constant 0 : index
    %9 = vector.load %arg4[%c0_6, %c0_7] : memref<256x2xbf16, #tpu.memory_space<vmem>>, vector<256x2xbf16>
    tpu.vector_store %arg4[%c0_6, %c0_7], %8 {strides = array<i32>} : memref<256x2xbf16, #tpu.memory_space<vmem>>, vector<256x2xbf16>,
    return
  }
  func.func @transform_0(%arg0: i32) -> (i32, i32) {
    %c0_i32 = arith.constant 0 : i32
    %c0_i32_0 = arith.constant 0 : i32
    return %arg0, %c0_i32 : i32, i32
  }
  func.func @transform_1(%arg0: i32) -> (i32, i32) {
    %c0_i32 = arith.constant 0 : i32
    %c0_i32_0 = arith.constant 0 : i32
    %c0_i32_1 = arith.constant 0 : i32
    return %c0_i32, %c0_i32_0 : i32, i32
  }
  func.func @transform_2(%arg0: i32) -> (i32, i32) {
    %c0_i32 = arith.constant 0 : i32
    %c0_i32_0 = arith.constant 0 : i32
    %c0_i32_1 = arith.constant 0 : i32
    return %c0_i32, %c0_i32_0 : i32, i32
  }
  func.func @transform_3(%arg0: i32) -> (i32, i32) {
    %c0_i32 = arith.constant 0 : i32
    %c0_i32_0 = arith.constant 0 : i32
    return %arg0, %c0_i32 : i32, i32
  }
}

module attributes {stable_mosaic.version = 11 : i64} {
  func.func @_conv_kernel(%arg0: i32, %arg1: memref<256x18xbf16, #tpu.memory_space<vmem>>, %arg2: memref<18x4xbf16, #tpu.memory_space<vmem>>, %arg3: memref<1x4xf32, #tpu.memory_space<vmem>>, %arg4: memref<256x4xbf16, #tpu.memory_space<vmem>>) attributes {dimension_semantics = [#tpu.dimension_semantics<parallel>], iteration_bounds = array<i64: 2>, scalar_prefetch = 0 : i64, scratch_operands = 0 : i64, tpu.core_type = #tpu.core_type<tc>, window_params = [{transform_indices = @transform_0, window_bounds = array<i64: 256, 18>}, {pipeline_mode = #tpu.pipeline_mode<synchronous>, transform_indices = @transform_1, window_bounds = array<i64: 18, 4>}, {pipeline_mode = #tpu.pipeline_mode<synchronous>, transform_indices = @transform_2, window_bounds = array<i64: 1, 4>}, {transform_indices = @transform_3, window_bounds = array<i64: 256, 4>}]} {
    %c0 = arith.constant 0 : index
    %c0_0 = arith.constant 0 : index
    %0 = vector.load %arg1[%c0, %c0_0] : memref<256x18xbf16, #tpu.memory_space<vmem>>, vector<256x18xbf16>
    %c0_1 = arith.constant 0 : index
    %c0_2 = arith.constant 0 : index
    %1 = vector.load %arg2[%c0_1, %c0_2] : memref<18x4xbf16, #tpu.memory_space<vmem>>, vector<18x4xbf16>
    %cst = arith.constant dense<0.000000e+00> : vector<256x4xf32>
    %2 = tpu.matmul %0, %1, %cst {dimension_numbers = #tpu.dot_dimension_numbers<[1], [0], [0], [1], [0, 0, 1, 1], [], []>} : vector<256x18xbf16>, vector<18x4xbf16>, vector<256x4xf32> -> vector<256x4xf32>
    %c0_3 = arith.constant 0 : index
    %c0_4 = arith.constant 0 : index
    %3 = vector.load %arg3[%c0_3, %c0_4] : memref<1x4xf32, #tpu.memory_space<vmem>>, vector<1x4xf32>
    %4 = vector.broadcast %3 : vector<1x4xf32> to vector<256x4xf32>
    %5 = arith.addf %2, %4 : vector<256x4xf32>
    %cst_5 = arith.constant 0.000000e+00 : f32
    %6 = vector.broadcast %cst_5 : f32 to vector<256x4xf32>
    %7 = arith.maximumf %5, %6 : vector<256x4xf32>
    %8 = arith.truncf %7 : vector<256x4xf32> to vector<256x4xbf16>
    %c0_6 = arith.constant 0 : index
    %c0_7 = arith.constant 0 : index
    %9 = vector.load %arg4[%c0_6, %c0_7] : memref<256x4xbf16, #tpu.memory_space<vmem>>, vector<256x4xbf16>
    tpu.vector_store %arg4[%c0_6, %c0_7], %8 {strides = array<i32>} : memref<256x4xbf16, #tpu.memory_space<vmem>>, vector<256x4xbf16>,
    return
  }
  func.func @transform_0(%arg0: i32) -> (i32, i32) {
    %c0_i32 = arith.constant 0 : i32
    %c0_i32_0 = arith.constant 0 : i32
    return %arg0, %c0_i32 : i32, i32
  }
  func.func @transform_1(%arg0: i32) -> (i32, i32) {
    %c0_i32 = arith.constant 0 : i32
    %c0_i32_0 = arith.constant 0 : i32
    %c0_i32_1 = arith.constant 0 : i32
    return %c0_i32, %c0_i32_0 : i32, i32
  }
  func.func @transform_2(%arg0: i32) -> (i32, i32) {
    %c0_i32 = arith.constant 0 : i32
    %c0_i32_0 = arith.constant 0 : i32
    %c0_i32_1 = arith.constant 0 : i32
    return %c0_i32, %c0_i32_0 : i32, i32
  }
  func.func @transform_3(%arg0: i32) -> (i32, i32) {
    %c0_i32 = arith.constant 0 : i32
    %c0_i32_0 = arith.constant 0 : i32
    return %arg0, %c0_i32 : i32, i32
  }
}

module attributes {stable_mosaic.version = 11 : i64} {
  func.func @_maxpool_kernel(%arg0: i32, %arg1: memref<16x32xbf16, #tpu.memory_space<vmem>>, %arg2: memref<16x32xbf16, #tpu.memory_space<vmem>>, %arg3: memref<16x32xbf16, #tpu.memory_space<vmem>>, %arg4: memref<16x32xbf16, #tpu.memory_space<vmem>>, %arg5: memref<16x32xbf16, #tpu.memory_space<vmem>>) attributes {dimension_semantics = [#tpu.dimension_semantics<parallel>], iteration_bounds = array<i64: 1>, scalar_prefetch = 0 : i64, scratch_operands = 0 : i64, tpu.core_type = #tpu.core_type<tc>, window_params = [{transform_indices = @transform_0, window_bounds = array<i64: 16, 32>}, {transform_indices = @transform_1, window_bounds = array<i64: 16, 32>}, {transform_indices = @transform_2, window_bounds = array<i64: 16, 32>}, {transform_indices = @transform_3, window_bounds = array<i64: 16, 32>}, {transform_indices = @transform_4, window_bounds = array<i64: 16, 32>}]} {
    %c0 = arith.constant 0 : index
    %c0_0 = arith.constant 0 : index
    %0 = vector.load %arg1[%c0, %c0_0] : memref<16x32xbf16, #tpu.memory_space<vmem>>, vector<16x32xbf16>
    %c0_1 = arith.constant 0 : index
    %c0_2 = arith.constant 0 : index
    %1 = vector.load %arg2[%c0_1, %c0_2] : memref<16x32xbf16, #tpu.memory_space<vmem>>, vector<16x32xbf16>
    %2 = arith.maximumf %0, %1 : vector<16x32xbf16>
    %c0_3 = arith.constant 0 : index
    %c0_4 = arith.constant 0 : index
    %3 = vector.load %arg3[%c0_3, %c0_4] : memref<16x32xbf16, #tpu.memory_space<vmem>>, vector<16x32xbf16>
    %4 = arith.maximumf %2, %3 : vector<16x32xbf16>
    %c0_5 = arith.constant 0 : index
    %c0_6 = arith.constant 0 : index
    %5 = vector.load %arg4[%c0_5, %c0_6] : memref<16x32xbf16, #tpu.memory_space<vmem>>, vector<16x32xbf16>
    %6 = arith.maximumf %4, %5 : vector<16x32xbf16>
    %c0_7 = arith.constant 0 : index
    %c0_8 = arith.constant 0 : index
    %7 = vector.load %arg5[%c0_7, %c0_8] : memref<16x32xbf16, #tpu.memory_space<vmem>>, vector<16x32xbf16>
    tpu.vector_store %arg5[%c0_7, %c0_8], %6 {strides = array<i32>} : memref<16x32xbf16, #tpu.memory_space<vmem>>, vector<16x32xbf16>,
    return
  }
  func.func @transform_0(%arg0: i32) -> (i32, i32) {
    %c0_i32 = arith.constant 0 : i32
    %c0_i32_0 = arith.constant 0 : i32
    return %arg0, %c0_i32 : i32, i32
  }
  func.func @transform_1(%arg0: i32) -> (i32, i32) {
    %c0_i32 = arith.constant 0 : i32
    %c0_i32_0 = arith.constant 0 : i32
    return %arg0, %c0_i32 : i32, i32
  }
  func.func @transform_2(%arg0: i32) -> (i32, i32) {
    %c0_i32 = arith.constant 0 : i32
    %c0_i32_0 = arith.constant 0 : i32
    return %arg0, %c0_i32 : i32, i32
  }
  func.func @transform_3(%arg0: i32) -> (i32, i32) {
    %c0_i32 = arith.constant 0 : i32
    %c0_i32_0 = arith.constant 0 : i32
    return %arg0, %c0_i32 : i32, i32
  }
  func.func @transform_4(%arg0: i32) -> (i32, i32) {
    %c0_i32 = arith.constant 0 : i32
    %c0_i32_0 = arith.constant 0 : i32
    return %arg0, %c0_i32 : i32, i32
  }
}

module attributes {stable_mosaic.version = 11 : i64} {
  func.func @_conv_kernel(%arg0: i32, %arg1: memref<128x4xbf16, #tpu.memory_space<vmem>>, %arg2: memref<4x8xbf16, #tpu.memory_space<vmem>>, %arg3: memref<1x8xf32, #tpu.memory_space<vmem>>, %arg4: memref<128x8xbf16, #tpu.memory_space<vmem>>) attributes {dimension_semantics = [#tpu.dimension_semantics<parallel>], iteration_bounds = array<i64: 1>, scalar_prefetch = 0 : i64, scratch_operands = 0 : i64, tpu.core_type = #tpu.core_type<tc>, window_params = [{transform_indices = @transform_0, window_bounds = array<i64: 128, 4>}, {pipeline_mode = #tpu.pipeline_mode<synchronous>, transform_indices = @transform_1, window_bounds = array<i64: 4, 8>}, {pipeline_mode = #tpu.pipeline_mode<synchronous>, transform_indices = @transform_2, window_bounds = array<i64: 1, 8>}, {transform_indices = @transform_3, window_bounds = array<i64: 128, 8>}]} {
    %c0 = arith.constant 0 : index
    %c0_0 = arith.constant 0 : index
    %0 = vector.load %arg1[%c0, %c0_0] : memref<128x4xbf16, #tpu.memory_space<vmem>>, vector<128x4xbf16>
    %c0_1 = arith.constant 0 : index
    %c0_2 = arith.constant 0 : index
    %1 = vector.load %arg2[%c0_1, %c0_2] : memref<4x8xbf16, #tpu.memory_space<vmem>>, vector<4x8xbf16>
    %cst = arith.constant dense<0.000000e+00> : vector<128x8xf32>
    %2 = tpu.matmul %0, %1, %cst {dimension_numbers = #tpu.dot_dimension_numbers<[1], [0], [0], [1], [0, 0, 1, 1], [], []>} : vector<128x4xbf16>, vector<4x8xbf16>, vector<128x8xf32> -> vector<128x8xf32>
    %c0_3 = arith.constant 0 : index
    %c0_4 = arith.constant 0 : index
    %3 = vector.load %arg3[%c0_3, %c0_4] : memref<1x8xf32, #tpu.memory_space<vmem>>, vector<1x8xf32>
    %4 = vector.broadcast %3 : vector<1x8xf32> to vector<128x8xf32>
    %5 = arith.addf %2, %4 : vector<128x8xf32>
    %6 = arith.truncf %5 : vector<128x8xf32> to vector<128x8xbf16>
    %c0_5 = arith.constant 0 : index
    %c0_6 = arith.constant 0 : index
    %7 = vector.load %arg4[%c0_5, %c0_6] : memref<128x8xbf16, #tpu.memory_space<vmem>>, vector<128x8xbf16>
    tpu.vector_store %arg4[%c0_5, %c0_6], %6 {strides = array<i32>} : memref<128x8xbf16, #tpu.memory_space<vmem>>, vector<128x8xbf16>,
    return
  }
  func.func @transform_0(%arg0: i32) -> (i32, i32) {
    %c0_i32 = arith.constant 0 : i32
    %c0_i32_0 = arith.constant 0 : i32
    return %arg0, %c0_i32 : i32, i32
  }
  func.func @transform_1(%arg0: i32) -> (i32, i32) {
    %c0_i32 = arith.constant 0 : i32
    %c0_i32_0 = arith.constant 0 : i32
    %c0_i32_1 = arith.constant 0 : i32
    return %c0_i32, %c0_i32_0 : i32, i32
  }
  func.func @transform_2(%arg0: i32) -> (i32, i32) {
    %c0_i32 = arith.constant 0 : i32
    %c0_i32_0 = arith.constant 0 : i32
    %c0_i32_1 = arith.constant 0 : i32
    return %c0_i32, %c0_i32_0 : i32, i32
  }
  func.func @transform_3(%arg0: i32) -> (i32, i32) {
    %c0_i32 = arith.constant 0 : i32
    %c0_i32_0 = arith.constant 0 : i32
    return %arg0, %c0_i32 : i32, i32
  }
}

module attributes {stable_mosaic.version = 11 : i64} {
  func.func @_conv_kernel(%arg0: i32, %arg1: memref<128x36xbf16, #tpu.memory_space<vmem>>, %arg2: memref<36x8xbf16, #tpu.memory_space<vmem>>, %arg3: memref<1x8xf32, #tpu.memory_space<vmem>>, %arg4: memref<128x8xbf16, #tpu.memory_space<vmem>>) attributes {dimension_semantics = [#tpu.dimension_semantics<parallel>], iteration_bounds = array<i64: 1>, scalar_prefetch = 0 : i64, scratch_operands = 0 : i64, tpu.core_type = #tpu.core_type<tc>, window_params = [{transform_indices = @transform_0, window_bounds = array<i64: 128, 36>}, {pipeline_mode = #tpu.pipeline_mode<synchronous>, transform_indices = @transform_1, window_bounds = array<i64: 36, 8>}, {pipeline_mode = #tpu.pipeline_mode<synchronous>, transform_indices = @transform_2, window_bounds = array<i64: 1, 8>}, {transform_indices = @transform_3, window_bounds = array<i64: 128, 8>}]} {
    %c0 = arith.constant 0 : index
    %c0_0 = arith.constant 0 : index
    %0 = vector.load %arg1[%c0, %c0_0] : memref<128x36xbf16, #tpu.memory_space<vmem>>, vector<128x36xbf16>
    %c0_1 = arith.constant 0 : index
    %c0_2 = arith.constant 0 : index
    %1 = vector.load %arg2[%c0_1, %c0_2] : memref<36x8xbf16, #tpu.memory_space<vmem>>, vector<36x8xbf16>
    %cst = arith.constant dense<0.000000e+00> : vector<128x8xf32>
    %2 = tpu.matmul %0, %1, %cst {dimension_numbers = #tpu.dot_dimension_numbers<[1], [0], [0], [1], [0, 0, 1, 1], [], []>} : vector<128x36xbf16>, vector<36x8xbf16>, vector<128x8xf32> -> vector<128x8xf32>
    %c0_3 = arith.constant 0 : index
    %c0_4 = arith.constant 0 : index
    %3 = vector.load %arg3[%c0_3, %c0_4] : memref<1x8xf32, #tpu.memory_space<vmem>>, vector<1x8xf32>
    %4 = vector.broadcast %3 : vector<1x8xf32> to vector<128x8xf32>
    %5 = arith.addf %2, %4 : vector<128x8xf32>
    %cst_5 = arith.constant 0.000000e+00 : f32
    %6 = vector.broadcast %cst_5 : f32 to vector<128x8xf32>
    %7 = arith.maximumf %5, %6 : vector<128x8xf32>
    %8 = arith.truncf %7 : vector<128x8xf32> to vector<128x8xbf16>
    %c0_6 = arith.constant 0 : index
    %c0_7 = arith.constant 0 : index
    %9 = vector.load %arg4[%c0_6, %c0_7] : memref<128x8xbf16, #tpu.memory_space<vmem>>, vector<128x8xbf16>
    tpu.vector_store %arg4[%c0_6, %c0_7], %8 {strides = array<i32>} : memref<128x8xbf16, #tpu.memory_space<vmem>>, vector<128x8xbf16>,
    return
  }
  func.func @transform_0(%arg0: i32) -> (i32, i32) {
    %c0_i32 = arith.constant 0 : i32
    %c0_i32_0 = arith.constant 0 : i32
    return %arg0, %c0_i32 : i32, i32
  }
  func.func @transform_1(%arg0: i32) -> (i32, i32) {
    %c0_i32 = arith.constant 0 : i32
    %c0_i32_0 = arith.constant 0 : i32
    %c0_i32_1 = arith.constant 0 : i32
    return %c0_i32, %c0_i32_0 : i32, i32
  }
  func.func @transform_2(%arg0: i32) -> (i32, i32) {
    %c0_i32 = arith.constant 0 : i32
    %c0_i32_0 = arith.constant 0 : i32
    %c0_i32_1 = arith.constant 0 : i32
    return %c0_i32, %c0_i32_0 : i32, i32
  }
  func.func @transform_3(%arg0: i32) -> (i32, i32) {
    %c0_i32 = arith.constant 0 : i32
    %c0_i32_0 = arith.constant 0 : i32
    return %arg0, %c0_i32 : i32, i32
  }
}

module attributes {stable_mosaic.version = 11 : i64} {
  func.func @_conv_kernel(%arg0: i32, %arg1: memref<128x72xbf16, #tpu.memory_space<vmem>>, %arg2: memref<72x8xbf16, #tpu.memory_space<vmem>>, %arg3: memref<1x8xf32, #tpu.memory_space<vmem>>, %arg4: memref<128x8xbf16, #tpu.memory_space<vmem>>, %arg5: memref<128x8xbf16, #tpu.memory_space<vmem>>) attributes {dimension_semantics = [#tpu.dimension_semantics<parallel>], iteration_bounds = array<i64: 1>, scalar_prefetch = 0 : i64, scratch_operands = 0 : i64, tpu.core_type = #tpu.core_type<tc>, window_params = [{transform_indices = @transform_0, window_bounds = array<i64: 128, 72>}, {pipeline_mode = #tpu.pipeline_mode<synchronous>, transform_indices = @transform_1, window_bounds = array<i64: 72, 8>}, {pipeline_mode = #tpu.pipeline_mode<synchronous>, transform_indices = @transform_2, window_bounds = array<i64: 1, 8>}, {transform_indices = @transform_3, window_bounds = array<i64: 128, 8>}, {transform_indices = @transform_4, window_bounds = array<i64: 128, 8>}]} {
    %c0 = arith.constant 0 : index
    %c0_0 = arith.constant 0 : index
    %0 = vector.load %arg1[%c0, %c0_0] : memref<128x72xbf16, #tpu.memory_space<vmem>>, vector<128x72xbf16>
    %c0_1 = arith.constant 0 : index
    %c0_2 = arith.constant 0 : index
    %1 = vector.load %arg2[%c0_1, %c0_2] : memref<72x8xbf16, #tpu.memory_space<vmem>>, vector<72x8xbf16>
    %cst = arith.constant dense<0.000000e+00> : vector<128x8xf32>
    %2 = tpu.matmul %0, %1, %cst {dimension_numbers = #tpu.dot_dimension_numbers<[1], [0], [0], [1], [0, 0, 1, 1], [], []>} : vector<128x72xbf16>, vector<72x8xbf16>, vector<128x8xf32> -> vector<128x8xf32>
    %c0_3 = arith.constant 0 : index
    %c0_4 = arith.constant 0 : index
    %3 = vector.load %arg3[%c0_3, %c0_4] : memref<1x8xf32, #tpu.memory_space<vmem>>, vector<1x8xf32>
    %4 = vector.broadcast %3 : vector<1x8xf32> to vector<128x8xf32>
    %5 = arith.addf %2, %4 : vector<128x8xf32>
    %c0_5 = arith.constant 0 : index
    %c0_6 = arith.constant 0 : index
    %6 = vector.load %arg4[%c0_5, %c0_6] : memref<128x8xbf16, #tpu.memory_space<vmem>>, vector<128x8xbf16>
    %7 = arith.extf %6 : vector<128x8xbf16> to vector<128x8xf32>
    %8 = arith.addf %5, %7 : vector<128x8xf32>
    %cst_7 = arith.constant 0.000000e+00 : f32
    %9 = vector.broadcast %cst_7 : f32 to vector<128x8xf32>
    %10 = arith.maximumf %8, %9 : vector<128x8xf32>
    %11 = arith.truncf %10 : vector<128x8xf32> to vector<128x8xbf16>
    %c0_8 = arith.constant 0 : index
    %c0_9 = arith.constant 0 : index
    %12 = vector.load %arg5[%c0_8, %c0_9] : memref<128x8xbf16, #tpu.memory_space<vmem>>, vector<128x8xbf16>
    tpu.vector_store %arg5[%c0_8, %c0_9], %11 {strides = array<i32>} : memref<128x8xbf16, #tpu.memory_space<vmem>>, vector<128x8xbf16>,
    return
  }
  func.func @transform_0(%arg0: i32) -> (i32, i32) {
    %c0_i32 = arith.constant 0 : i32
    %c0_i32_0 = arith.constant 0 : i32
    return %arg0, %c0_i32 : i32, i32
  }
  func.func @transform_1(%arg0: i32) -> (i32, i32) {
    %c0_i32 = arith.constant 0 : i32
    %c0_i32_0 = arith.constant 0 : i32
    %c0_i32_1 = arith.constant 0 : i32
    return %c0_i32, %c0_i32_0 : i32, i32
  }
  func.func @transform_2(%arg0: i32) -> (i32, i32) {
    %c0_i32 = arith.constant 0 : i32
    %c0_i32_0 = arith.constant 0 : i32
    %c0_i32_1 = arith.constant 0 : i32
    return %c0_i32, %c0_i32_0 : i32, i32
  }
  func.func @transform_3(%arg0: i32) -> (i32, i32) {
    %c0_i32 = arith.constant 0 : i32
    %c0_i32_0 = arith.constant 0 : i32
    return %arg0, %c0_i32 : i32, i32
  }
  func.func @transform_4(%arg0: i32) -> (i32, i32) {
    %c0_i32 = arith.constant 0 : i32
    %c0_i32_0 = arith.constant 0 : i32
    return %arg0, %c0_i32 : i32, i32
  }
}

module attributes {stable_mosaic.version = 11 : i64} {
  func.func @_conv_kernel(%arg0: i32, %arg1: memref<128x72xbf16, #tpu.memory_space<vmem>>, %arg2: memref<72x8xbf16, #tpu.memory_space<vmem>>, %arg3: memref<1x8xf32, #tpu.memory_space<vmem>>, %arg4: memref<128x8xbf16, #tpu.memory_space<vmem>>) attributes {dimension_semantics = [#tpu.dimension_semantics<parallel>], iteration_bounds = array<i64: 1>, scalar_prefetch = 0 : i64, scratch_operands = 0 : i64, tpu.core_type = #tpu.core_type<tc>, window_params = [{transform_indices = @transform_0, window_bounds = array<i64: 128, 72>}, {pipeline_mode = #tpu.pipeline_mode<synchronous>, transform_indices = @transform_1, window_bounds = array<i64: 72, 8>}, {pipeline_mode = #tpu.pipeline_mode<synchronous>, transform_indices = @transform_2, window_bounds = array<i64: 1, 8>}, {transform_indices = @transform_3, window_bounds = array<i64: 128, 8>}]} {
    %c0 = arith.constant 0 : index
    %c0_0 = arith.constant 0 : index
    %0 = vector.load %arg1[%c0, %c0_0] : memref<128x72xbf16, #tpu.memory_space<vmem>>, vector<128x72xbf16>
    %c0_1 = arith.constant 0 : index
    %c0_2 = arith.constant 0 : index
    %1 = vector.load %arg2[%c0_1, %c0_2] : memref<72x8xbf16, #tpu.memory_space<vmem>>, vector<72x8xbf16>
    %cst = arith.constant dense<0.000000e+00> : vector<128x8xf32>
    %2 = tpu.matmul %0, %1, %cst {dimension_numbers = #tpu.dot_dimension_numbers<[1], [0], [0], [1], [0, 0, 1, 1], [], []>} : vector<128x72xbf16>, vector<72x8xbf16>, vector<128x8xf32> -> vector<128x8xf32>
    %c0_3 = arith.constant 0 : index
    %c0_4 = arith.constant 0 : index
    %3 = vector.load %arg3[%c0_3, %c0_4] : memref<1x8xf32, #tpu.memory_space<vmem>>, vector<1x8xf32>
    %4 = vector.broadcast %3 : vector<1x8xf32> to vector<128x8xf32>
    %5 = arith.addf %2, %4 : vector<128x8xf32>
    %cst_5 = arith.constant 0.000000e+00 : f32
    %6 = vector.broadcast %cst_5 : f32 to vector<128x8xf32>
    %7 = arith.maximumf %5, %6 : vector<128x8xf32>
    %8 = arith.truncf %7 : vector<128x8xf32> to vector<128x8xbf16>
    %c0_6 = arith.constant 0 : index
    %c0_7 = arith.constant 0 : index
    %9 = vector.load %arg4[%c0_6, %c0_7] : memref<128x8xbf16, #tpu.memory_space<vmem>>, vector<128x8xbf16>
    tpu.vector_store %arg4[%c0_6, %c0_7], %8 {strides = array<i32>} : memref<128x8xbf16, #tpu.memory_space<vmem>>, vector<128x8xbf16>,
    return
  }
  func.func @transform_0(%arg0: i32) -> (i32, i32) {
    %c0_i32 = arith.constant 0 : i32
    %c0_i32_0 = arith.constant 0 : i32
    return %arg0, %c0_i32 : i32, i32
  }
  func.func @transform_1(%arg0: i32) -> (i32, i32) {
    %c0_i32 = arith.constant 0 : i32
    %c0_i32_0 = arith.constant 0 : i32
    %c0_i32_1 = arith.constant 0 : i32
    return %c0_i32, %c0_i32_0 : i32, i32
  }
  func.func @transform_2(%arg0: i32) -> (i32, i32) {
    %c0_i32 = arith.constant 0 : i32
    %c0_i32_0 = arith.constant 0 : i32
    %c0_i32_1 = arith.constant 0 : i32
    return %c0_i32, %c0_i32_0 : i32, i32
  }
  func.func @transform_3(%arg0: i32) -> (i32, i32) {
    %c0_i32 = arith.constant 0 : i32
    %c0_i32_0 = arith.constant 0 : i32
    return %arg0, %c0_i32 : i32, i32
  }
}

module attributes {stable_mosaic.version = 11 : i64} {
  func.func @_conv_kernel(%arg0: i32, %arg1: memref<32x8xbf16, #tpu.memory_space<vmem>>, %arg2: memref<8x16xbf16, #tpu.memory_space<vmem>>, %arg3: memref<1x16xf32, #tpu.memory_space<vmem>>, %arg4: memref<32x16xbf16, #tpu.memory_space<vmem>>) attributes {dimension_semantics = [#tpu.dimension_semantics<parallel>], iteration_bounds = array<i64: 1>, scalar_prefetch = 0 : i64, scratch_operands = 0 : i64, tpu.core_type = #tpu.core_type<tc>, window_params = [{transform_indices = @transform_0, window_bounds = array<i64: 32, 8>}, {pipeline_mode = #tpu.pipeline_mode<synchronous>, transform_indices = @transform_1, window_bounds = array<i64: 8, 16>}, {pipeline_mode = #tpu.pipeline_mode<synchronous>, transform_indices = @transform_2, window_bounds = array<i64: 1, 16>}, {transform_indices = @transform_3, window_bounds = array<i64: 32, 16>}]} {
    %c0 = arith.constant 0 : index
    %c0_0 = arith.constant 0 : index
    %0 = vector.load %arg1[%c0, %c0_0] : memref<32x8xbf16, #tpu.memory_space<vmem>>, vector<32x8xbf16>
    %c0_1 = arith.constant 0 : index
    %c0_2 = arith.constant 0 : index
    %1 = vector.load %arg2[%c0_1, %c0_2] : memref<8x16xbf16, #tpu.memory_space<vmem>>, vector<8x16xbf16>
    %cst = arith.constant dense<0.000000e+00> : vector<32x16xf32>
    %2 = tpu.matmul %0, %1, %cst {dimension_numbers = #tpu.dot_dimension_numbers<[1], [0], [0], [1], [0, 0, 1, 1], [], []>} : vector<32x8xbf16>, vector<8x16xbf16>, vector<32x16xf32> -> vector<32x16xf32>
    %c0_3 = arith.constant 0 : index
    %c0_4 = arith.constant 0 : index
    %3 = vector.load %arg3[%c0_3, %c0_4] : memref<1x16xf32, #tpu.memory_space<vmem>>, vector<1x16xf32>
    %4 = vector.broadcast %3 : vector<1x16xf32> to vector<32x16xf32>
    %5 = arith.addf %2, %4 : vector<32x16xf32>
    %6 = arith.truncf %5 : vector<32x16xf32> to vector<32x16xbf16>
    %c0_5 = arith.constant 0 : index
    %c0_6 = arith.constant 0 : index
    %7 = vector.load %arg4[%c0_5, %c0_6] : memref<32x16xbf16, #tpu.memory_space<vmem>>, vector<32x16xbf16>
    tpu.vector_store %arg4[%c0_5, %c0_6], %6 {strides = array<i32>} : memref<32x16xbf16, #tpu.memory_space<vmem>>, vector<32x16xbf16>,
    return
  }
  func.func @transform_0(%arg0: i32) -> (i32, i32) {
    %c0_i32 = arith.constant 0 : i32
    %c0_i32_0 = arith.constant 0 : i32
    return %arg0, %c0_i32 : i32, i32
  }
  func.func @transform_1(%arg0: i32) -> (i32, i32) {
    %c0_i32 = arith.constant 0 : i32
    %c0_i32_0 = arith.constant 0 : i32
    %c0_i32_1 = arith.constant 0 : i32
    return %c0_i32, %c0_i32_0 : i32, i32
  }
  func.func @transform_2(%arg0: i32) -> (i32, i32) {
    %c0_i32 = arith.constant 0 : i32
    %c0_i32_0 = arith.constant 0 : i32
    %c0_i32_1 = arith.constant 0 : i32
    return %c0_i32, %c0_i32_0 : i32, i32
  }
  func.func @transform_3(%arg0: i32) -> (i32, i32) {
    %c0_i32 = arith.constant 0 : i32
    %c0_i32_0 = arith.constant 0 : i32
    return %arg0, %c0_i32 : i32, i32
  }
}

module attributes {stable_mosaic.version = 11 : i64} {
  func.func @_conv_kernel(%arg0: i32, %arg1: memref<32x72xbf16, #tpu.memory_space<vmem>>, %arg2: memref<72x16xbf16, #tpu.memory_space<vmem>>, %arg3: memref<1x16xf32, #tpu.memory_space<vmem>>, %arg4: memref<32x16xbf16, #tpu.memory_space<vmem>>) attributes {dimension_semantics = [#tpu.dimension_semantics<parallel>], iteration_bounds = array<i64: 1>, scalar_prefetch = 0 : i64, scratch_operands = 0 : i64, tpu.core_type = #tpu.core_type<tc>, window_params = [{transform_indices = @transform_0, window_bounds = array<i64: 32, 72>}, {pipeline_mode = #tpu.pipeline_mode<synchronous>, transform_indices = @transform_1, window_bounds = array<i64: 72, 16>}, {pipeline_mode = #tpu.pipeline_mode<synchronous>, transform_indices = @transform_2, window_bounds = array<i64: 1, 16>}, {transform_indices = @transform_3, window_bounds = array<i64: 32, 16>}]} {
    %c0 = arith.constant 0 : index
    %c0_0 = arith.constant 0 : index
    %0 = vector.load %arg1[%c0, %c0_0] : memref<32x72xbf16, #tpu.memory_space<vmem>>, vector<32x72xbf16>
    %c0_1 = arith.constant 0 : index
    %c0_2 = arith.constant 0 : index
    %1 = vector.load %arg2[%c0_1, %c0_2] : memref<72x16xbf16, #tpu.memory_space<vmem>>, vector<72x16xbf16>
    %cst = arith.constant dense<0.000000e+00> : vector<32x16xf32>
    %2 = tpu.matmul %0, %1, %cst {dimension_numbers = #tpu.dot_dimension_numbers<[1], [0], [0], [1], [0, 0, 1, 1], [], []>} : vector<32x72xbf16>, vector<72x16xbf16>, vector<32x16xf32> -> vector<32x16xf32>
    %c0_3 = arith.constant 0 : index
    %c0_4 = arith.constant 0 : index
    %3 = vector.load %arg3[%c0_3, %c0_4] : memref<1x16xf32, #tpu.memory_space<vmem>>, vector<1x16xf32>
    %4 = vector.broadcast %3 : vector<1x16xf32> to vector<32x16xf32>
    %5 = arith.addf %2, %4 : vector<32x16xf32>
    %cst_5 = arith.constant 0.000000e+00 : f32
    %6 = vector.broadcast %cst_5 : f32 to vector<32x16xf32>
    %7 = arith.maximumf %5, %6 : vector<32x16xf32>
    %8 = arith.truncf %7 : vector<32x16xf32> to vector<32x16xbf16>
    %c0_6 = arith.constant 0 : index
    %c0_7 = arith.constant 0 : index
    %9 = vector.load %arg4[%c0_6, %c0_7] : memref<32x16xbf16, #tpu.memory_space<vmem>>, vector<32x16xbf16>
    tpu.vector_store %arg4[%c0_6, %c0_7], %8 {strides = array<i32>} : memref<32x16xbf16, #tpu.memory_space<vmem>>, vector<32x16xbf16>,
    return
  }
  func.func @transform_0(%arg0: i32) -> (i32, i32) {
    %c0_i32 = arith.constant 0 : i32
    %c0_i32_0 = arith.constant 0 : i32
    return %arg0, %c0_i32 : i32, i32
  }
  func.func @transform_1(%arg0: i32) -> (i32, i32) {
    %c0_i32 = arith.constant 0 : i32
    %c0_i32_0 = arith.constant 0 : i32
    %c0_i32_1 = arith.constant 0 : i32
    return %c0_i32, %c0_i32_0 : i32, i32
  }
  func.func @transform_2(%arg0: i32) -> (i32, i32) {
    %c0_i32 = arith.constant 0 : i32
    %c0_i32_0 = arith.constant 0 : i32
    %c0_i32_1 = arith.constant 0 : i32
    return %c0_i32, %c0_i32_0 : i32, i32
  }
  func.func @transform_3(%arg0: i32) -> (i32, i32) {
    %c0_i32 = arith.constant 0 : i32
    %c0_i32_0 = arith.constant 0 : i32
    return %arg0, %c0_i32 : i32, i32
  }
}

module attributes {stable_mosaic.version = 11 : i64} {
  func.func @_conv_kernel(%arg0: i32, %arg1: memref<32x144xbf16, #tpu.memory_space<vmem>>, %arg2: memref<144x16xbf16, #tpu.memory_space<vmem>>, %arg3: memref<1x16xf32, #tpu.memory_space<vmem>>, %arg4: memref<32x16xbf16, #tpu.memory_space<vmem>>, %arg5: memref<32x16xbf16, #tpu.memory_space<vmem>>) attributes {dimension_semantics = [#tpu.dimension_semantics<parallel>], iteration_bounds = array<i64: 1>, scalar_prefetch = 0 : i64, scratch_operands = 0 : i64, tpu.core_type = #tpu.core_type<tc>, window_params = [{transform_indices = @transform_0, window_bounds = array<i64: 32, 144>}, {pipeline_mode = #tpu.pipeline_mode<synchronous>, transform_indices = @transform_1, window_bounds = array<i64: 144, 16>}, {pipeline_mode = #tpu.pipeline_mode<synchronous>, transform_indices = @transform_2, window_bounds = array<i64: 1, 16>}, {transform_indices = @transform_3, window_bounds = array<i64: 32, 16>}, {transform_indices = @transform_4, window_bounds = array<i64: 32, 16>}]} {
    %c0 = arith.constant 0 : index
    %c0_0 = arith.constant 0 : index
    %0 = vector.load %arg1[%c0, %c0_0] : memref<32x144xbf16, #tpu.memory_space<vmem>>, vector<32x144xbf16>
    %c0_1 = arith.constant 0 : index
    %c0_2 = arith.constant 0 : index
    %1 = vector.load %arg2[%c0_1, %c0_2] : memref<144x16xbf16, #tpu.memory_space<vmem>>, vector<144x16xbf16>
    %cst = arith.constant dense<0.000000e+00> : vector<32x16xf32>
    %2 = tpu.matmul %0, %1, %cst {dimension_numbers = #tpu.dot_dimension_numbers<[1], [0], [0], [1], [0, 0, 1, 1], [], []>} : vector<32x144xbf16>, vector<144x16xbf16>, vector<32x16xf32> -> vector<32x16xf32>
    %c0_3 = arith.constant 0 : index
    %c0_4 = arith.constant 0 : index
    %3 = vector.load %arg3[%c0_3, %c0_4] : memref<1x16xf32, #tpu.memory_space<vmem>>, vector<1x16xf32>
    %4 = vector.broadcast %3 : vector<1x16xf32> to vector<32x16xf32>
    %5 = arith.addf %2, %4 : vector<32x16xf32>
    %c0_5 = arith.constant 0 : index
    %c0_6 = arith.constant 0 : index
    %6 = vector.load %arg4[%c0_5, %c0_6] : memref<32x16xbf16, #tpu.memory_space<vmem>>, vector<32x16xbf16>
    %7 = arith.extf %6 : vector<32x16xbf16> to vector<32x16xf32>
    %8 = arith.addf %5, %7 : vector<32x16xf32>
    %cst_7 = arith.constant 0.000000e+00 : f32
    %9 = vector.broadcast %cst_7 : f32 to vector<32x16xf32>
    %10 = arith.maximumf %8, %9 : vector<32x16xf32>
    %11 = arith.truncf %10 : vector<32x16xf32> to vector<32x16xbf16>
    %c0_8 = arith.constant 0 : index
    %c0_9 = arith.constant 0 : index
    %12 = vector.load %arg5[%c0_8, %c0_9] : memref<32x16xbf16, #tpu.memory_space<vmem>>, vector<32x16xbf16>
    tpu.vector_store %arg5[%c0_8, %c0_9], %11 {strides = array<i32>} : memref<32x16xbf16, #tpu.memory_space<vmem>>, vector<32x16xbf16>,
    return
  }
  func.func @transform_0(%arg0: i32) -> (i32, i32) {
    %c0_i32 = arith.constant 0 : i32
    %c0_i32_0 = arith.constant 0 : i32
    return %arg0, %c0_i32 : i32, i32
  }
  func.func @transform_1(%arg0: i32) -> (i32, i32) {
    %c0_i32 = arith.constant 0 : i32
    %c0_i32_0 = arith.constant 0 : i32
    %c0_i32_1 = arith.constant 0 : i32
    return %c0_i32, %c0_i32_0 : i32, i32
  }
  func.func @transform_2(%arg0: i32) -> (i32, i32) {
    %c0_i32 = arith.constant 0 : i32
    %c0_i32_0 = arith.constant 0 : i32
    %c0_i32_1 = arith.constant 0 : i32
    return %c0_i32, %c0_i32_0 : i32, i32
  }
  func.func @transform_3(%arg0: i32) -> (i32, i32) {
    %c0_i32 = arith.constant 0 : i32
    %c0_i32_0 = arith.constant 0 : i32
    return %arg0, %c0_i32 : i32, i32
  }
  func.func @transform_4(%arg0: i32) -> (i32, i32) {
    %c0_i32 = arith.constant 0 : i32
    %c0_i32_0 = arith.constant 0 : i32
    return %arg0, %c0_i32 : i32, i32
  }
}

module attributes {stable_mosaic.version = 11 : i64} {
  func.func @_conv_kernel(%arg0: i32, %arg1: memref<32x144xbf16, #tpu.memory_space<vmem>>, %arg2: memref<144x16xbf16, #tpu.memory_space<vmem>>, %arg3: memref<1x16xf32, #tpu.memory_space<vmem>>, %arg4: memref<32x16xbf16, #tpu.memory_space<vmem>>) attributes {dimension_semantics = [#tpu.dimension_semantics<parallel>], iteration_bounds = array<i64: 1>, scalar_prefetch = 0 : i64, scratch_operands = 0 : i64, tpu.core_type = #tpu.core_type<tc>, window_params = [{transform_indices = @transform_0, window_bounds = array<i64: 32, 144>}, {pipeline_mode = #tpu.pipeline_mode<synchronous>, transform_indices = @transform_1, window_bounds = array<i64: 144, 16>}, {pipeline_mode = #tpu.pipeline_mode<synchronous>, transform_indices = @transform_2, window_bounds = array<i64: 1, 16>}, {transform_indices = @transform_3, window_bounds = array<i64: 32, 16>}]} {
    %c0 = arith.constant 0 : index
    %c0_0 = arith.constant 0 : index
    %0 = vector.load %arg1[%c0, %c0_0] : memref<32x144xbf16, #tpu.memory_space<vmem>>, vector<32x144xbf16>
    %c0_1 = arith.constant 0 : index
    %c0_2 = arith.constant 0 : index
    %1 = vector.load %arg2[%c0_1, %c0_2] : memref<144x16xbf16, #tpu.memory_space<vmem>>, vector<144x16xbf16>
    %cst = arith.constant dense<0.000000e+00> : vector<32x16xf32>
    %2 = tpu.matmul %0, %1, %cst {dimension_numbers = #tpu.dot_dimension_numbers<[1], [0], [0], [1], [0, 0, 1, 1], [], []>} : vector<32x144xbf16>, vector<144x16xbf16>, vector<32x16xf32> -> vector<32x16xf32>
    %c0_3 = arith.constant 0 : index
    %c0_4 = arith.constant 0 : index
    %3 = vector.load %arg3[%c0_3, %c0_4] : memref<1x16xf32, #tpu.memory_space<vmem>>, vector<1x16xf32>
    %4 = vector.broadcast %3 : vector<1x16xf32> to vector<32x16xf32>
    %5 = arith.addf %2, %4 : vector<32x16xf32>
    %cst_5 = arith.constant 0.000000e+00 : f32
    %6 = vector.broadcast %cst_5 : f32 to vector<32x16xf32>
    %7 = arith.maximumf %5, %6 : vector<32x16xf32>
    %8 = arith.truncf %7 : vector<32x16xf32> to vector<32x16xbf16>
    %c0_6 = arith.constant 0 : index
    %c0_7 = arith.constant 0 : index
    %9 = vector.load %arg4[%c0_6, %c0_7] : memref<32x16xbf16, #tpu.memory_space<vmem>>, vector<32x16xbf16>
    tpu.vector_store %arg4[%c0_6, %c0_7], %8 {strides = array<i32>} : memref<32x16xbf16, #tpu.memory_space<vmem>>, vector<32x16xbf16>,
    return
  }
  func.func @transform_0(%arg0: i32) -> (i32, i32) {
    %c0_i32 = arith.constant 0 : i32
    %c0_i32_0 = arith.constant 0 : i32
    return %arg0, %c0_i32 : i32, i32
  }
  func.func @transform_1(%arg0: i32) -> (i32, i32) {
    %c0_i32 = arith.constant 0 : i32
    %c0_i32_0 = arith.constant 0 : i32
    %c0_i32_1 = arith.constant 0 : i32
    return %c0_i32, %c0_i32_0 : i32, i32
  }
  func.func @transform_2(%arg0: i32) -> (i32, i32) {
    %c0_i32 = arith.constant 0 : i32
    %c0_i32_0 = arith.constant 0 : i32
    %c0_i32_1 = arith.constant 0 : i32
    return %c0_i32, %c0_i32_0 : i32, i32
  }
  func.func @transform_3(%arg0: i32) -> (i32, i32) {
    %c0_i32 = arith.constant 0 : i32
    %c0_i32_0 = arith.constant 0 : i32
    return %arg0, %c0_i32 : i32, i32
  }
}

module attributes {stable_mosaic.version = 11 : i64} {
  func.func @_maxpool_kernel(%arg0: i32, %arg1: memref<16x80xbf16, #tpu.memory_space<vmem>>, %arg2: memref<16x80xbf16, #tpu.memory_space<vmem>>, %arg3: memref<16x80xbf16, #tpu.memory_space<vmem>>, %arg4: memref<16x80xbf16, #tpu.memory_space<vmem>>, %arg5: memref<16x80xbf16, #tpu.memory_space<vmem>>) attributes {dimension_semantics = [#tpu.dimension_semantics<parallel>], iteration_bounds = array<i64: 1>, scalar_prefetch = 0 : i64, scratch_operands = 0 : i64, tpu.core_type = #tpu.core_type<tc>, window_params = [{transform_indices = @transform_0, window_bounds = array<i64: 16, 80>}, {transform_indices = @transform_1, window_bounds = array<i64: 16, 80>}, {transform_indices = @transform_2, window_bounds = array<i64: 16, 80>}, {transform_indices = @transform_3, window_bounds = array<i64: 16, 80>}, {transform_indices = @transform_4, window_bounds = array<i64: 16, 80>}]} {
    %c0 = arith.constant 0 : index
    %c0_0 = arith.constant 0 : index
    %0 = vector.load %arg1[%c0, %c0_0] : memref<16x80xbf16, #tpu.memory_space<vmem>>, vector<16x80xbf16>
    %c0_1 = arith.constant 0 : index
    %c0_2 = arith.constant 0 : index
    %1 = vector.load %arg2[%c0_1, %c0_2] : memref<16x80xbf16, #tpu.memory_space<vmem>>, vector<16x80xbf16>
    %2 = arith.maximumf %0, %1 : vector<16x80xbf16>
    %c0_3 = arith.constant 0 : index
    %c0_4 = arith.constant 0 : index
    %3 = vector.load %arg3[%c0_3, %c0_4] : memref<16x80xbf16, #tpu.memory_space<vmem>>, vector<16x80xbf16>
    %4 = arith.maximumf %2, %3 : vector<16x80xbf16>
    %c0_5 = arith.constant 0 : index
    %c0_6 = arith.constant 0 : index
    %5 = vector.load %arg4[%c0_5, %c0_6] : memref<16x80xbf16, #tpu.memory_space<vmem>>, vector<16x80xbf16>
    %6 = arith.maximumf %4, %5 : vector<16x80xbf16>
    %c0_7 = arith.constant 0 : index
    %c0_8 = arith.constant 0 : index
    %7 = vector.load %arg5[%c0_7, %c0_8] : memref<16x80xbf16, #tpu.memory_space<vmem>>, vector<16x80xbf16>
    tpu.vector_store %arg5[%c0_7, %c0_8], %6 {strides = array<i32>} : memref<16x80xbf16, #tpu.memory_space<vmem>>, vector<16x80xbf16>,
    return
  }
  func.func @transform_0(%arg0: i32) -> (i32, i32) {
    %c0_i32 = arith.constant 0 : i32
    %c0_i32_0 = arith.constant 0 : i32
    return %arg0, %c0_i32 : i32, i32
  }
  func.func @transform_1(%arg0: i32) -> (i32, i32) {
    %c0_i32 = arith.constant 0 : i32
    %c0_i32_0 = arith.constant 0 : i32
    return %arg0, %c0_i32 : i32, i32
  }
  func.func @transform_2(%arg0: i32) -> (i32, i32) {
    %c0_i32 = arith.constant 0 : i32
    %c0_i32_0 = arith.constant 0 : i32
    return %arg0, %c0_i32 : i32, i32
  }
  func.func @transform_3(%arg0: i32) -> (i32, i32) {
    %c0_i32 = arith.constant 0 : i32
    %c0_i32_0 = arith.constant 0 : i32
    return %arg0, %c0_i32 : i32, i32
  }
  func.func @transform_4(%arg0: i32) -> (i32, i32) {
    %c0_i32 = arith.constant 0 : i32
    %c0_i32_0 = arith.constant 0 : i32
    return %arg0, %c0_i32 : i32, i32
  }
}

module attributes {stable_mosaic.version = 11 : i64} {
  func.func @_conv_kernel(%arg0: i32, %arg1: memref<32x16xbf16, #tpu.memory_space<vmem>>, %arg2: memref<16x32xbf16, #tpu.memory_space<vmem>>, %arg3: memref<1x32xf32, #tpu.memory_space<vmem>>, %arg4: memref<32x32xbf16, #tpu.memory_space<vmem>>) attributes {dimension_semantics = [#tpu.dimension_semantics<parallel>], iteration_bounds = array<i64: 1>, scalar_prefetch = 0 : i64, scratch_operands = 0 : i64, tpu.core_type = #tpu.core_type<tc>, window_params = [{transform_indices = @transform_0, window_bounds = array<i64: 32, 16>}, {pipeline_mode = #tpu.pipeline_mode<synchronous>, transform_indices = @transform_1, window_bounds = array<i64: 16, 32>}, {pipeline_mode = #tpu.pipeline_mode<synchronous>, transform_indices = @transform_2, window_bounds = array<i64: 1, 32>}, {transform_indices = @transform_3, window_bounds = array<i64: 32, 32>}]} {
    %c0 = arith.constant 0 : index
    %c0_0 = arith.constant 0 : index
    %0 = vector.load %arg1[%c0, %c0_0] : memref<32x16xbf16, #tpu.memory_space<vmem>>, vector<32x16xbf16>
    %c0_1 = arith.constant 0 : index
    %c0_2 = arith.constant 0 : index
    %1 = vector.load %arg2[%c0_1, %c0_2] : memref<16x32xbf16, #tpu.memory_space<vmem>>, vector<16x32xbf16>
    %cst = arith.constant dense<0.000000e+00> : vector<32x32xf32>
    %2 = tpu.matmul %0, %1, %cst {dimension_numbers = #tpu.dot_dimension_numbers<[1], [0], [0], [1], [0, 0, 1, 1], [], []>} : vector<32x16xbf16>, vector<16x32xbf16>, vector<32x32xf32> -> vector<32x32xf32>
    %c0_3 = arith.constant 0 : index
    %c0_4 = arith.constant 0 : index
    %3 = vector.load %arg3[%c0_3, %c0_4] : memref<1x32xf32, #tpu.memory_space<vmem>>, vector<1x32xf32>
    %4 = vector.broadcast %3 : vector<1x32xf32> to vector<32x32xf32>
    %5 = arith.addf %2, %4 : vector<32x32xf32>
    %6 = arith.truncf %5 : vector<32x32xf32> to vector<32x32xbf16>
    %c0_5 = arith.constant 0 : index
    %c0_6 = arith.constant 0 : index
    %7 = vector.load %arg4[%c0_5, %c0_6] : memref<32x32xbf16, #tpu.memory_space<vmem>>, vector<32x32xbf16>
    tpu.vector_store %arg4[%c0_5, %c0_6], %6 {strides = array<i32>} : memref<32x32xbf16, #tpu.memory_space<vmem>>, vector<32x32xbf16>,
    return
  }
  func.func @transform_0(%arg0: i32) -> (i32, i32) {
    %c0_i32 = arith.constant 0 : i32
    %c0_i32_0 = arith.constant 0 : i32
    return %arg0, %c0_i32 : i32, i32
  }
  func.func @transform_1(%arg0: i32) -> (i32, i32) {
    %c0_i32 = arith.constant 0 : i32
    %c0_i32_0 = arith.constant 0 : i32
    %c0_i32_1 = arith.constant 0 : i32
    return %c0_i32, %c0_i32_0 : i32, i32
  }
  func.func @transform_2(%arg0: i32) -> (i32, i32) {
    %c0_i32 = arith.constant 0 : i32
    %c0_i32_0 = arith.constant 0 : i32
    %c0_i32_1 = arith.constant 0 : i32
    return %c0_i32, %c0_i32_0 : i32, i32
  }
  func.func @transform_3(%arg0: i32) -> (i32, i32) {
    %c0_i32 = arith.constant 0 : i32
    %c0_i32_0 = arith.constant 0 : i32
    return %arg0, %c0_i32 : i32, i32
  }
}

module attributes {stable_mosaic.version = 11 : i64} {
  func.func @_conv_kernel(%arg0: i32, %arg1: memref<32x144xbf16, #tpu.memory_space<vmem>>, %arg2: memref<144x32xbf16, #tpu.memory_space<vmem>>, %arg3: memref<1x32xf32, #tpu.memory_space<vmem>>, %arg4: memref<32x32xbf16, #tpu.memory_space<vmem>>) attributes {dimension_semantics = [#tpu.dimension_semantics<parallel>], iteration_bounds = array<i64: 1>, scalar_prefetch = 0 : i64, scratch_operands = 0 : i64, tpu.core_type = #tpu.core_type<tc>, window_params = [{transform_indices = @transform_0, window_bounds = array<i64: 32, 144>}, {pipeline_mode = #tpu.pipeline_mode<synchronous>, transform_indices = @transform_1, window_bounds = array<i64: 144, 32>}, {pipeline_mode = #tpu.pipeline_mode<synchronous>, transform_indices = @transform_2, window_bounds = array<i64: 1, 32>}, {transform_indices = @transform_3, window_bounds = array<i64: 32, 32>}]} {
    %c0 = arith.constant 0 : index
    %c0_0 = arith.constant 0 : index
    %0 = vector.load %arg1[%c0, %c0_0] : memref<32x144xbf16, #tpu.memory_space<vmem>>, vector<32x144xbf16>
    %c0_1 = arith.constant 0 : index
    %c0_2 = arith.constant 0 : index
    %1 = vector.load %arg2[%c0_1, %c0_2] : memref<144x32xbf16, #tpu.memory_space<vmem>>, vector<144x32xbf16>
    %cst = arith.constant dense<0.000000e+00> : vector<32x32xf32>
    %2 = tpu.matmul %0, %1, %cst {dimension_numbers = #tpu.dot_dimension_numbers<[1], [0], [0], [1], [0, 0, 1, 1], [], []>} : vector<32x144xbf16>, vector<144x32xbf16>, vector<32x32xf32> -> vector<32x32xf32>
    %c0_3 = arith.constant 0 : index
    %c0_4 = arith.constant 0 : index
    %3 = vector.load %arg3[%c0_3, %c0_4] : memref<1x32xf32, #tpu.memory_space<vmem>>, vector<1x32xf32>
    %4 = vector.broadcast %3 : vector<1x32xf32> to vector<32x32xf32>
    %5 = arith.addf %2, %4 : vector<32x32xf32>
    %cst_5 = arith.constant 0.000000e+00 : f32
    %6 = vector.broadcast %cst_5 : f32 to vector<32x32xf32>
    %7 = arith.maximumf %5, %6 : vector<32x32xf32>
    %8 = arith.truncf %7 : vector<32x32xf32> to vector<32x32xbf16>
    %c0_6 = arith.constant 0 : index
    %c0_7 = arith.constant 0 : index
    %9 = vector.load %arg4[%c0_6, %c0_7] : memref<32x32xbf16, #tpu.memory_space<vmem>>, vector<32x32xbf16>
    tpu.vector_store %arg4[%c0_6, %c0_7], %8 {strides = array<i32>} : memref<32x32xbf16, #tpu.memory_space<vmem>>, vector<32x32xbf16>,
    return
  }
  func.func @transform_0(%arg0: i32) -> (i32, i32) {
    %c0_i32 = arith.constant 0 : i32
    %c0_i32_0 = arith.constant 0 : i32
    return %arg0, %c0_i32 : i32, i32
  }
  func.func @transform_1(%arg0: i32) -> (i32, i32) {
    %c0_i32 = arith.constant 0 : i32
    %c0_i32_0 = arith.constant 0 : i32
    %c0_i32_1 = arith.constant 0 : i32
    return %c0_i32, %c0_i32_0 : i32, i32
  }
  func.func @transform_2(%arg0: i32) -> (i32, i32) {
    %c0_i32 = arith.constant 0 : i32
    %c0_i32_0 = arith.constant 0 : i32
    %c0_i32_1 = arith.constant 0 : i32
    return %c0_i32, %c0_i32_0 : i32, i32
  }
  func.func @transform_3(%arg0: i32) -> (i32, i32) {
    %c0_i32 = arith.constant 0 : i32
    %c0_i32_0 = arith.constant 0 : i32
    return %arg0, %c0_i32 : i32, i32
  }
}

module attributes {stable_mosaic.version = 11 : i64} {
  func.func @_conv_kernel(%arg0: i32, %arg1: memref<32x288xbf16, #tpu.memory_space<vmem>>, %arg2: memref<288x32xbf16, #tpu.memory_space<vmem>>, %arg3: memref<1x32xf32, #tpu.memory_space<vmem>>, %arg4: memref<32x32xbf16, #tpu.memory_space<vmem>>) attributes {dimension_semantics = [#tpu.dimension_semantics<parallel>], iteration_bounds = array<i64: 1>, scalar_prefetch = 0 : i64, scratch_operands = 0 : i64, tpu.core_type = #tpu.core_type<tc>, window_params = [{transform_indices = @transform_0, window_bounds = array<i64: 32, 288>}, {pipeline_mode = #tpu.pipeline_mode<synchronous>, transform_indices = @transform_1, window_bounds = array<i64: 288, 32>}, {pipeline_mode = #tpu.pipeline_mode<synchronous>, transform_indices = @transform_2, window_bounds = array<i64: 1, 32>}, {transform_indices = @transform_3, window_bounds = array<i64: 32, 32>}]} {
    %c0 = arith.constant 0 : index
    %c0_0 = arith.constant 0 : index
    %0 = vector.load %arg1[%c0, %c0_0] : memref<32x288xbf16, #tpu.memory_space<vmem>>, vector<32x288xbf16>
    %c0_1 = arith.constant 0 : index
    %c0_2 = arith.constant 0 : index
    %1 = vector.load %arg2[%c0_1, %c0_2] : memref<288x32xbf16, #tpu.memory_space<vmem>>, vector<288x32xbf16>
    %cst = arith.constant dense<0.000000e+00> : vector<32x32xf32>
    %2 = tpu.matmul %0, %1, %cst {dimension_numbers = #tpu.dot_dimension_numbers<[1], [0], [0], [1], [0, 0, 1, 1], [], []>} : vector<32x288xbf16>, vector<288x32xbf16>, vector<32x32xf32> -> vector<32x32xf32>
    %c0_3 = arith.constant 0 : index
    %c0_4 = arith.constant 0 : index
    %3 = vector.load %arg3[%c0_3, %c0_4] : memref<1x32xf32, #tpu.memory_space<vmem>>, vector<1x32xf32>
    %4 = vector.broadcast %3 : vector<1x32xf32> to vector<32x32xf32>
    %5 = arith.addf %2, %4 : vector<32x32xf32>
    %cst_5 = arith.constant 0.000000e+00 : f32
    %6 = vector.broadcast %cst_5 : f32 to vector<32x32xf32>
    %7 = arith.maximumf %5, %6 : vector<32x32xf32>
    %8 = arith.truncf %7 : vector<32x32xf32> to vector<32x32xbf16>
    %c0_6 = arith.constant 0 : index
    %c0_7 = arith.constant 0 : index
    %9 = vector.load %arg4[%c0_6, %c0_7] : memref<32x32xbf16, #tpu.memory_space<vmem>>, vector<32x32xbf16>
    tpu.vector_store %arg4[%c0_6, %c0_7], %8 {strides = array<i32>} : memref<32x32xbf16, #tpu.memory_space<vmem>>, vector<32x32xbf16>,
    return
  }
  func.func @transform_0(%arg0: i32) -> (i32, i32) {
    %c0_i32 = arith.constant 0 : i32
    %c0_i32_0 = arith.constant 0 : i32
    return %arg0, %c0_i32 : i32, i32
  }
  func.func @transform_1(%arg0: i32) -> (i32, i32) {
    %c0_i32 = arith.constant 0 : i32
    %c0_i32_0 = arith.constant 0 : i32
    %c0_i32_1 = arith.constant 0 : i32
    return %c0_i32, %c0_i32_0 : i32, i32
  }
  func.func @transform_2(%arg0: i32) -> (i32, i32) {
    %c0_i32 = arith.constant 0 : i32
    %c0_i32_0 = arith.constant 0 : i32
    %c0_i32_1 = arith.constant 0 : i32
    return %c0_i32, %c0_i32_0 : i32, i32
  }
  func.func @transform_3(%arg0: i32) -> (i32, i32) {
    %c0_i32 = arith.constant 0 : i32
    %c0_i32_0 = arith.constant 0 : i32
    return %arg0, %c0_i32 : i32, i32
  }
}

module attributes {stable_mosaic.version = 11 : i64} {
  func.func @_conv_kernel(%arg0: i32, %arg1: memref<32x288xbf16, #tpu.memory_space<vmem>>, %arg2: memref<288x32xbf16, #tpu.memory_space<vmem>>, %arg3: memref<1x32xf32, #tpu.memory_space<vmem>>, %arg4: memref<32x32xbf16, #tpu.memory_space<vmem>>, %arg5: memref<32x32xbf16, #tpu.memory_space<vmem>>) attributes {dimension_semantics = [#tpu.dimension_semantics<parallel>], iteration_bounds = array<i64: 1>, scalar_prefetch = 0 : i64, scratch_operands = 0 : i64, tpu.core_type = #tpu.core_type<tc>, window_params = [{transform_indices = @transform_0, window_bounds = array<i64: 32, 288>}, {pipeline_mode = #tpu.pipeline_mode<synchronous>, transform_indices = @transform_1, window_bounds = array<i64: 288, 32>}, {pipeline_mode = #tpu.pipeline_mode<synchronous>, transform_indices = @transform_2, window_bounds = array<i64: 1, 32>}, {transform_indices = @transform_3, window_bounds = array<i64: 32, 32>}, {transform_indices = @transform_4, window_bounds = array<i64: 32, 32>}]} {
    %c0 = arith.constant 0 : index
    %c0_0 = arith.constant 0 : index
    %0 = vector.load %arg1[%c0, %c0_0] : memref<32x288xbf16, #tpu.memory_space<vmem>>, vector<32x288xbf16>
    %c0_1 = arith.constant 0 : index
    %c0_2 = arith.constant 0 : index
    %1 = vector.load %arg2[%c0_1, %c0_2] : memref<288x32xbf16, #tpu.memory_space<vmem>>, vector<288x32xbf16>
    %cst = arith.constant dense<0.000000e+00> : vector<32x32xf32>
    %2 = tpu.matmul %0, %1, %cst {dimension_numbers = #tpu.dot_dimension_numbers<[1], [0], [0], [1], [0, 0, 1, 1], [], []>} : vector<32x288xbf16>, vector<288x32xbf16>, vector<32x32xf32> -> vector<32x32xf32>
    %c0_3 = arith.constant 0 : index
    %c0_4 = arith.constant 0 : index
    %3 = vector.load %arg3[%c0_3, %c0_4] : memref<1x32xf32, #tpu.memory_space<vmem>>, vector<1x32xf32>
    %4 = vector.broadcast %3 : vector<1x32xf32> to vector<32x32xf32>
    %5 = arith.addf %2, %4 : vector<32x32xf32>
    %c0_5 = arith.constant 0 : index
    %c0_6 = arith.constant 0 : index
    %6 = vector.load %arg4[%c0_5, %c0_6] : memref<32x32xbf16, #tpu.memory_space<vmem>>, vector<32x32xbf16>
    %7 = arith.extf %6 : vector<32x32xbf16> to vector<32x32xf32>
    %8 = arith.addf %5, %7 : vector<32x32xf32>
    %cst_7 = arith.constant 0.000000e+00 : f32
    %9 = vector.broadcast %cst_7 : f32 to vector<32x32xf32>
    %10 = arith.maximumf %8, %9 : vector<32x32xf32>
    %11 = arith.truncf %10 : vector<32x32xf32> to vector<32x32xbf16>
    %c0_8 = arith.constant 0 : index
    %c0_9 = arith.constant 0 : index
    %12 = vector.load %arg5[%c0_8, %c0_9] : memref<32x32xbf16, #tpu.memory_space<vmem>>, vector<32x32xbf16>
    tpu.vector_store %arg5[%c0_8, %c0_9], %11 {strides = array<i32>} : memref<32x32xbf16, #tpu.memory_space<vmem>>, vector<32x32xbf16>,
    return
  }
  func.func @transform_0(%arg0: i32) -> (i32, i32) {
    %c0_i32 = arith.constant 0 : i32
    %c0_i32_0 = arith.constant 0 : i32
    return %arg0, %c0_i32 : i32, i32
  }
  func.func @transform_1(%arg0: i32) -> (i32, i32) {
    %c0_i32 = arith.constant 0 : i32
    %c0_i32_0 = arith.constant 0 : i32
    %c0_i32_1 = arith.constant 0 : i32
    return %c0_i32, %c0_i32_0 : i32, i32
  }
  func.func @transform_2(%arg0: i32) -> (i32, i32) {
    %c0_i32 = arith.constant 0 : i32
    %c0_i32_0 = arith.constant 0 : i32
    %c0_i32_1 = arith.constant 0 : i32
    return %c0_i32, %c0_i32_0 : i32, i32
  }
  func.func @transform_3(%arg0: i32) -> (i32, i32) {
    %c0_i32 = arith.constant 0 : i32
    %c0_i32_0 = arith.constant 0 : i32
    return %arg0, %c0_i32 : i32, i32
  }
  func.func @transform_4(%arg0: i32) -> (i32, i32) {
    %c0_i32 = arith.constant 0 : i32
    %c0_i32_0 = arith.constant 0 : i32
    return %arg0, %c0_i32 : i32, i32
  }
}

module attributes {stable_mosaic.version = 11 : i64} {
  func.func @_conv_kernel(%arg0: i32, %arg1: memref<16x128xbf16, #tpu.memory_space<vmem>>, %arg2: memref<128x32xbf16, #tpu.memory_space<vmem>>, %arg3: memref<1x32xf32, #tpu.memory_space<vmem>>, %arg4: memref<16x32xbf16, #tpu.memory_space<vmem>>) attributes {dimension_semantics = [#tpu.dimension_semantics<parallel>], iteration_bounds = array<i64: 1>, scalar_prefetch = 0 : i64, scratch_operands = 0 : i64, tpu.core_type = #tpu.core_type<tc>, window_params = [{transform_indices = @transform_0, window_bounds = array<i64: 16, 128>}, {pipeline_mode = #tpu.pipeline_mode<synchronous>, transform_indices = @transform_1, window_bounds = array<i64: 128, 32>}, {pipeline_mode = #tpu.pipeline_mode<synchronous>, transform_indices = @transform_2, window_bounds = array<i64: 1, 32>}, {transform_indices = @transform_3, window_bounds = array<i64: 16, 32>}]} {
    %c0 = arith.constant 0 : index
    %c0_0 = arith.constant 0 : index
    %0 = vector.load %arg1[%c0, %c0_0] : memref<16x128xbf16, #tpu.memory_space<vmem>>, vector<16x128xbf16>
    %c0_1 = arith.constant 0 : index
    %c0_2 = arith.constant 0 : index
    %1 = vector.load %arg2[%c0_1, %c0_2] : memref<128x32xbf16, #tpu.memory_space<vmem>>, vector<128x32xbf16>
    %cst = arith.constant dense<0.000000e+00> : vector<16x32xf32>
    %2 = tpu.matmul %0, %1, %cst {dimension_numbers = #tpu.dot_dimension_numbers<[1], [0], [0], [1], [0, 0, 1, 1], [], []>} : vector<16x128xbf16>, vector<128x32xbf16>, vector<16x32xf32> -> vector<16x32xf32>
    %c0_3 = arith.constant 0 : index
    %c0_4 = arith.constant 0 : index
    %3 = vector.load %arg3[%c0_3, %c0_4] : memref<1x32xf32, #tpu.memory_space<vmem>>, vector<1x32xf32>
    %4 = vector.broadcast %3 : vector<1x32xf32> to vector<16x32xf32>
    %5 = arith.addf %2, %4 : vector<16x32xf32>
    %cst_5 = arith.constant 0.000000e+00 : f32
    %6 = vector.broadcast %cst_5 : f32 to vector<16x32xf32>
    %7 = arith.maximumf %5, %6 : vector<16x32xf32>
    %8 = arith.truncf %7 : vector<16x32xf32> to vector<16x32xbf16>
    %c0_6 = arith.constant 0 : index
    %c0_7 = arith.constant 0 : index
    %9 = vector.load %arg4[%c0_6, %c0_7] : memref<16x32xbf16, #tpu.memory_space<vmem>>, vector<16x32xbf16>
    tpu.vector_store %arg4[%c0_6, %c0_7], %8 {strides = array<i32>} : memref<16x32xbf16, #tpu.memory_space<vmem>>, vector<16x32xbf16>,
    return
  }
  func.func @transform_0(%arg0: i32) -> (i32, i32) {
    %c0_i32 = arith.constant 0 : i32
    %c0_i32_0 = arith.constant 0 : i32
    return %arg0, %c0_i32 : i32, i32
  }
  func.func @transform_1(%arg0: i32) -> (i32, i32) {
    %c0_i32 = arith.constant 0 : i32
    %c0_i32_0 = arith.constant 0 : i32
    %c0_i32_1 = arith.constant 0 : i32
    return %c0_i32, %c0_i32_0 : i32, i32
  }
  func.func @transform_2(%arg0: i32) -> (i32, i32) {
    %c0_i32 = arith.constant 0 : i32
    %c0_i32_0 = arith.constant 0 : i32
    %c0_i32_1 = arith.constant 0 : i32
    return %c0_i32, %c0_i32_0 : i32, i32
  }
  func.func @transform_3(%arg0: i32) -> (i32, i32) {
    %c0_i32 = arith.constant 0 : i32
    %c0_i32_0 = arith.constant 0 : i32
    return %arg0, %c0_i32 : i32, i32
  }
}

</mosaic_0001>

<bundles_post_ra>
// kernel: _lambda_.34
= control target key start
LH: loop header
LB: loop body
LE: loop exit
PB: predicated region body
PF: predicated region fallthrough
CT: control target
= control target key end

     0   :  { %s1008_s12 = smov 0   ;;  %s1178_s0 = inlined_call_operand.vmem [shape: bf16[512,36], index: 0, kind: input, shape index: {}]   ;;  %s1179_s1 = inlined_call_operand.vmem [shape: bf16[36,2], index: 1, kind: input, shape index: {}]   ;;  %s1180_s2 = inlined_call_operand.vmem [shape: f32[1,2], index: 2, kind: input, shape index: {}]   ;;  %s1181_s3 = inlined_call_operand.vmem [shape: bf16[512,2], index: 3, kind: output, shape index: {}]  }
   0x1 LB: > { %s777_s13 = sadd.s32 4294967295, %s986_s12   ;;  %p781_p0 = scmp.ge.s32.totalorder %s986_s12, 1  ;;  %s986_s12 = sphi %s1008_s12, %s13_s12  }
   0x2   : > { %p138_p1 = scmp.lt.s32.totalorder %s986_s12, 3 }
   0x4   : > { %p139_p2 = pnand %p781_p0, %p138_p1 }
   0x5   : > { %s782_s18 = sshll.u32 (!%p139_p2), %s777_s13, 5 }
   0x6   : > { %142 = sbr.rel (%p139_p2) target bundleno = 255 (0xff), region = 32  ;;  %p163_p3 = scmp.lt.s32.totalorder (!%p139_p2), %s782_s18, 63 }
   0xb   : > { %v961_v0 = vld [vmem:[%s1179_s1 + $0x10] ss:$0 sps:$4 sm:$0x33]   ;;  %vm363_vm0 = vcmask 1041408   ;;  %v962_v1 = vld [vmem:[%s1179_s1 + $0x8] sm:$0xff]   ;;  %v963_v3 = vld [vmem:[%s1179_s1] sm:$0xff]  }
   0xc   : > { %951 = vmatprep.subr.msk.bf16.mxu0 %vm363_vm0, %v961_v0  ;;  %952 = vmatprep.subr.msk.bf16.mxu1 %vm363_vm0, %v961_v0  ;;  %v365_v2 = vsel %vm363_vm0, %v961_v0, 0  ;;  %s1183_s18 = smov (!%p163_p3, %s782_s18), 63  ;;  %vm314_vm1 = vcmask 293888   ;;  %v1070_v20 = vld [vmem:[%s1180_s2] ss:$0 sm:$0xff]  ;;  %vm688_vm2 = vcmask 11264  }
   0xd   : > { %908 = vmatpush3.bf16.msra.mxu0 %v365_v2  ;;  %948 = vmatpush3.bf16.msra.mxu1 %v365_v2  ;;  %s783_s21 = sshll.u32 %s1183_s18, 2 }
   0xe   : > { %909 = vmatprep.subr.bf16.mxu0 %v962_v1  ;;  %946 = vmatprep.subr.bf16.mxu1 %v962_v1  ;;  %s1033_s24 = scalar_lea.vmem %s1178_s0, %s783_s21  ;;  %s1081_s29 = scalar_lea.vmem %s1181_s3, %s783_s21 }
   0xf   : > { %v964_v4 = vld [vmem:[%s1033_s24] sm:$0xff]   ;;  %v966_v6 = vld [vmem:[%s1033_s24 + $0x8] sm:$0xff]   ;;  %v968_v8 = vld [vmem:[%s1033_s24 + $0x10] sm:$0xff]  }
  0x10   : > { %v965_v5 = vld [vmem:[%s1033_s24 + $0x40] sm:$0xff]   ;;  %913 = vmatprep.mubr.msk.bf16.mxu0 %vm314_vm1, %v964_v4  ;;  %v967_v7 = vld [vmem:[%s1033_s24 + $0x48] sm:$0xff]   ;;  %v969_v9 = vld [vmem:[%s1033_s24 + $0x50] sm:$0xff]  }
  0x11   : > { %910 = vmatpush3.bf16.msra.mxu0 %v962_v1  ;;  %949 = vmatpush3.bf16.msra.mxu1 %v962_v1  ;;  %v970_v10 = vld [vmem:[%s1033_s24 + $0x18] sm:$0xff]   ;;  %v972_v12 = vld [vmem:[%s1033_s24 + $0x20] sm:$0xff]   ;;  %v974_v14 = vld [vmem:[%s1033_s24 + $0x28] sm:$0xff]  }
  0x12   : > { %911 = vmatprep.subr.bf16.mxu0 %v963_v3  ;;  %947 = vmatprep.subr.bf16.mxu1 %v963_v3  ;;  %v971_v11 = vld [vmem:[%s1033_s24 + $0x58] sm:$0xff]   ;;  %v973_v13 = vld [vmem:[%s1033_s24 + $0x60] sm:$0xff]   ;;  %v975_v15 = vld [vmem:[%s1033_s24 + $0x68] sm:$0xff]  }
  0x13   : > { %929 = vmatprep.mubr.msk.bf16.mxu1 %vm314_vm1, %v965_v5  ;;  %v976_v16 = vld [vmem:[%s1033_s24 + $0x30] sm:$0xff]   ;;  %v978_v18 = vld [vmem:[%s1033_s24 + $0x38] sm:$0xff]  }
  0x14   : > { %v977_v17 = vld [vmem:[%s1033_s24 + $0x70] sm:$0xff]   ;;  %v979_v19 = vld [vmem:[%s1033_s24 + $0x78] sm:$0xff]  }
  0x15   : > { %912 = vmatpush3.bf16.msra.mxu0 %v963_v3  ;;  %950 = vmatpush3.bf16.msra.mxu1 %v963_v3 }
  0x18   : > { %914 = vmatmul.mubr.msk.bf16.vlgmr.msra.gmra.mxu0 %vm314_vm1, %v966_v6  ;;  %930 = vmatmul.mubr.msk.bf16.vlgmr.msra.gmra.mxu1 %vm314_vm1, %v967_v7 }
  0x19   : > { %917 = vmatprep.mubr.msk.bf16.mxu0 %vm314_vm1, %v968_v8  ;;  %933 = vmatprep.mubr.msk.bf16.mxu1 %vm314_vm1, %v969_v9 }
  0x20   : > { %918 = vmatmul.mubr.msk.bf16.gmra.mxu0 %vm314_vm1, %v970_v10  ;;  %934 = vmatmul.mubr.msk.bf16.gmra.mxu1 %vm314_vm1, %v971_v11 }
  0x21   : > { %921 = vmatprep.mubr.msk.bf16.mxu0 %vm314_vm1, %v972_v12  ;;  %937 = vmatprep.mubr.msk.bf16.mxu1 %vm314_vm1, %v973_v13 }
  0x28   : > { %922 = vmatmul.mubr.msk.bf16.gmra.mxu0 %vm314_vm1, %v974_v14  ;;  %938 = vmatmul.mubr.msk.bf16.gmra.mxu1 %vm314_vm1, %v975_v15 }
  0x29   : > { %925 = vmatprep.mubr.msk.bf16.mxu0 %vm314_vm1, %v976_v16  ;;  %941 = vmatprep.mubr.msk.bf16.mxu1 %vm314_vm1, %v977_v17 }
  0x30   : > { %926 = vmatmul.mubr.msk.bf16.gmra.mxu0 %vm314_vm1, %v978_v18  ;;  %942 = vmatmul.mubr.msk.bf16.gmra.mxu1 %vm314_vm1, %v979_v19 }
  0xd8   : > { %v915_v21 = vpop.f32.mrf.mxu0  ;;  %v931_v22 = vpop.f32.mrf.mxu1 }
  0xd9   : > { %v410_v23 = vadd.f32 %v915_v21, %v1070_v20  ;;  %v474_v24 = vadd.f32 %v931_v22, %v1070_v20 }
  0xda   : > { %v401_v25 = vpop.f32.mrf.mxu0  ;;  %v465_v26 = vpop.f32.mrf.mxu1 }
  0xdb   : > { %v530_v27 = vmax.f32 %v410_v23, 0.0  ;;  %v546_v28 = vmax.f32 %v474_v24, 0.0  ;;  %v402_v29 = vadd.f32 %v1070_v20, %v401_v25  ;;  %v466_v30 = vadd.f32 %v1070_v20, %v465_v26 }
  0xdc   : > { %v916_v31 = vpop.f32.mrf.mxu0  ;;  %v932_v32 = vpop.f32.mrf.mxu1 }
  0xdd   : > { %v858_v33 = vpack.c.bf16 %v530_v27, %v530_v27  ;;  %v874_v34 = vpack.c.bf16 %v546_v28, %v546_v28  ;;  %v528_v35 = vmax.f32 %v402_v29, 0.0  ;;  %v544_v36 = vmax.f32 %v466_v30, 0.0 }
  0xde   : > { %v413_v37 = vadd.f32 %v916_v31, %v1070_v20  ;;  %v477_v38 = vadd.f32 %v932_v32, %v1070_v20  ;;  %v404_v39 = vpop.f32.mrf.mxu0  ;;  %v468_v40 = vpop.f32.mrf.mxu1 }
  0xdf   : > { %691 = vst.msk [vmem:[%s1081_s29 + $0x8] sm:$0xf] %vm688_vm2, %v858_v33  ;;  %707 = vst.msk [vmem:[%s1081_s29 + $0x48] sm:$0xf] %vm688_vm2, %v874_v34  ;;  %v856_v41 = vpack.c.bf16 %v528_v35, %v528_v35  ;;  %v872_v42 = vpack.c.bf16 %v544_v36, %v544_v36  ;;  %v405_v43 = vadd.f32 %v1070_v20, %v404_v39 }
  0xe0   : > { %v469_v44 = vadd.f32 %v1070_v20, %v468_v40  ;;  %v531_v45 = vmax.f32 %v413_v37, 0.0  ;;  %v547_v46 = vmax.f32 %v477_v38, 0.0  ;;  %v919_v47 = vpop.f32.mrf.mxu0  ;;  %v935_v48 = vpop.f32.mrf.mxu1 }
  0xe1   : > { %689 = vst.msk [vmem:[%s1081_s29] sm:$0xf] %vm688_vm2, %v856_v41  ;;  %705 = vst.msk [vmem:[%s1081_s29 + $0x40] sm:$0xf] %vm688_vm2, %v872_v42  ;;  %v529_v49 = vmax.f32 %v405_v43, 0.0  ;;  %v426_v51 = vadd.f32 %v919_v47, %v1070_v20  ;;  %v490_v52 = vadd.f32 %v935_v48, %v1070_v20 }
  0xe2   : > { %v545_v50 = vmax.f32 %v469_v44, 0.0  ;;  %v859_v53 = vpack.c.bf16 %v531_v45, %v531_v45  ;;  %v875_v54 = vpack.c.bf16 %v547_v46, %v547_v46  ;;  %v417_v55 = vpop.f32.mrf.mxu0  ;;  %v481_v56 = vpop.f32.mrf.mxu1 }
  0xe3   : > { %v857_v57 = vpack.c.bf16 %v529_v49, %v529_v49  ;;  %v534_v59 = vmax.f32 %v426_v51, 0.0  ;;  %v550_v60 = vmax.f32 %v490_v52, 0.0  ;;  %v418_v61 = vadd.f32 %v1070_v20, %v417_v55 }
  0xe4   : > { %v873_v58 = vpack.c.bf16 %v545_v50, %v545_v50  ;;  %692 = vst.msk [vmem:[%s1081_s29 + $0xc] sm:$0xf] %vm688_vm2, %v859_v53  ;;  %708 = vst.msk [vmem:[%s1081_s29 + $0x4c] sm:$0xf] %vm688_vm2, %v875_v54  ;;  %v482_v62 = vadd.f32 %v1070_v20, %v481_v56  ;;  %v920_v63 = vpop.f32.mrf.mxu0  ;;  %v936_v0 = vpop.f32.mrf.mxu1 }
  0xe5   : > { %690 = vst.msk [vmem:[%s1081_s29 + $0x4] sm:$0xf] %vm688_vm2, %v857_v57  ;;  %v862_v1 = vpack.c.bf16 %v534_v59, %v534_v59  ;;  %v878_v2 = vpack.c.bf16 %v550_v60, %v550_v60  ;;  %v429_v3 = vadd.f32 %v920_v63, %v1070_v20  ;;  %v493_v4 = vadd.f32 %v936_v0, %v1070_v20 }
  0xe6   : > { %706 = vst.msk [vmem:[%s1081_s29 + $0x44] sm:$0xf] %vm688_vm2, %v873_v58  ;;  %v532_v5 = vmax.f32 %v418_v61, 0.0  ;;  %v548_v6 = vmax.f32 %v482_v62, 0.0  ;;  %v420_v7 = vpop.f32.mrf.mxu0  ;;  %v484_v8 = vpop.f32.mrf.mxu1 }
  0xe7   : > { %695 = vst.msk [vmem:[%s1081_s29 + $0x18] sm:$0xf] %vm688_vm2, %v862_v1  ;;  %711 = vst.msk [vmem:[%s1081_s29 + $0x58] sm:$0xf] %vm688_vm2, %v878_v2  ;;  %v535_v9 = vmax.f32 %v429_v3, 0.0  ;;  %v551_v10 = vmax.f32 %v493_v4, 0.0  ;;  %v421_v11 = vadd.f32 %v1070_v20, %v420_v7  ;;  %v485_v12 = vadd.f32 %v1070_v20, %v484_v8 }
  0xe8   : > { %v860_v13 = vpack.c.bf16 %v532_v5, %v532_v5  ;;  %v876_v14 = vpack.c.bf16 %v548_v6, %v548_v6  ;;  %v923_v15 = vpop.f32.mrf.mxu0  ;;  %v939_v16 = vpop.f32.mrf.mxu1 }
  0xe9   : > { %v863_v17 = vpack.c.bf16 %v535_v9, %v535_v9  ;;  %v879_v18 = vpack.c.bf16 %v551_v10, %v551_v10  ;;  %v533_v19 = vmax.f32 %v421_v11, 0.0  ;;  %v549_v21 = vmax.f32 %v485_v12, 0.0 }
  0xea   : > { %693 = vst.msk [vmem:[%s1081_s29 + $0x10] sm:$0xf] %vm688_vm2, %v860_v13  ;;  %709 = vst.msk [vmem:[%s1081_s29 + $0x50] sm:$0xf] %vm688_vm2, %v876_v14  ;;  %v442_v22 = vadd.f32 %v923_v15, %v1070_v20  ;;  %v506_v23 = vadd.f32 %v939_v16, %v1070_v20  ;;  %v433_v24 = vpop.f32.mrf.mxu0  ;;  %v497_v25 = vpop.f32.mrf.mxu1 }
  0xeb   : > { %696 = vst.msk [vmem:[%s1081_s29 + $0x1c] sm:$0xf] %vm688_vm2, %v863_v17  ;;  %712 = vst.msk [vmem:[%s1081_s29 + $0x5c] sm:$0xf] %vm688_vm2, %v879_v18  ;;  %v861_v26 = vpack.c.bf16 %v533_v19, %v533_v19  ;;  %v877_v27 = vpack.c.bf16 %v549_v21, %v549_v21  ;;  %v434_v28 = vadd.f32 %v1070_v20, %v433_v24 }
  0xec   : > { %v498_v29 = vadd.f32 %v1070_v20, %v497_v25  ;;  %v538_v30 = vmax.f32 %v442_v22, 0.0  ;;  %v554_v31 = vmax.f32 %v506_v23, 0.0  ;;  %v924_v32 = vpop.f32.mrf.mxu0  ;;  %v940_v33 = vpop.f32.mrf.mxu1 }
  0xed   : > { %694 = vst.msk [vmem:[%s1081_s29 + $0x14] sm:$0xf] %vm688_vm2, %v861_v26  ;;  %710 = vst.msk [vmem:[%s1081_s29 + $0x54] sm:$0xf] %vm688_vm2, %v877_v27  ;;  %v536_v34 = vmax.f32 %v434_v28, 0.0  ;;  %v445_v36 = vadd.f32 %v924_v32, %v1070_v20  ;;  %v509_v37 = vadd.f32 %v940_v33, %v1070_v20 }
  0xee   : > { %v552_v35 = vmax.f32 %v498_v29, 0.0  ;;  %v866_v38 = vpack.c.bf16 %v538_v30, %v538_v30  ;;  %v882_v39 = vpack.c.bf16 %v554_v31, %v554_v31  ;;  %v436_v40 = vpop.f32.mrf.mxu0  ;;  %v500_v41 = vpop.f32.mrf.mxu1 }
  0xef   : > { %v864_v42 = vpack.c.bf16 %v536_v34, %v536_v34  ;;  %v539_v44 = vmax.f32 %v445_v36, 0.0  ;;  %v555_v45 = vmax.f32 %v509_v37, 0.0  ;;  %v437_v46 = vadd.f32 %v1070_v20, %v436_v40 }
  0xf0   : > { %v880_v43 = vpack.c.bf16 %v552_v35, %v552_v35  ;;  %699 = vst.msk [vmem:[%s1081_s29 + $0x28] sm:$0xf] %vm688_vm2, %v866_v38  ;;  %715 = vst.msk [vmem:[%s1081_s29 + $0x68] sm:$0xf] %vm688_vm2, %v882_v39  ;;  %v501_v47 = vadd.f32 %v1070_v20, %v500_v41  ;;  %v927_v48 = vpop.f32.mrf.mxu0  ;;  %v943_v49 = vpop.f32.mrf.mxu1 }
  0xf1   : > { %697 = vst.msk [vmem:[%s1081_s29 + $0x20] sm:$0xf] %vm688_vm2, %v864_v42  ;;  %v867_v50 = vpack.c.bf16 %v539_v44, %v539_v44  ;;  %v883_v51 = vpack.c.bf16 %v555_v45, %v555_v45  ;;  %v458_v52 = vadd.f32 %v927_v48, %v1070_v20  ;;  %v522_v53 = vadd.f32 %v943_v49, %v1070_v20 }
  0xf2   : > { %713 = vst.msk [vmem:[%s1081_s29 + $0x60] sm:$0xf] %vm688_vm2, %v880_v43  ;;  %v537_v54 = vmax.f32 %v437_v46, 0.0  ;;  %v553_v55 = vmax.f32 %v501_v47, 0.0  ;;  %v449_v56 = vpop.f32.mrf.mxu0  ;;  %v513_v57 = vpop.f32.mrf.mxu1 }
  0xf3   : > { %700 = vst.msk [vmem:[%s1081_s29 + $0x2c] sm:$0xf] %vm688_vm2, %v867_v50  ;;  %716 = vst.msk [vmem:[%s1081_s29 + $0x6c] sm:$0xf] %vm688_vm2, %v883_v51  ;;  %v542_v58 = vmax.f32 %v458_v52, 0.0  ;;  %v558_v59 = vmax.f32 %v522_v53, 0.0  ;;  %v450_v60 = vadd.f32 %v1070_v20, %v449_v56  ;;  %v514_v61 = vadd.f32 %v1070_v20, %v513_v57 }
  0xf4   : > { %v865_v62 = vpack.c.bf16 %v537_v54, %v537_v54  ;;  %v881_v63 = vpack.c.bf16 %v553_v55, %v553_v55  ;;  %v928_v0 = vpop.f32.mrf.mxu0  ;;  %v944_v1 = vpop.f32.mrf.mxu1 }
  0xf5   : > { %v870_v2 = vpack.c.bf16 %v542_v58, %v542_v58  ;;  %v886_v3 = vpack.c.bf16 %v558_v59, %v558_v59  ;;  %v540_v4 = vmax.f32 %v450_v60, 0.0  ;;  %v556_v5 = vmax.f32 %v514_v61, 0.0 }
  0xf6   : > { %698 = vst.msk [vmem:[%s1081_s29 + $0x24] sm:$0xf] %vm688_vm2, %v865_v62  ;;  %714 = vst.msk [vmem:[%s1081_s29 + $0x64] sm:$0xf] %vm688_vm2, %v881_v63  ;;  %v461_v6 = vadd.f32 %v928_v0, %v1070_v20  ;;  %v525_v7 = vadd.f32 %v944_v1, %v1070_v20  ;;  %v452_v8 = vpop.f32.mrf.mxu0  ;;  %v516_v9 = vpop.f32.mrf.mxu1 }
  0xf7   : > { %703 = vst.msk [vmem:[%s1081_s29 + $0x38] sm:$0xf] %vm688_vm2, %v870_v2  ;;  %719 = vst.msk [vmem:[%s1081_s29 + $0x78] sm:$0xf] %vm688_vm2, %v886_v3  ;;  %v868_v10 = vpack.c.bf16 %v540_v4, %v540_v4  ;;  %v884_v11 = vpack.c.bf16 %v556_v5, %v556_v5  ;;  %v453_v12 = vadd.f32 %v1070_v20, %v452_v8 }
  0xf8   : > { %v517_v13 = vadd.f32 %v1070_v20, %v516_v9  ;;  %v543_v14 = vmax.f32 %v461_v6, 0.0  ;;  %v559_v15 = vmax.f32 %v525_v7, 0.0 }
  0xf9   : > { %701 = vst.msk [vmem:[%s1081_s29 + $0x30] sm:$0xf] %vm688_vm2, %v868_v10  ;;  %717 = vst.msk [vmem:[%s1081_s29 + $0x70] sm:$0xf] %vm688_vm2, %v884_v11  ;;  %v541_v16 = vmax.f32 %v453_v12, 0.0 }
  0xfa   : > { %v557_v17 = vmax.f32 %v517_v13, 0.0  ;;  %v871_v18 = vpack.c.bf16 %v543_v14, %v543_v14  ;;  %v887_v19 = vpack.c.bf16 %v559_v15, %v559_v15 }
  0xfb   : > { %v869_v21 = vpack.c.bf16 %v541_v16, %v541_v16 }
  0xfc   : > { %v885_v22 = vpack.c.bf16 %v557_v17, %v557_v17  ;;  %704 = vst.msk [vmem:[%s1081_s29 + $0x3c] sm:$0xf] %vm688_vm2, %v871_v18  ;;  %720 = vst.msk [vmem:[%s1081_s29 + $0x7c] sm:$0xf] %vm688_vm2, %v887_v19 }
  0xfd   : > { %702 = vst.msk [vmem:[%s1081_s29 + $0x34] sm:$0xf] %vm688_vm2, %v869_v21 }
  0xfe   : > { %718 = vst.msk [vmem:[%s1081_s29 + $0x74] sm:$0xf] %vm688_vm2, %v885_v22 }
  0xff PF: > { %s13_s12 = sadd.s32 1, %s986_s12  }
 0x100   : > { %p10_p4 = scmp.ge.s32.totalorder %s13_s12, 4  }
 0x102   :  { %12 = sbr.rel (!%p10_p4) target bundleno = 1 (0x1), region = 62 }

// kernel: _lambda_.35
= control target key start
LH: loop header
LB: loop body
LE: loop exit
PB: predicated region body
PF: predicated region fallthrough
CT: control target
= control target key end

     0   :  { %s993_s12 = smov 0   ;;  %s1160_s0 = inlined_call_operand.vmem [shape: bf16[512,18], index: 0, kind: input, shape index: {}]   ;;  %s1161_s1 = inlined_call_operand.vmem [shape: bf16[18,4], index: 1, kind: input, shape index: {}]   ;;  %s1162_s2 = inlined_call_operand.vmem [shape: f32[1,4], index: 2, kind: input, shape index: {}]   ;;  %s1163_s3 = inlined_call_operand.vmem [shape: bf16[512,4], index: 3, kind: output, shape index: {}]  }
   0x1 LB: > { %s769_s13 = sadd.s32 4294967295, %s971_s12   ;;  %p773_p0 = scmp.ge.s32.totalorder %s971_s12, 1  ;;  %s971_s12 = sphi %s993_s12, %s13_s12  }
   0x2   : > { %p138_p1 = scmp.lt.s32.totalorder %s971_s12, 3 }
   0x4   : > { %p139_p2 = pnand %p773_p0, %p138_p1 }
   0x5   : > { %s774_s18 = sshll.u32 (!%p139_p2), %s769_s13, 5 }
   0x6   : > { %142 = sbr.rel (%p139_p2) target bundleno = 250 (0xfa), region = 32  ;;  %p163_p3 = scmp.lt.s32.totalorder (!%p139_p2), %s774_s18, 63 }
   0xb   : > { %v947_v0 = vld [vmem:[%s1161_s1 + $0x8] ss:$0 sps:$4 sm:$0x11]   ;;  %vm355_vm0 = vcmask 1040384   ;;  %v948_v1 = vld [vmem:[%s1161_s1] sm:$0xff]   ;;  %s1165_s18 = smov (!%p163_p3, %s774_s18), 63 }
   0xc   : > { %937 = vmatprep.subr.msk.bf16.mxu0 %vm355_vm0, %v947_v0  ;;  %938 = vmatprep.subr.msk.bf16.mxu1 %vm355_vm0, %v947_v0  ;;  %v357_v2 = vsel %vm355_vm0, %v947_v0, 0  ;;  %s775_s19 = sshll.u32 %s1165_s18, 2  ;;  %vm306_vm1 = vcmask 146432   ;;  %v1052_v19 = vld [vmem:[%s1162_s2] ss:$0 sm:$0xff]  ;;  %vm680_vm2 = vcmask 27648  }
   0xd   : > { %898 = vmatpush3.bf16.msra.mxu0 %v357_v2  ;;  %935 = vmatpush3.bf16.msra.mxu1 %v357_v2  ;;  %s1015_s22 = scalar_lea.vmem %s1160_s0, %s775_s19  ;;  %s1062_s27 = scalar_lea.vmem %s1163_s3, %s775_s19 }
   0xe   : > { %899 = vmatprep.subr.bf16.mxu0 %v948_v1  ;;  %934 = vmatprep.subr.bf16.mxu1 %v948_v1  ;;  %v949_v3 = vld [vmem:[%s1015_s22] sm:$0xff]   ;;  %v951_v5 = vld [vmem:[%s1015_s22 + $0x8] sm:$0xff]   ;;  %v953_v7 = vld [vmem:[%s1015_s22 + $0x10] sm:$0xff]  }
   0xf   : > { %v950_v4 = vld [vmem:[%s1015_s22 + $0x40] sm:$0xff]   ;;  %901 = vmatprep.mubr.msk.bf16.mxu0 %vm306_vm1, %v949_v3  ;;  %v952_v6 = vld [vmem:[%s1015_s22 + $0x48] sm:$0xff]   ;;  %v954_v8 = vld [vmem:[%s1015_s22 + $0x50] sm:$0xff]  }
  0x10   : > { %917 = vmatprep.mubr.msk.bf16.mxu1 %vm306_vm1, %v950_v4  ;;  %v955_v9 = vld [vmem:[%s1015_s22 + $0x18] sm:$0xff]   ;;  %v957_v11 = vld [vmem:[%s1015_s22 + $0x20] sm:$0xff]   ;;  %v959_v13 = vld [vmem:[%s1015_s22 + $0x28] sm:$0xff]  }
  0x11   : > { %900 = vmatpush3.bf16.msra.mxu0 %v948_v1  ;;  %936 = vmatpush3.bf16.msra.mxu1 %v948_v1  ;;  %v956_v10 = vld [vmem:[%s1015_s22 + $0x58] sm:$0xff]   ;;  %v958_v12 = vld [vmem:[%s1015_s22 + $0x60] sm:$0xff]   ;;  %v960_v14 = vld [vmem:[%s1015_s22 + $0x68] sm:$0xff]  }
  0x12   : > { %v961_v15 = vld [vmem:[%s1015_s22 + $0x30] sm:$0xff]   ;;  %v963_v17 = vld [vmem:[%s1015_s22 + $0x38] sm:$0xff]  }
  0x13   : > { %v962_v16 = vld [vmem:[%s1015_s22 + $0x70] sm:$0xff]   ;;  %v964_v18 = vld [vmem:[%s1015_s22 + $0x78] sm:$0xff]  }
  0x14   : > { %902 = vmatmul.mubr.msk.bf16.vlgmr.msra.gmra.mxu0 %vm306_vm1, %v951_v5  ;;  %918 = vmatmul.mubr.msk.bf16.vlgmr.msra.gmra.mxu1 %vm306_vm1, %v952_v6 }
  0x15   : > { %905 = vmatprep.mubr.msk.bf16.mxu0 %vm306_vm1, %v953_v7  ;;  %921 = vmatprep.mubr.msk.bf16.mxu1 %vm306_vm1, %v954_v8 }
  0x1c   : > { %906 = vmatmul.mubr.msk.bf16.gmra.mxu0 %vm306_vm1, %v955_v9  ;;  %922 = vmatmul.mubr.msk.bf16.gmra.mxu1 %vm306_vm1, %v956_v10 }
  0x1d   : > { %909 = vmatprep.mubr.msk.bf16.mxu0 %vm306_vm1, %v957_v11  ;;  %925 = vmatprep.mubr.msk.bf16.mxu1 %vm306_vm1, %v958_v12 }
  0x24   : > { %910 = vmatmul.mubr.msk.bf16.gmra.mxu0 %vm306_vm1, %v959_v13  ;;  %926 = vmatmul.mubr.msk.bf16.gmra.mxu1 %vm306_vm1, %v960_v14 }
  0x25   : > { %913 = vmatprep.mubr.msk.bf16.mxu0 %vm306_vm1, %v961_v15  ;;  %929 = vmatprep.mubr.msk.bf16.mxu1 %vm306_vm1, %v962_v16 }
  0x2c   : > { %914 = vmatmul.mubr.msk.bf16.gmra.mxu0 %vm306_vm1, %v963_v17  ;;  %930 = vmatmul.mubr.msk.bf16.gmra.mxu1 %vm306_vm1, %v964_v18 }
  0xd4   : > { %v903_v20 = vpop.f32.mrf.mxu0  ;;  %v919_v22 = vpop.f32.mrf.mxu1 }
  0xd5   : > { %v402_v21 = vadd.f32 %v903_v20, %v1052_v19  ;;  %v466_v23 = vadd.f32 %v919_v22, %v1052_v19 }
  0xd6   : > { %v393_v24 = vpop.f32.mrf.mxu0  ;;  %v457_v27 = vpop.f32.mrf.mxu1 }
  0xd7   : > { %v522_v25 = vmax.f32 %v402_v21, 0.0  ;;  %v394_v26 = vadd.f32 %v1052_v19, %v393_v24  ;;  %v538_v28 = vmax.f32 %v466_v23, 0.0  ;;  %v458_v29 = vadd.f32 %v1052_v19, %v457_v27 }
  0xd8   : > { %v904_v30 = vpop.f32.mrf.mxu0  ;;  %v920_v34 = vpop.f32.mrf.mxu1 }
  0xd9   : > { %v849_v31 = vpack.c.bf16 %v522_v25, %v522_v25  ;;  %v520_v32 = vmax.f32 %v394_v26, 0.0  ;;  %v405_v33 = vadd.f32 %v904_v30, %v1052_v19  ;;  %v865_v35 = vpack.c.bf16 %v538_v28, %v538_v28 }
  0xda   : > { %v536_v36 = vmax.f32 %v458_v29, 0.0  ;;  %v469_v37 = vadd.f32 %v920_v34, %v1052_v19  ;;  %v396_v38 = vpop.f32.mrf.mxu0  ;;  %v460_v42 = vpop.f32.mrf.mxu1 }
  0xdb   : > { %683 = vst.msk [vmem:[%s1062_s27 + $0x8] sm:$0xf] %vm680_vm2, %v849_v31  ;;  %v847_v39 = vpack.c.bf16 %v520_v32, %v520_v32  ;;  %v523_v40 = vmax.f32 %v405_v33, 0.0  ;;  %v397_v41 = vadd.f32 %v1052_v19, %v396_v38  ;;  %699 = vst.msk [vmem:[%s1062_s27 + $0x48] sm:$0xf] %vm680_vm2, %v865_v35  ;;  %v461_v45 = vadd.f32 %v1052_v19, %v460_v42 }
  0xdc   : > { %v863_v43 = vpack.c.bf16 %v536_v36, %v536_v36  ;;  %v539_v44 = vmax.f32 %v469_v37, 0.0  ;;  %v907_v46 = vpop.f32.mrf.mxu0  ;;  %v923_v50 = vpop.f32.mrf.mxu1 }
  0xdd   : > { %681 = vst.msk [vmem:[%s1062_s27] sm:$0xf] %vm680_vm2, %v847_v39  ;;  %v850_v47 = vpack.c.bf16 %v523_v40, %v523_v40  ;;  %v521_v48 = vmax.f32 %v397_v41, 0.0  ;;  %v418_v49 = vadd.f32 %v907_v46, %v1052_v19  ;;  %v537_v52 = vmax.f32 %v461_v45, 0.0 }
  0xde   : > { %697 = vst.msk [vmem:[%s1062_s27 + $0x40] sm:$0xf] %vm680_vm2, %v863_v43  ;;  %v866_v51 = vpack.c.bf16 %v539_v44, %v539_v44  ;;  %v482_v53 = vadd.f32 %v923_v50, %v1052_v19  ;;  %v409_v54 = vpop.f32.mrf.mxu0  ;;  %v473_v58 = vpop.f32.mrf.mxu1 }
  0xdf   : > { %684 = vst.msk [vmem:[%s1062_s27 + $0xc] sm:$0xf] %vm680_vm2, %v850_v47  ;;  %v848_v55 = vpack.c.bf16 %v521_v48, %v521_v48  ;;  %v526_v56 = vmax.f32 %v418_v49, 0.0  ;;  %v410_v57 = vadd.f32 %v1052_v19, %v409_v54  ;;  %v864_v59 = vpack.c.bf16 %v537_v52, %v537_v52 }
  0xe0   : > { %700 = vst.msk [vmem:[%s1062_s27 + $0x4c] sm:$0xf] %vm680_vm2, %v866_v51  ;;  %v542_v60 = vmax.f32 %v482_v53, 0.0  ;;  %v474_v61 = vadd.f32 %v1052_v19, %v473_v58  ;;  %v908_v62 = vpop.f32.mrf.mxu0  ;;  %v924_v2 = vpop.f32.mrf.mxu1 }
  0xe1   : > { %682 = vst.msk [vmem:[%s1062_s27 + $0x4] sm:$0xf] %vm680_vm2, %v848_v55  ;;  %v853_v63 = vpack.c.bf16 %v526_v56, %v526_v56  ;;  %v524_v0 = vmax.f32 %v410_v57, 0.0  ;;  %v421_v1 = vadd.f32 %v908_v62, %v1052_v19  ;;  %698 = vst.msk [vmem:[%s1062_s27 + $0x44] sm:$0xf] %vm680_vm2, %v864_v59  ;;  %v485_v5 = vadd.f32 %v924_v2, %v1052_v19 }
  0xe2   : > { %v869_v3 = vpack.c.bf16 %v542_v60, %v542_v60  ;;  %v540_v4 = vmax.f32 %v474_v61, 0.0  ;;  %v412_v6 = vpop.f32.mrf.mxu0  ;;  %v476_v10 = vpop.f32.mrf.mxu1 }
  0xe3   : > { %687 = vst.msk [vmem:[%s1062_s27 + $0x18] sm:$0xf] %vm680_vm2, %v853_v63  ;;  %v851_v7 = vpack.c.bf16 %v524_v0, %v524_v0  ;;  %v527_v8 = vmax.f32 %v421_v1, 0.0  ;;  %v413_v9 = vadd.f32 %v1052_v19, %v412_v6  ;;  %v543_v12 = vmax.f32 %v485_v5, 0.0 }
  0xe4   : > { %703 = vst.msk [vmem:[%s1062_s27 + $0x58] sm:$0xf] %vm680_vm2, %v869_v3  ;;  %v867_v11 = vpack.c.bf16 %v540_v4, %v540_v4  ;;  %v477_v13 = vadd.f32 %v1052_v19, %v476_v10  ;;  %v911_v14 = vpop.f32.mrf.mxu0  ;;  %v927_v18 = vpop.f32.mrf.mxu1 }
  0xe5   : > { %685 = vst.msk [vmem:[%s1062_s27 + $0x10] sm:$0xf] %vm680_vm2, %v851_v7  ;;  %v854_v15 = vpack.c.bf16 %v527_v8, %v527_v8  ;;  %v525_v16 = vmax.f32 %v413_v9, 0.0  ;;  %v434_v17 = vadd.f32 %v911_v14, %v1052_v19  ;;  %v870_v20 = vpack.c.bf16 %v543_v12, %v543_v12 }
  0xe6   : > { %701 = vst.msk [vmem:[%s1062_s27 + $0x50] sm:$0xf] %vm680_vm2, %v867_v11  ;;  %v541_v21 = vmax.f32 %v477_v13, 0.0  ;;  %v498_v22 = vadd.f32 %v927_v18, %v1052_v19  ;;  %v425_v23 = vpop.f32.mrf.mxu0  ;;  %v489_v27 = vpop.f32.mrf.mxu1 }
  0xe7   : > { %688 = vst.msk [vmem:[%s1062_s27 + $0x1c] sm:$0xf] %vm680_vm2, %v854_v15  ;;  %v852_v24 = vpack.c.bf16 %v525_v16, %v525_v16  ;;  %v530_v25 = vmax.f32 %v434_v17, 0.0  ;;  %v426_v26 = vadd.f32 %v1052_v19, %v425_v23  ;;  %704 = vst.msk [vmem:[%s1062_s27 + $0x5c] sm:$0xf] %vm680_vm2, %v870_v20  ;;  %v490_v30 = vadd.f32 %v1052_v19, %v489_v27 }
  0xe8   : > { %v868_v28 = vpack.c.bf16 %v541_v21, %v541_v21  ;;  %v546_v29 = vmax.f32 %v498_v22, 0.0  ;;  %v912_v31 = vpop.f32.mrf.mxu0  ;;  %v928_v35 = vpop.f32.mrf.mxu1 }
  0xe9   : > { %686 = vst.msk [vmem:[%s1062_s27 + $0x14] sm:$0xf] %vm680_vm2, %v852_v24  ;;  %v857_v32 = vpack.c.bf16 %v530_v25, %v530_v25  ;;  %v528_v33 = vmax.f32 %v426_v26, 0.0  ;;  %v437_v34 = vadd.f32 %v912_v31, %v1052_v19  ;;  %v544_v37 = vmax.f32 %v490_v30, 0.0 }
  0xea   : > { %702 = vst.msk [vmem:[%s1062_s27 + $0x54] sm:$0xf] %vm680_vm2, %v868_v28  ;;  %v873_v36 = vpack.c.bf16 %v546_v29, %v546_v29  ;;  %v501_v38 = vadd.f32 %v928_v35, %v1052_v19  ;;  %v428_v39 = vpop.f32.mrf.mxu0  ;;  %v492_v43 = vpop.f32.mrf.mxu1 }
  0xeb   : > { %691 = vst.msk [vmem:[%s1062_s27 + $0x28] sm:$0xf] %vm680_vm2, %v857_v32  ;;  %v855_v40 = vpack.c.bf16 %v528_v33, %v528_v33  ;;  %v531_v41 = vmax.f32 %v437_v34, 0.0  ;;  %v429_v42 = vadd.f32 %v1052_v19, %v428_v39  ;;  %v871_v44 = vpack.c.bf16 %v544_v37, %v544_v37 }
  0xec   : > { %707 = vst.msk [vmem:[%s1062_s27 + $0x68] sm:$0xf] %vm680_vm2, %v873_v36  ;;  %v547_v45 = vmax.f32 %v501_v38, 0.0  ;;  %v493_v46 = vadd.f32 %v1052_v19, %v492_v43  ;;  %v915_v47 = vpop.f32.mrf.mxu0  ;;  %v931_v51 = vpop.f32.mrf.mxu1 }
  0xed   : > { %689 = vst.msk [vmem:[%s1062_s27 + $0x20] sm:$0xf] %vm680_vm2, %v855_v40  ;;  %v858_v48 = vpack.c.bf16 %v531_v41, %v531_v41  ;;  %v529_v49 = vmax.f32 %v429_v42, 0.0  ;;  %v450_v50 = vadd.f32 %v915_v47, %v1052_v19  ;;  %705 = vst.msk [vmem:[%s1062_s27 + $0x60] sm:$0xf] %vm680_vm2, %v871_v44  ;;  %v514_v54 = vadd.f32 %v931_v51, %v1052_v19 }
  0xee   : > { %v874_v52 = vpack.c.bf16 %v547_v45, %v547_v45  ;;  %v545_v53 = vmax.f32 %v493_v46, 0.0  ;;  %v441_v55 = vpop.f32.mrf.mxu0  ;;  %v505_v59 = vpop.f32.mrf.mxu1 }
  0xef   : > { %692 = vst.msk [vmem:[%s1062_s27 + $0x2c] sm:$0xf] %vm680_vm2, %v858_v48  ;;  %v856_v56 = vpack.c.bf16 %v529_v49, %v529_v49  ;;  %v534_v57 = vmax.f32 %v450_v50, 0.0  ;;  %v442_v58 = vadd.f32 %v1052_v19, %v441_v55  ;;  %v550_v61 = vmax.f32 %v514_v54, 0.0 }
  0xf0   : > { %708 = vst.msk [vmem:[%s1062_s27 + $0x6c] sm:$0xf] %vm680_vm2, %v874_v52  ;;  %v872_v60 = vpack.c.bf16 %v545_v53, %v545_v53  ;;  %v506_v62 = vadd.f32 %v1052_v19, %v505_v59  ;;  %v916_v63 = vpop.f32.mrf.mxu0  ;;  %v932_v3 = vpop.f32.mrf.mxu1 }
  0xf1   : > { %690 = vst.msk [vmem:[%s1062_s27 + $0x24] sm:$0xf] %vm680_vm2, %v856_v56  ;;  %v861_v0 = vpack.c.bf16 %v534_v57, %v534_v57  ;;  %v532_v1 = vmax.f32 %v442_v58, 0.0  ;;  %v453_v2 = vadd.f32 %v916_v63, %v1052_v19  ;;  %v877_v4 = vpack.c.bf16 %v550_v61, %v550_v61 }
  0xf2   : > { %706 = vst.msk [vmem:[%s1062_s27 + $0x64] sm:$0xf] %vm680_vm2, %v872_v60  ;;  %v548_v5 = vmax.f32 %v506_v62, 0.0  ;;  %v517_v6 = vadd.f32 %v932_v3, %v1052_v19  ;;  %v444_v7 = vpop.f32.mrf.mxu0  ;;  %v508_v11 = vpop.f32.mrf.mxu1 }
  0xf3   : > { %695 = vst.msk [vmem:[%s1062_s27 + $0x38] sm:$0xf] %vm680_vm2, %v861_v0  ;;  %v859_v8 = vpack.c.bf16 %v532_v1, %v532_v1  ;;  %v535_v9 = vmax.f32 %v453_v2, 0.0  ;;  %v445_v10 = vadd.f32 %v1052_v19, %v444_v7  ;;  %711 = vst.msk [vmem:[%s1062_s27 + $0x78] sm:$0xf] %vm680_vm2, %v877_v4  ;;  %v509_v14 = vadd.f32 %v1052_v19, %v508_v11 }
  0xf4   : > { %v875_v12 = vpack.c.bf16 %v548_v5, %v548_v5  ;;  %v551_v13 = vmax.f32 %v517_v6, 0.0 }
  0xf5   : > { %693 = vst.msk [vmem:[%s1062_s27 + $0x30] sm:$0xf] %vm680_vm2, %v859_v8  ;;  %v862_v15 = vpack.c.bf16 %v535_v9, %v535_v9  ;;  %v533_v16 = vmax.f32 %v445_v10, 0.0  ;;  %v549_v18 = vmax.f32 %v509_v14, 0.0 }
  0xf6   : > { %709 = vst.msk [vmem:[%s1062_s27 + $0x70] sm:$0xf] %vm680_vm2, %v875_v12  ;;  %v878_v17 = vpack.c.bf16 %v551_v13, %v551_v13 }
  0xf7   : > { %696 = vst.msk [vmem:[%s1062_s27 + $0x3c] sm:$0xf] %vm680_vm2, %v862_v15  ;;  %v860_v20 = vpack.c.bf16 %v533_v16, %v533_v16  ;;  %v876_v21 = vpack.c.bf16 %v549_v18, %v549_v18 }
  0xf8   : > { %712 = vst.msk [vmem:[%s1062_s27 + $0x7c] sm:$0xf] %vm680_vm2, %v878_v17 }
  0xf9   : > { %694 = vst.msk [vmem:[%s1062_s27 + $0x34] sm:$0xf] %vm680_vm2, %v860_v20  ;;  %710 = vst.msk [vmem:[%s1062_s27 + $0x74] sm:$0xf] %vm680_vm2, %v876_v21 }
  0xfa PF: > { %s13_s12 = sadd.s32 1, %s971_s12  }
  0xfb   : > { %p10_p4 = scmp.ge.s32.totalorder %s13_s12, 4  }
  0xfd   :  { %12 = sbr.rel (!%p10_p4) target bundleno = 1 (0x1), region = 62 }

// kernel: _lambda_.36
= control target key start
LH: loop header
LB: loop body
LE: loop exit
PB: predicated region body
PF: predicated region fallthrough
CT: control target
= control target key end

     0   :  { %vm31_vm0 = vcmask 257024   ;;  %s93_s0 = inlined_call_operand.vmem [shape: bf16[16,32], index: 0, kind: input, shape index: {}]   ;;  %s94_s1 = inlined_call_operand.vmem [shape: bf16[16,32], index: 1, kind: input, shape index: {}]   ;;  %s95_s2 = inlined_call_operand.vmem [shape: bf16[16,32], index: 2, kind: input, shape index: {}]   ;;  %s96_s3 = inlined_call_operand.vmem [shape: bf16[16,32], index: 3, kind: input, shape index: {}]   ;;  %s97_s4 = inlined_call_operand.vmem [shape: bf16[16,32], index: 4, kind: output, shape index: {}]  }
   0x1   :  { %v17_v0 = vld [vmem:[%s93_s0] sm:$0xf]  ;;  %v18_v4 = vld [vmem:[%s93_s0 + $0x4] sm:$0xf] }
   0x2   :  { %v19_v1 = vld [vmem:[%s94_s1] sm:$0xf]  ;;  %v20_v5 = vld [vmem:[%s94_s1 + $0x4] sm:$0xf] }
   0x3   :  { %v23_v2 = vld [vmem:[%s95_s2] sm:$0xf]  ;;  %v21_v3 = vmax.bf16 %v19_v1, %v17_v0  ;;  %v22_v7 = vmax.bf16 %v20_v5, %v18_v4  ;;  %v24_v8 = vld [vmem:[%s95_s2 + $0x4] sm:$0xf] }
   0x4   :  { %v27_v6 = vld [vmem:[%s96_s3] sm:$0xf]  ;;  %v28_v10 = vld [vmem:[%s96_s3 + $0x4] sm:$0xf] }
   0x5   :  { %v25_v9 = vmax.bf16 %v23_v2, %v21_v3  ;;  %v26_v11 = vmax.bf16 %v24_v8, %v22_v7 }
   0x7   :  { %v29_v12 = vmax.bf16 %v27_v6, %v25_v9  ;;  %v30_v13 = vmax.bf16 %v28_v10, %v26_v11 }
   0x9   :  { %32 = vst.msk [vmem:[%s97_s4] sm:$0xf] %vm31_vm0, %v29_v12  ;;  %33 = vst.msk [vmem:[%s97_s4 + $0x4] sm:$0xf] %vm31_vm0, %v30_v13 }

// kernel: _lambda_.37
= control target key start
LH: loop header
LB: loop body
LE: loop exit
PB: predicated region body
PF: predicated region fallthrough
CT: control target
= control target key end

     0   :  { %vm104_vm0 = vcmask 1041408   ;;  %vm79_vm1 = vcmask 31744   ;;  %vm269_vm2 = vcmask 60416   ;;  %s500_s1 = inlined_call_operand.vmem [shape: bf16[4,8], index: 1, kind: input, shape index: {}]   ;;  %s501_s0 = inlined_call_operand.vmem [shape: bf16[128,4], index: 0, kind: input, shape index: {}]   ;;  %s502_s2 = inlined_call_operand.vmem [shape: f32[1,8], index: 2, kind: input, shape index: {}]   ;;  %s503_s3 = inlined_call_operand.vmem [shape: bf16[128,8], index: 3, kind: output, shape index: {}]  }
   0x1   :  { %v31_v0 = vld [vmem:[%s500_s1] sm:$0x3]  ;;  %v372_v4 = vld [vmem:[%s501_s0 + $0x8] sm:$0xff]   ;;  %v374_v6 = vld [vmem:[%s501_s0 + $0x10] sm:$0xff]  }
   0x2   :  { %368 = vmatprep.subr.msk.bf16.mxu0 %vm104_vm0, %v31_v0  ;;  %369 = vmatprep.subr.msk.bf16.mxu1 %vm104_vm0, %v31_v0  ;;  %v106_v1 = vsel %vm104_vm0, %v31_v0, 0  ;;  %v370_v2 = vld [vmem:[%s501_s0] sm:$0xff]   ;;  %v373_v5 = vld [vmem:[%s501_s0 + $0x28] sm:$0xff]   ;;  %v375_v7 = vld [vmem:[%s501_s0 + $0x30] sm:$0xff]  }
   0x3   :  { %349 = vmatpush3.bf16.msra.mxu0 %v106_v1  ;;  %367 = vmatpush3.bf16.msra.mxu1 %v106_v1  ;;  %v371_v3 = vld [vmem:[%s501_s0 + $0x20] sm:$0xff]   ;;  %v376_v8 = vld [vmem:[%s501_s0 + $0x18] sm:$0xff]  }
   0x4   :  { %350 = vmatprep.mubr.msk.bf16.mxu0 %vm79_vm1, %v370_v2  ;;  %358 = vmatprep.mubr.msk.bf16.mxu1 %vm79_vm1, %v371_v3  ;;  %v377_v9 = vld [vmem:[%s501_s0 + $0x38] sm:$0xff]   ;;  %v290_v10 = vld [vmem:[%s502_s2] ss:$0 sm:$0xff] }
   0x6   :  { %351 = vmatmul.mubr.msk.bf16.vlgmr.msra.gmra.mxu0 %vm79_vm1, %v372_v4  ;;  %359 = vmatmul.mubr.msk.bf16.vlgmr.msra.gmra.mxu1 %vm79_vm1, %v373_v5 }
   0x7   :  { %354 = vmatprep.mubr.msk.bf16.mxu0 %vm79_vm1, %v374_v6  ;;  %362 = vmatprep.mubr.msk.bf16.mxu1 %vm79_vm1, %v375_v7 }
   0xe   :  { %355 = vmatmul.mubr.msk.bf16.gmra.mxu0 %vm79_vm1, %v376_v8  ;;  %363 = vmatmul.mubr.msk.bf16.gmra.mxu1 %vm79_vm1, %v377_v9 }
  0xc6   :  { %v352_v11 = vpop.f32.mrf.mxu0  ;;  %v360_v13 = vpop.f32.mrf.mxu1 }
  0xc7   :  { %v151_v12 = vadd.f32 %v352_v11, %v290_v10  ;;  %v183_v14 = vadd.f32 %v360_v13, %v290_v10 }
  0xc8   :  { %v142_v15 = vpop.f32.mrf.mxu0  ;;  %v174_v18 = vpop.f32.mrf.mxu1 }
  0xc9   :  { %v325_v16 = vpack.c.bf16 %v151_v12, %v151_v12  ;;  %v143_v17 = vadd.f32 %v290_v10, %v142_v15  ;;  %v333_v19 = vpack.c.bf16 %v183_v14, %v183_v14  ;;  %v175_v20 = vadd.f32 %v290_v10, %v174_v18 }
  0xca   :  { %v353_v21 = vpop.f32.mrf.mxu0  ;;  %v361_v24 = vpop.f32.mrf.mxu1 }
  0xcb   :  { %272 = vst.msk [vmem:[%s503_s3 + $0x8] sm:$0xf] %vm269_vm2, %v325_v16  ;;  %v323_v22 = vpack.c.bf16 %v143_v17, %v143_v17  ;;  %v154_v23 = vadd.f32 %v353_v21, %v290_v10  ;;  %280 = vst.msk [vmem:[%s503_s3 + $0x28] sm:$0xf] %vm269_vm2, %v333_v19  ;;  %v331_v25 = vpack.c.bf16 %v175_v20, %v175_v20 }
  0xcc   :  { %v186_v26 = vadd.f32 %v361_v24, %v290_v10  ;;  %v145_v27 = vpop.f32.mrf.mxu0  ;;  %v177_v30 = vpop.f32.mrf.mxu1 }
  0xcd   :  { %270 = vst.msk [vmem:[%s503_s3] sm:$0xf] %vm269_vm2, %v323_v22  ;;  %v326_v28 = vpack.c.bf16 %v154_v23, %v154_v23  ;;  %v146_v29 = vadd.f32 %v290_v10, %v145_v27  ;;  %278 = vst.msk [vmem:[%s503_s3 + $0x20] sm:$0xf] %vm269_vm2, %v331_v25  ;;  %v178_v32 = vadd.f32 %v290_v10, %v177_v30 }
  0xce   :  { %v334_v31 = vpack.c.bf16 %v186_v26, %v186_v26  ;;  %v356_v33 = vpop.f32.mrf.mxu0  ;;  %v364_v36 = vpop.f32.mrf.mxu1 }
  0xcf   :  { %273 = vst.msk [vmem:[%s503_s3 + $0xc] sm:$0xf] %vm269_vm2, %v326_v28  ;;  %v324_v34 = vpack.c.bf16 %v146_v29, %v146_v29  ;;  %v167_v35 = vadd.f32 %v356_v33, %v290_v10  ;;  %v332_v37 = vpack.c.bf16 %v178_v32, %v178_v32  ;;  %v199_v38 = vadd.f32 %v364_v36, %v290_v10 }
  0xd0   :  { %281 = vst.msk [vmem:[%s503_s3 + $0x2c] sm:$0xf] %vm269_vm2, %v334_v31  ;;  %v158_v39 = vpop.f32.mrf.mxu0  ;;  %v190_v42 = vpop.f32.mrf.mxu1 }
  0xd1   :  { %271 = vst.msk [vmem:[%s503_s3 + $0x4] sm:$0xf] %vm269_vm2, %v324_v34  ;;  %v329_v40 = vpack.c.bf16 %v167_v35, %v167_v35  ;;  %v159_v41 = vadd.f32 %v290_v10, %v158_v39  ;;  %279 = vst.msk [vmem:[%s503_s3 + $0x24] sm:$0xf] %vm269_vm2, %v332_v37  ;;  %v337_v43 = vpack.c.bf16 %v199_v38, %v199_v38 }
  0xd2   :  { %v191_v44 = vadd.f32 %v290_v10, %v190_v42  ;;  %v357_v45 = vpop.f32.mrf.mxu0  ;;  %v365_v48 = vpop.f32.mrf.mxu1 }
  0xd3   :  { %276 = vst.msk [vmem:[%s503_s3 + $0x18] sm:$0xf] %vm269_vm2, %v329_v40  ;;  %v327_v46 = vpack.c.bf16 %v159_v41, %v159_v41  ;;  %v170_v47 = vadd.f32 %v357_v45, %v290_v10  ;;  %284 = vst.msk [vmem:[%s503_s3 + $0x38] sm:$0xf] %vm269_vm2, %v337_v43  ;;  %v202_v50 = vadd.f32 %v365_v48, %v290_v10 }
  0xd4   :  { %v335_v49 = vpack.c.bf16 %v191_v44, %v191_v44  ;;  %v161_v51 = vpop.f32.mrf.mxu0  ;;  %v193_v54 = vpop.f32.mrf.mxu1 }
  0xd5   :  { %274 = vst.msk [vmem:[%s503_s3 + $0x10] sm:$0xf] %vm269_vm2, %v327_v46  ;;  %v330_v52 = vpack.c.bf16 %v170_v47, %v170_v47  ;;  %v162_v53 = vadd.f32 %v290_v10, %v161_v51  ;;  %v338_v55 = vpack.c.bf16 %v202_v50, %v202_v50  ;;  %v194_v56 = vadd.f32 %v290_v10, %v193_v54 }
  0xd6   :  { %282 = vst.msk [vmem:[%s503_s3 + $0x30] sm:$0xf] %vm269_vm2, %v335_v49 }
  0xd7   :  { %277 = vst.msk [vmem:[%s503_s3 + $0x1c] sm:$0xf] %vm269_vm2, %v330_v52  ;;  %v328_v57 = vpack.c.bf16 %v162_v53, %v162_v53  ;;  %285 = vst.msk [vmem:[%s503_s3 + $0x3c] sm:$0xf] %vm269_vm2, %v338_v55  ;;  %v336_v58 = vpack.c.bf16 %v194_v56, %v194_v56 }
  0xd9   :  { %275 = vst.msk [vmem:[%s503_s3 + $0x14] sm:$0xf] %vm269_vm2, %v328_v57  ;;  %283 = vst.msk [vmem:[%s503_s3 + $0x34] sm:$0xf] %vm269_vm2, %v336_v58 }

// kernel: _lambda_.38
= control target key start
LH: loop header
LB: loop body
LE: loop exit
PB: predicated region body
PF: predicated region fallthrough
CT: control target
= control target key end

     0   :  { %vm123_vm0 = vcmask 1041408   ;;  %vm98_vm1 = vcmask 293888   ;;  %vm304_vm2 = vcmask 60416   ;;  %s575_s1 = inlined_call_operand.vmem [shape: bf16[36,8], index: 1, kind: input, shape index: {}]   ;;  %s576_s0 = inlined_call_operand.vmem [shape: bf16[128,36], index: 0, kind: input, shape index: {}]   ;;  %s577_s2 = inlined_call_operand.vmem [shape: f32[1,8], index: 2, kind: input, shape index: {}]   ;;  %s578_s3 = inlined_call_operand.vmem [shape: bf16[128,8], index: 3, kind: output, shape index: {}]  }
   0x1   :  { %v418_v0 = vld [vmem:[%s575_s1 + $0x10] ss:$0 sps:$4 sm:$0x33]   ;;  %v419_v1 = vld [vmem:[%s575_s1 + $0x8] sm:$0xff]   ;;  %v420_v3 = vld [vmem:[%s575_s1] sm:$0xff]  }
   0x2   :  { %416 = vmatprep.subr.msk.bf16.mxu0 %vm123_vm0, %v418_v0  ;;  %417 = vmatprep.subr.msk.bf16.mxu1 %vm123_vm0, %v418_v0  ;;  %v125_v2 = vsel %vm123_vm0, %v418_v0, 0  ;;  %v421_v4 = vld [vmem:[%s576_s0] sm:$0xff]   ;;  %v423_v6 = vld [vmem:[%s576_s0 + $0x8] sm:$0xff]   ;;  %v425_v8 = vld [vmem:[%s576_s0 + $0x10] sm:$0xff]  }
   0x3   :  { %389 = vmatpush3.bf16.msra.mxu0 %v125_v2  ;;  %413 = vmatpush3.bf16.msra.mxu1 %v125_v2  ;;  %v422_v5 = vld [vmem:[%s576_s0 + $0x20] sm:$0xff]   ;;  %v424_v7 = vld [vmem:[%s576_s0 + $0x28] sm:$0xff]   ;;  %v426_v9 = vld [vmem:[%s576_s0 + $0x30] sm:$0xff]  }
   0x4   :  { %390 = vmatprep.subr.bf16.mxu0 %v419_v1  ;;  %411 = vmatprep.subr.bf16.mxu1 %v419_v1  ;;  %v427_v10 = vld [vmem:[%s576_s0 + $0x18] sm:$0xff]   ;;  %v493_v12 = vld [vmem:[%s577_s2] ss:$0 sm:$0xff] }
   0x5   :  { %394 = vmatprep.mubr.msk.bf16.mxu0 %vm98_vm1, %v421_v4  ;;  %402 = vmatprep.mubr.msk.bf16.mxu1 %vm98_vm1, %v422_v5  ;;  %v428_v11 = vld [vmem:[%s576_s0 + $0x38] sm:$0xff]  }
   0x7   :  { %391 = vmatpush3.bf16.msra.mxu0 %v419_v1  ;;  %414 = vmatpush3.bf16.msra.mxu1 %v419_v1 }
   0x8   :  { %392 = vmatprep.subr.bf16.mxu0 %v420_v3  ;;  %412 = vmatprep.subr.bf16.mxu1 %v420_v3 }
   0xb   :  { %393 = vmatpush3.bf16.msra.mxu0 %v420_v3  ;;  %415 = vmatpush3.bf16.msra.mxu1 %v420_v3 }
   0xe   :  { %395 = vmatmul.mubr.msk.bf16.vlgmr.msra.gmra.mxu0 %vm98_vm1, %v423_v6  ;;  %403 = vmatmul.mubr.msk.bf16.vlgmr.msra.gmra.mxu1 %vm98_vm1, %v424_v7 }
   0xf   :  { %398 = vmatprep.mubr.msk.bf16.mxu0 %vm98_vm1, %v425_v8  ;;  %406 = vmatprep.mubr.msk.bf16.mxu1 %vm98_vm1, %v426_v9 }
  0x16   :  { %399 = vmatmul.mubr.msk.bf16.gmra.mxu0 %vm98_vm1, %v427_v10  ;;  %407 = vmatmul.mubr.msk.bf16.gmra.mxu1 %vm98_vm1, %v428_v11 }
  0xce   :  { %v396_v13 = vpop.f32.mrf.mxu0  ;;  %v404_v14 = vpop.f32.mrf.mxu1 }
  0xcf   :  { %v170_v15 = vadd.f32 %v396_v13, %v493_v12  ;;  %v202_v16 = vadd.f32 %v404_v14, %v493_v12 }
  0xd0   :  { %v161_v17 = vpop.f32.mrf.mxu0  ;;  %v193_v18 = vpop.f32.mrf.mxu1 }
  0xd1   :  { %v226_v19 = vmax.f32 %v170_v15, 0.0  ;;  %v234_v20 = vmax.f32 %v202_v16, 0.0  ;;  %v162_v21 = vadd.f32 %v493_v12, %v161_v17  ;;  %v194_v22 = vadd.f32 %v493_v12, %v193_v18 }
  0xd2   :  { %v397_v23 = vpop.f32.mrf.mxu0  ;;  %v405_v24 = vpop.f32.mrf.mxu1 }
  0xd3   :  { %v363_v25 = vpack.c.bf16 %v226_v19, %v226_v19  ;;  %v371_v26 = vpack.c.bf16 %v234_v20, %v234_v20  ;;  %v224_v27 = vmax.f32 %v162_v21, 0.0  ;;  %v232_v28 = vmax.f32 %v194_v22, 0.0 }
  0xd4   :  { %v173_v29 = vadd.f32 %v397_v23, %v493_v12  ;;  %v205_v30 = vadd.f32 %v405_v24, %v493_v12  ;;  %v164_v31 = vpop.f32.mrf.mxu0  ;;  %v196_v32 = vpop.f32.mrf.mxu1 }
  0xd5   :  { %307 = vst.msk [vmem:[%s578_s3 + $0x8] sm:$0xf] %vm304_vm2, %v363_v25  ;;  %315 = vst.msk [vmem:[%s578_s3 + $0x28] sm:$0xf] %vm304_vm2, %v371_v26  ;;  %v361_v33 = vpack.c.bf16 %v224_v27, %v224_v27  ;;  %v369_v34 = vpack.c.bf16 %v232_v28, %v232_v28  ;;  %v165_v35 = vadd.f32 %v493_v12, %v164_v31 }
  0xd6   :  { %v197_v36 = vadd.f32 %v493_v12, %v196_v32  ;;  %v227_v37 = vmax.f32 %v173_v29, 0.0  ;;  %v235_v38 = vmax.f32 %v205_v30, 0.0  ;;  %v400_v39 = vpop.f32.mrf.mxu0  ;;  %v408_v40 = vpop.f32.mrf.mxu1 }
  0xd7   :  { %305 = vst.msk [vmem:[%s578_s3] sm:$0xf] %vm304_vm2, %v361_v33  ;;  %313 = vst.msk [vmem:[%s578_s3 + $0x20] sm:$0xf] %vm304_vm2, %v369_v34  ;;  %v225_v41 = vmax.f32 %v165_v35, 0.0  ;;  %v186_v43 = vadd.f32 %v400_v39, %v493_v12  ;;  %v218_v44 = vadd.f32 %v408_v40, %v493_v12 }
  0xd8   :  { %v233_v42 = vmax.f32 %v197_v36, 0.0  ;;  %v364_v45 = vpack.c.bf16 %v227_v37, %v227_v37  ;;  %v372_v46 = vpack.c.bf16 %v235_v38, %v235_v38  ;;  %v177_v47 = vpop.f32.mrf.mxu0  ;;  %v209_v48 = vpop.f32.mrf.mxu1 }
  0xd9   :  { %v362_v49 = vpack.c.bf16 %v225_v41, %v225_v41  ;;  %v230_v51 = vmax.f32 %v186_v43, 0.0  ;;  %v238_v52 = vmax.f32 %v218_v44, 0.0  ;;  %v178_v53 = vadd.f32 %v493_v12, %v177_v47 }
  0xda   :  { %v370_v50 = vpack.c.bf16 %v233_v42, %v233_v42  ;;  %308 = vst.msk [vmem:[%s578_s3 + $0xc] sm:$0xf] %vm304_vm2, %v364_v45  ;;  %316 = vst.msk [vmem:[%s578_s3 + $0x2c] sm:$0xf] %vm304_vm2, %v372_v46  ;;  %v210_v54 = vadd.f32 %v493_v12, %v209_v48  ;;  %v401_v55 = vpop.f32.mrf.mxu0  ;;  %v409_v56 = vpop.f32.mrf.mxu1 }
  0xdb   :  { %306 = vst.msk [vmem:[%s578_s3 + $0x4] sm:$0xf] %vm304_vm2, %v362_v49  ;;  %v367_v57 = vpack.c.bf16 %v230_v51, %v230_v51  ;;  %v375_v58 = vpack.c.bf16 %v238_v52, %v238_v52  ;;  %v189_v59 = vadd.f32 %v401_v55, %v493_v12  ;;  %v221_v60 = vadd.f32 %v409_v56, %v493_v12 }
  0xdc   :  { %314 = vst.msk [vmem:[%s578_s3 + $0x24] sm:$0xf] %vm304_vm2, %v370_v50  ;;  %v228_v61 = vmax.f32 %v178_v53, 0.0  ;;  %v236_v62 = vmax.f32 %v210_v54, 0.0  ;;  %v180_v63 = vpop.f32.mrf.mxu0  ;;  %v212_v0 = vpop.f32.mrf.mxu1 }
  0xdd   :  { %311 = vst.msk [vmem:[%s578_s3 + $0x18] sm:$0xf] %vm304_vm2, %v367_v57  ;;  %319 = vst.msk [vmem:[%s578_s3 + $0x38] sm:$0xf] %vm304_vm2, %v375_v58  ;;  %v231_v1 = vmax.f32 %v189_v59, 0.0  ;;  %v239_v2 = vmax.f32 %v221_v60, 0.0  ;;  %v181_v3 = vadd.f32 %v493_v12, %v180_v63  ;;  %v213_v4 = vadd.f32 %v493_v12, %v212_v0 }
  0xde   :  { %v365_v5 = vpack.c.bf16 %v228_v61, %v228_v61  ;;  %v373_v6 = vpack.c.bf16 %v236_v62, %v236_v62 }
  0xdf   :  { %v368_v7 = vpack.c.bf16 %v231_v1, %v231_v1  ;;  %v376_v8 = vpack.c.bf16 %v239_v2, %v239_v2  ;;  %v229_v9 = vmax.f32 %v181_v3, 0.0  ;;  %v237_v10 = vmax.f32 %v213_v4, 0.0 }
  0xe0   :  { %309 = vst.msk [vmem:[%s578_s3 + $0x10] sm:$0xf] %vm304_vm2, %v365_v5  ;;  %317 = vst.msk [vmem:[%s578_s3 + $0x30] sm:$0xf] %vm304_vm2, %v373_v6 }
  0xe1   :  { %312 = vst.msk [vmem:[%s578_s3 + $0x1c] sm:$0xf] %vm304_vm2, %v368_v7  ;;  %320 = vst.msk [vmem:[%s578_s3 + $0x3c] sm:$0xf] %vm304_vm2, %v376_v8  ;;  %v366_v11 = vpack.c.bf16 %v229_v9, %v229_v9  ;;  %v374_v12 = vpack.c.bf16 %v237_v10, %v237_v10 }
  0xe3   :  { %310 = vst.msk [vmem:[%s578_s3 + $0x14] sm:$0xf] %vm304_vm2, %v366_v11  ;;  %318 = vst.msk [vmem:[%s578_s3 + $0x34] sm:$0xf] %vm304_vm2, %v374_v12 }

// kernel: _lambda_.39
= control target key start
LH: loop header
LB: loop body
LE: loop exit
PB: predicated region body
PF: predicated region fallthrough
CT: control target
= control target key end

     0   :  { %vm142_vm0 = vcmask 1043456   ;;  %vm117_vm1 = vcmask 588800   ;;  %vm371_vm2 = vcmask 60416   ;;  %s762_s1 = inlined_call_operand.vmem [shape: bf16[72,8], index: 1, kind: input, shape index: {}]   ;;  %s763_s0 = inlined_call_operand.vmem [shape: bf16[128,72], index: 0, kind: input, shape index: {}]   ;;  %s764_s3 = inlined_call_operand.vmem [shape: bf16[128,8], index: 3, kind: input, shape index: {}]   ;;  %s765_s2 = inlined_call_operand.vmem [shape: f32[1,8], index: 2, kind: input, shape index: {}]   ;;  %s766_s4 = inlined_call_operand.vmem [shape: bf16[128,8], index: 4, kind: output, shape index: {}]  }
   0x1   :  { %v536_v0 = vld [vmem:[%s762_s1 + $0x20] ss:$0 sps:$4 sm:$0xff]   ;;  %v537_v1 = vld [vmem:[%s762_s1 + $0x18] sm:$0xff]   ;;  %v538_v3 = vld [vmem:[%s762_s1 + $0x10] sm:$0xff]  }
   0x2   :  { %534 = vmatprep.subr.msk.bf16.mxu0 %vm142_vm0, %v536_v0  ;;  %535 = vmatprep.subr.msk.bf16.mxu1 %vm142_vm0, %v536_v0  ;;  %v144_v2 = vsel %vm142_vm0, %v536_v0, 0  ;;  %v541_v4 = vld [vmem:[%s763_s0] sm:$0xff]   ;;  %v539_v6 = vld [vmem:[%s762_s1 + $0x8] sm:$0xff]   ;;  %v545_v10 = vld [vmem:[%s763_s0 + $0x10] sm:$0xff]  }
   0x3   :  { %499 = vmatpush3.bf16.msra.mxu0 %v144_v2  ;;  %529 = vmatpush3.bf16.msra.mxu1 %v144_v2  ;;  %v542_v5 = vld [vmem:[%s763_s0 + $0x20] sm:$0xff]   ;;  %v543_v8 = vld [vmem:[%s763_s0 + $0x8] sm:$0xff]   ;;  %v546_v11 = vld [vmem:[%s763_s0 + $0x30] sm:$0xff]  }
   0x4   :  { %500 = vmatprep.subr.bf16.mxu0 %v537_v1  ;;  %525 = vmatprep.subr.bf16.mxu1 %v537_v1  ;;  %v540_v7 = vld [vmem:[%s762_s1] sm:$0xff]   ;;  %v544_v9 = vld [vmem:[%s763_s0 + $0x28] sm:$0xff]   ;;  %v547_v12 = vld [vmem:[%s763_s0 + $0x18] sm:$0xff]  }
   0x5   :  { %508 = vmatprep.mubr.msk.bf16.mxu0 %vm117_vm1, %v541_v4  ;;  %516 = vmatprep.mubr.msk.bf16.mxu1 %vm117_vm1, %v542_v5  ;;  %v548_v13 = vld [vmem:[%s763_s0 + $0x38] sm:$0xff]   ;;  %v478_v14 = vld [vmem:[%s764_s3 + $0x8] sm:$0xff]   ;;  %v630_v16 = vld [vmem:[%s764_s3] sm:$0xff]  }
   0x6   :  { %v482_v15 = vld [vmem:[%s764_s3 + $0x28] sm:$0xff]   ;;  %v635_v17 = vld [vmem:[%s764_s3 + $0x20] sm:$0xff]   ;;  %v452_v19 = vunpack.c.l.bf16 %v478_v14  ;;  %v645_v21 = vld [vmem:[%s764_s3 + $0x18] sm:$0xff]   ;;  %v448_v25 = vunpack.c.l.bf16 %v630_v16  ;;  %v453_v27 = vunpack.c.h.bf16 %v478_v14  ;;  %v449_v35 = vunpack.c.h.bf16 %v630_v16 }
   0x7   :  { %501 = vmatpush3.bf16.msra.mxu0 %v537_v1  ;;  %530 = vmatpush3.bf16.msra.mxu1 %v537_v1  ;;  %v640_v18 = vld [vmem:[%s765_s2] ss:$0 sm:$0xff]  ;;  %v468_v20 = vunpack.c.l.bf16 %v482_v15  ;;  %v650_v22 = vld [vmem:[%s764_s3 + $0x38] sm:$0xff]   ;;  %v464_v26 = vunpack.c.l.bf16 %v635_v17  ;;  %v469_v30 = vunpack.c.h.bf16 %v482_v15  ;;  %v659_v31 = vld [vmem:[%s764_s3 + $0x10] sm:$0xff]   ;;  %v465_v36 = vunpack.c.h.bf16 %v635_v17 }
   0x8   :  { %502 = vmatprep.subr.bf16.mxu0 %v538_v3  ;;  %526 = vmatprep.subr.bf16.mxu1 %v538_v3  ;;  %v664_v32 = vld [vmem:[%s764_s3 + $0x30] sm:$0xff]   ;;  %v460_v37 = vunpack.c.l.bf16 %v645_v21  ;;  %v476_v38 = vunpack.c.l.bf16 %v650_v22  ;;  %v456_v45 = vunpack.c.l.bf16 %v659_v31  ;;  %v461_v47 = vunpack.c.h.bf16 %v645_v21 }
   0x9   :  { %v472_v46 = vunpack.c.l.bf16 %v664_v32  ;;  %v477_v48 = vunpack.c.h.bf16 %v650_v22  ;;  %v457_v57 = vunpack.c.h.bf16 %v659_v31  ;;  %v473_v58 = vunpack.c.h.bf16 %v664_v32 }
   0xb   :  { %503 = vmatpush3.bf16.msra.mxu0 %v538_v3  ;;  %531 = vmatpush3.bf16.msra.mxu1 %v538_v3 }
   0xc   :  { %504 = vmatprep.subr.bf16.mxu0 %v539_v6  ;;  %527 = vmatprep.subr.bf16.mxu1 %v539_v6 }
   0xf   :  { %505 = vmatpush3.bf16.msra.mxu0 %v539_v6  ;;  %532 = vmatpush3.bf16.msra.mxu1 %v539_v6 }
  0x10   :  { %506 = vmatprep.subr.bf16.mxu0 %v540_v7  ;;  %528 = vmatprep.subr.bf16.mxu1 %v540_v7 }
  0x13   :  { %507 = vmatpush3.bf16.msra.mxu0 %v540_v7  ;;  %533 = vmatpush3.bf16.msra.mxu1 %v540_v7 }
  0x16   :  { %509 = vmatmul.mubr.msk.bf16.vlgmr.msra.gmra.mxu0 %vm117_vm1, %v543_v8  ;;  %517 = vmatmul.mubr.msk.bf16.vlgmr.msra.gmra.mxu1 %vm117_vm1, %v544_v9 }
  0x17   :  { %512 = vmatprep.mubr.msk.bf16.mxu0 %vm117_vm1, %v545_v10  ;;  %520 = vmatprep.mubr.msk.bf16.mxu1 %vm117_vm1, %v546_v11 }
  0x1e   :  { %513 = vmatmul.mubr.msk.bf16.gmra.mxu0 %vm117_vm1, %v547_v12  ;;  %521 = vmatmul.mubr.msk.bf16.gmra.mxu1 %vm117_vm1, %v548_v13 }
  0xd6   :  { %v510_v23 = vpop.f32.mrf.mxu0  ;;  %v518_v24 = vpop.f32.mrf.mxu1 }
  0xd7   :  { %v189_v28 = vadd.f32 %v510_v23, %v640_v18  ;;  %v221_v29 = vadd.f32 %v518_v24, %v640_v18 }
  0xd8   :  { %v180_v33 = vpop.f32.mrf.mxu0  ;;  %v212_v34 = vpop.f32.mrf.mxu1 }
  0xd9   :  { %v277_v39 = vadd.f32 %v452_v19, %v189_v28  ;;  %v285_v40 = vadd.f32 %v468_v20, %v221_v29  ;;  %v181_v41 = vadd.f32 %v640_v18, %v180_v33  ;;  %v213_v42 = vadd.f32 %v640_v18, %v212_v34 }
  0xda   :  { %v511_v43 = vpop.f32.mrf.mxu0  ;;  %v519_v44 = vpop.f32.mrf.mxu1 }
  0xdb   :  { %v293_v49 = vmax.f32 %v277_v39, 0.0  ;;  %v301_v50 = vmax.f32 %v285_v40, 0.0  ;;  %v275_v51 = vadd.f32 %v448_v25, %v181_v41  ;;  %v283_v52 = vadd.f32 %v464_v26, %v213_v42 }
  0xdc   :  { %v192_v53 = vadd.f32 %v511_v43, %v640_v18  ;;  %v224_v54 = vadd.f32 %v519_v44, %v640_v18  ;;  %v183_v55 = vpop.f32.mrf.mxu0  ;;  %v215_v56 = vpop.f32.mrf.mxu1 }
  0xdd   :  { %v432_v59 = vpack.c.bf16 %v293_v49, %v293_v49  ;;  %v440_v60 = vpack.c.bf16 %v301_v50, %v301_v50  ;;  %v291_v61 = vmax.f32 %v275_v51, 0.0  ;;  %v299_v62 = vmax.f32 %v283_v52, 0.0 }
  0xde   :  { %v278_v63 = vadd.f32 %v453_v27, %v192_v53  ;;  %v286_v0 = vadd.f32 %v469_v30, %v224_v54  ;;  %v184_v1 = vadd.f32 %v640_v18, %v183_v55  ;;  %v216_v2 = vadd.f32 %v640_v18, %v215_v56  ;;  %v514_v3 = vpop.f32.mrf.mxu0  ;;  %v522_v4 = vpop.f32.mrf.mxu1 }
  0xdf   :  { %374 = vst.msk [vmem:[%s766_s4 + $0x8] sm:$0xf] %vm371_vm2, %v432_v59  ;;  %382 = vst.msk [vmem:[%s766_s4 + $0x28] sm:$0xf] %vm371_vm2, %v440_v60  ;;  %v430_v5 = vpack.c.bf16 %v291_v61, %v291_v61  ;;  %v438_v6 = vpack.c.bf16 %v299_v62, %v299_v62  ;;  %v205_v7 = vadd.f32 %v514_v3, %v640_v18 }
  0xe0   :  { %v237_v8 = vadd.f32 %v522_v4, %v640_v18  ;;  %v294_v9 = vmax.f32 %v278_v63, 0.0  ;;  %v302_v10 = vmax.f32 %v286_v0, 0.0  ;;  %v276_v11 = vadd.f32 %v449_v35, %v184_v1  ;;  %v196_v13 = vpop.f32.mrf.mxu0  ;;  %v228_v14 = vpop.f32.mrf.mxu1 }
  0xe1   :  { %v284_v12 = vadd.f32 %v465_v36, %v216_v2  ;;  %372 = vst.msk [vmem:[%s766_s4] sm:$0xf] %vm371_vm2, %v430_v5  ;;  %380 = vst.msk [vmem:[%s766_s4 + $0x20] sm:$0xf] %vm371_vm2, %v438_v6  ;;  %v281_v15 = vadd.f32 %v460_v37, %v205_v7  ;;  %v197_v17 = vadd.f32 %v640_v18, %v196_v13 }
  0xe2   :  { %v289_v16 = vadd.f32 %v476_v38, %v237_v8  ;;  %v229_v19 = vadd.f32 %v640_v18, %v228_v14  ;;  %v433_v20 = vpack.c.bf16 %v294_v9, %v294_v9  ;;  %v441_v23 = vpack.c.bf16 %v302_v10, %v302_v10  ;;  %v515_v26 = vpop.f32.mrf.mxu0  ;;  %v523_v27 = vpop.f32.mrf.mxu1 }
  0xe3   :  { %v292_v24 = vmax.f32 %v276_v11, 0.0  ;;  %v300_v25 = vmax.f32 %v284_v12, 0.0  ;;  %v297_v28 = vmax.f32 %v281_v15, 0.0  ;;  %v279_v30 = vadd.f32 %v456_v45, %v197_v17 }
  0xe4   :  { %v305_v29 = vmax.f32 %v289_v16, 0.0  ;;  %v287_v33 = vadd.f32 %v472_v46, %v229_v19  ;;  %375 = vst.msk [vmem:[%s766_s4 + $0xc] sm:$0xf] %vm371_vm2, %v433_v20  ;;  %383 = vst.msk [vmem:[%s766_s4 + $0x2c] sm:$0xf] %vm371_vm2, %v441_v23  ;;  %v208_v36 = vadd.f32 %v515_v26, %v640_v18  ;;  %v240_v37 = vadd.f32 %v523_v27, %v640_v18  ;;  %v199_v38 = vpop.f32.mrf.mxu0  ;;  %v231_v39 = vpop.f32.mrf.mxu1 }
  0xe5   :  { %v431_v34 = vpack.c.bf16 %v292_v24, %v292_v24  ;;  %v439_v35 = vpack.c.bf16 %v300_v25, %v300_v25  ;;  %v436_v40 = vpack.c.bf16 %v297_v28, %v297_v28  ;;  %v295_v42 = vmax.f32 %v279_v30, 0.0 }
  0xe6   :  { %v444_v41 = vpack.c.bf16 %v305_v29, %v305_v29  ;;  %v303_v43 = vmax.f32 %v287_v33, 0.0  ;;  %v282_v44 = vadd.f32 %v461_v47, %v208_v36  ;;  %v290_v45 = vadd.f32 %v477_v48, %v240_v37 }
  0xe7   :  { %373 = vst.msk [vmem:[%s766_s4 + $0x4] sm:$0xf] %vm371_vm2, %v431_v34  ;;  %381 = vst.msk [vmem:[%s766_s4 + $0x24] sm:$0xf] %vm371_vm2, %v439_v35  ;;  %v200_v46 = vadd.f32 %v640_v18, %v199_v38  ;;  %v232_v49 = vadd.f32 %v640_v18, %v231_v39  ;;  %v434_v50 = vpack.c.bf16 %v295_v42, %v295_v42 }
  0xe8   :  { %378 = vst.msk [vmem:[%s766_s4 + $0x18] sm:$0xf] %vm371_vm2, %v436_v40  ;;  %386 = vst.msk [vmem:[%s766_s4 + $0x38] sm:$0xf] %vm371_vm2, %v444_v41  ;;  %v442_v21 = vpack.c.bf16 %v303_v43, %v303_v43  ;;  %v298_v47 = vmax.f32 %v282_v44, 0.0  ;;  %v306_v51 = vmax.f32 %v290_v45, 0.0 }
  0xe9   :  { %v280_v22 = vadd.f32 %v457_v57, %v200_v46  ;;  %v288_v18 = vadd.f32 %v473_v58, %v232_v49  ;;  %376 = vst.msk [vmem:[%s766_s4 + $0x10] sm:$0xf] %vm371_vm2, %v434_v50 }
  0xea   :  { %384 = vst.msk [vmem:[%s766_s4 + $0x30] sm:$0xf] %vm371_vm2, %v442_v21  ;;  %v437_v48 = vpack.c.bf16 %v298_v47, %v298_v47  ;;  %v445_v52 = vpack.c.bf16 %v306_v51, %v306_v51 }
  0xeb   :  { %v296_v53 = vmax.f32 %v280_v22, 0.0  ;;  %v304_v54 = vmax.f32 %v288_v18, 0.0 }
  0xec   :  { %379 = vst.msk [vmem:[%s766_s4 + $0x1c] sm:$0xf] %vm371_vm2, %v437_v48  ;;  %387 = vst.msk [vmem:[%s766_s4 + $0x3c] sm:$0xf] %vm371_vm2, %v445_v52 }
  0xed   :  { %v435_v31 = vpack.c.bf16 %v296_v53, %v296_v53  ;;  %v443_v32 = vpack.c.bf16 %v304_v54, %v304_v54 }
  0xef   :  { %377 = vst.msk [vmem:[%s766_s4 + $0x14] sm:$0xf] %vm371_vm2, %v435_v31  ;;  %385 = vst.msk [vmem:[%s766_s4 + $0x34] sm:$0xf] %vm371_vm2, %v443_v32 }

// kernel: _lambda_.40
= control target key start
LH: loop header
LB: loop body
LE: loop exit
PB: predicated region body
PF: predicated region fallthrough
CT: control target
= control target key end

     0   :  { %vm139_vm0 = vcmask 1043456   ;;  %vm114_vm1 = vcmask 588800   ;;  %vm320_vm2 = vcmask 60416   ;;  %s611_s1 = inlined_call_operand.vmem [shape: bf16[72,8], index: 1, kind: input, shape index: {}]   ;;  %s612_s0 = inlined_call_operand.vmem [shape: bf16[128,72], index: 0, kind: input, shape index: {}]   ;;  %s613_s2 = inlined_call_operand.vmem [shape: f32[1,8], index: 2, kind: input, shape index: {}]   ;;  %s614_s3 = inlined_call_operand.vmem [shape: bf16[128,8], index: 3, kind: output, shape index: {}]  }
   0x1   :  { %v446_v0 = vld [vmem:[%s611_s1 + $0x20] ss:$0 sps:$4 sm:$0xff]   ;;  %v447_v1 = vld [vmem:[%s611_s1 + $0x18] sm:$0xff]   ;;  %v448_v3 = vld [vmem:[%s611_s1 + $0x10] sm:$0xff]  }
   0x2   :  { %444 = vmatprep.subr.msk.bf16.mxu0 %vm139_vm0, %v446_v0  ;;  %445 = vmatprep.subr.msk.bf16.mxu1 %vm139_vm0, %v446_v0  ;;  %v141_v2 = vsel %vm139_vm0, %v446_v0, 0  ;;  %v451_v4 = vld [vmem:[%s612_s0] sm:$0xff]   ;;  %v449_v6 = vld [vmem:[%s611_s1 + $0x8] sm:$0xff]   ;;  %v455_v10 = vld [vmem:[%s612_s0 + $0x10] sm:$0xff]  }
   0x3   :  { %409 = vmatpush3.bf16.msra.mxu0 %v141_v2  ;;  %439 = vmatpush3.bf16.msra.mxu1 %v141_v2  ;;  %v452_v5 = vld [vmem:[%s612_s0 + $0x20] sm:$0xff]   ;;  %v453_v8 = vld [vmem:[%s612_s0 + $0x8] sm:$0xff]   ;;  %v456_v11 = vld [vmem:[%s612_s0 + $0x30] sm:$0xff]  }
   0x4   :  { %410 = vmatprep.subr.bf16.mxu0 %v447_v1  ;;  %435 = vmatprep.subr.bf16.mxu1 %v447_v1  ;;  %v450_v7 = vld [vmem:[%s611_s1] sm:$0xff]   ;;  %v454_v9 = vld [vmem:[%s612_s0 + $0x28] sm:$0xff]   ;;  %v457_v12 = vld [vmem:[%s612_s0 + $0x18] sm:$0xff]  }
   0x5   :  { %418 = vmatprep.mubr.msk.bf16.mxu0 %vm114_vm1, %v451_v4  ;;  %426 = vmatprep.mubr.msk.bf16.mxu1 %vm114_vm1, %v452_v5  ;;  %v458_v13 = vld [vmem:[%s612_s0 + $0x38] sm:$0xff]   ;;  %v529_v14 = vld [vmem:[%s613_s2] ss:$0 sm:$0xff] }
   0x7   :  { %411 = vmatpush3.bf16.msra.mxu0 %v447_v1  ;;  %440 = vmatpush3.bf16.msra.mxu1 %v447_v1 }
   0x8   :  { %412 = vmatprep.subr.bf16.mxu0 %v448_v3  ;;  %436 = vmatprep.subr.bf16.mxu1 %v448_v3 }
   0xb   :  { %413 = vmatpush3.bf16.msra.mxu0 %v448_v3  ;;  %441 = vmatpush3.bf16.msra.mxu1 %v448_v3 }
   0xc   :  { %414 = vmatprep.subr.bf16.mxu0 %v449_v6  ;;  %437 = vmatprep.subr.bf16.mxu1 %v449_v6 }
   0xf   :  { %415 = vmatpush3.bf16.msra.mxu0 %v449_v6  ;;  %442 = vmatpush3.bf16.msra.mxu1 %v449_v6 }
  0x10   :  { %416 = vmatprep.subr.bf16.mxu0 %v450_v7  ;;  %438 = vmatprep.subr.bf16.mxu1 %v450_v7 }
  0x13   :  { %417 = vmatpush3.bf16.msra.mxu0 %v450_v7  ;;  %443 = vmatpush3.bf16.msra.mxu1 %v450_v7 }
  0x16   :  { %419 = vmatmul.mubr.msk.bf16.vlgmr.msra.gmra.mxu0 %vm114_vm1, %v453_v8  ;;  %427 = vmatmul.mubr.msk.bf16.vlgmr.msra.gmra.mxu1 %vm114_vm1, %v454_v9 }
  0x17   :  { %422 = vmatprep.mubr.msk.bf16.mxu0 %vm114_vm1, %v455_v10  ;;  %430 = vmatprep.mubr.msk.bf16.mxu1 %vm114_vm1, %v456_v11 }
  0x1e   :  { %423 = vmatmul.mubr.msk.bf16.gmra.mxu0 %vm114_vm1, %v457_v12  ;;  %431 = vmatmul.mubr.msk.bf16.gmra.mxu1 %vm114_vm1, %v458_v13 }
  0xd6   :  { %v420_v15 = vpop.f32.mrf.mxu0  ;;  %v428_v16 = vpop.f32.mrf.mxu1 }
  0xd7   :  { %v186_v17 = vadd.f32 %v420_v15, %v529_v14  ;;  %v218_v18 = vadd.f32 %v428_v16, %v529_v14 }
  0xd8   :  { %v177_v19 = vpop.f32.mrf.mxu0  ;;  %v209_v20 = vpop.f32.mrf.mxu1 }
  0xd9   :  { %v242_v21 = vmax.f32 %v186_v17, 0.0  ;;  %v250_v22 = vmax.f32 %v218_v18, 0.0  ;;  %v178_v23 = vadd.f32 %v529_v14, %v177_v19  ;;  %v210_v24 = vadd.f32 %v529_v14, %v209_v20 }
  0xda   :  { %v421_v25 = vpop.f32.mrf.mxu0  ;;  %v429_v26 = vpop.f32.mrf.mxu1 }
  0xdb   :  { %v381_v27 = vpack.c.bf16 %v242_v21, %v242_v21  ;;  %v389_v28 = vpack.c.bf16 %v250_v22, %v250_v22  ;;  %v240_v29 = vmax.f32 %v178_v23, 0.0  ;;  %v248_v30 = vmax.f32 %v210_v24, 0.0 }
  0xdc   :  { %v189_v31 = vadd.f32 %v421_v25, %v529_v14  ;;  %v221_v32 = vadd.f32 %v429_v26, %v529_v14  ;;  %v180_v33 = vpop.f32.mrf.mxu0  ;;  %v212_v34 = vpop.f32.mrf.mxu1 }
  0xdd   :  { %323 = vst.msk [vmem:[%s614_s3 + $0x8] sm:$0xf] %vm320_vm2, %v381_v27  ;;  %331 = vst.msk [vmem:[%s614_s3 + $0x28] sm:$0xf] %vm320_vm2, %v389_v28  ;;  %v379_v35 = vpack.c.bf16 %v240_v29, %v240_v29  ;;  %v387_v36 = vpack.c.bf16 %v248_v30, %v248_v30  ;;  %v181_v37 = vadd.f32 %v529_v14, %v180_v33 }
  0xde   :  { %v213_v38 = vadd.f32 %v529_v14, %v212_v34  ;;  %v243_v39 = vmax.f32 %v189_v31, 0.0  ;;  %v251_v40 = vmax.f32 %v221_v32, 0.0  ;;  %v424_v41 = vpop.f32.mrf.mxu0  ;;  %v432_v42 = vpop.f32.mrf.mxu1 }
  0xdf   :  { %321 = vst.msk [vmem:[%s614_s3] sm:$0xf] %vm320_vm2, %v379_v35  ;;  %329 = vst.msk [vmem:[%s614_s3 + $0x20] sm:$0xf] %vm320_vm2, %v387_v36  ;;  %v241_v43 = vmax.f32 %v181_v37, 0.0  ;;  %v202_v45 = vadd.f32 %v424_v41, %v529_v14  ;;  %v234_v46 = vadd.f32 %v432_v42, %v529_v14 }
  0xe0   :  { %v249_v44 = vmax.f32 %v213_v38, 0.0  ;;  %v382_v47 = vpack.c.bf16 %v243_v39, %v243_v39  ;;  %v390_v48 = vpack.c.bf16 %v251_v40, %v251_v40  ;;  %v193_v49 = vpop.f32.mrf.mxu0  ;;  %v225_v50 = vpop.f32.mrf.mxu1 }
  0xe1   :  { %v380_v51 = vpack.c.bf16 %v241_v43, %v241_v43  ;;  %v246_v53 = vmax.f32 %v202_v45, 0.0  ;;  %v254_v54 = vmax.f32 %v234_v46, 0.0  ;;  %v194_v55 = vadd.f32 %v529_v14, %v193_v49 }
  0xe2   :  { %v388_v52 = vpack.c.bf16 %v249_v44, %v249_v44  ;;  %324 = vst.msk [vmem:[%s614_s3 + $0xc] sm:$0xf] %vm320_vm2, %v382_v47  ;;  %332 = vst.msk [vmem:[%s614_s3 + $0x2c] sm:$0xf] %vm320_vm2, %v390_v48  ;;  %v226_v56 = vadd.f32 %v529_v14, %v225_v50  ;;  %v425_v57 = vpop.f32.mrf.mxu0  ;;  %v433_v58 = vpop.f32.mrf.mxu1 }
  0xe3   :  { %322 = vst.msk [vmem:[%s614_s3 + $0x4] sm:$0xf] %vm320_vm2, %v380_v51  ;;  %v385_v59 = vpack.c.bf16 %v246_v53, %v246_v53  ;;  %v393_v60 = vpack.c.bf16 %v254_v54, %v254_v54  ;;  %v205_v61 = vadd.f32 %v425_v57, %v529_v14  ;;  %v237_v62 = vadd.f32 %v433_v58, %v529_v14 }
  0xe4   :  { %330 = vst.msk [vmem:[%s614_s3 + $0x24] sm:$0xf] %vm320_vm2, %v388_v52  ;;  %v244_v63 = vmax.f32 %v194_v55, 0.0  ;;  %v252_v0 = vmax.f32 %v226_v56, 0.0  ;;  %v196_v1 = vpop.f32.mrf.mxu0  ;;  %v228_v2 = vpop.f32.mrf.mxu1 }
  0xe5   :  { %327 = vst.msk [vmem:[%s614_s3 + $0x18] sm:$0xf] %vm320_vm2, %v385_v59  ;;  %335 = vst.msk [vmem:[%s614_s3 + $0x38] sm:$0xf] %vm320_vm2, %v393_v60  ;;  %v247_v3 = vmax.f32 %v205_v61, 0.0  ;;  %v255_v4 = vmax.f32 %v237_v62, 0.0  ;;  %v197_v5 = vadd.f32 %v529_v14, %v196_v1  ;;  %v229_v6 = vadd.f32 %v529_v14, %v228_v2 }
  0xe6   :  { %v383_v7 = vpack.c.bf16 %v244_v63, %v244_v63  ;;  %v391_v8 = vpack.c.bf16 %v252_v0, %v252_v0 }
  0xe7   :  { %v386_v9 = vpack.c.bf16 %v247_v3, %v247_v3  ;;  %v394_v10 = vpack.c.bf16 %v255_v4, %v255_v4  ;;  %v245_v11 = vmax.f32 %v197_v5, 0.0  ;;  %v253_v12 = vmax.f32 %v229_v6, 0.0 }
  0xe8   :  { %325 = vst.msk [vmem:[%s614_s3 + $0x10] sm:$0xf] %vm320_vm2, %v383_v7  ;;  %333 = vst.msk [vmem:[%s614_s3 + $0x30] sm:$0xf] %vm320_vm2, %v391_v8 }
  0xe9   :  { %328 = vst.msk [vmem:[%s614_s3 + $0x1c] sm:$0xf] %vm320_vm2, %v386_v9  ;;  %336 = vst.msk [vmem:[%s614_s3 + $0x3c] sm:$0xf] %vm320_vm2, %v394_v10  ;;  %v384_v13 = vpack.c.bf16 %v245_v11, %v245_v11  ;;  %v392_v14 = vpack.c.bf16 %v253_v12, %v253_v12 }
  0xeb   :  { %326 = vst.msk [vmem:[%s614_s3 + $0x14] sm:$0xf] %vm320_vm2, %v384_v13  ;;  %334 = vst.msk [vmem:[%s614_s3 + $0x34] sm:$0xf] %vm320_vm2, %v392_v14 }

// kernel: _lambda_.42
= control target key start
LH: loop header
LB: loop body
LE: loop exit
PB: predicated region body
PF: predicated region fallthrough
CT: control target
= control target key end

     0   :  { %vm44_vm0 = vcmask 1043456   ;;  %vm37_vm1 = vcmask 64512   ;;  %vm113_vm2 = vcmask 125952   ;;  %s191_s1 = inlined_call_operand.vmem [shape: bf16[8,16], index: 1, kind: input, shape index: {}]   ;;  %s192_s0 = inlined_call_operand.vmem [shape: bf16[32,8], index: 0, kind: input, shape index: {}]   ;;  %s193_s2 = inlined_call_operand.vmem [shape: f32[1,16], index: 2, kind: input, shape index: {}]   ;;  %s194_s3 = inlined_call_operand.vmem [shape: bf16[32,16], index: 3, kind: output, shape index: {}]  }
   0x1   :  { %v19_v0 = vld [vmem:[%s191_s1] sm:$0xf]  ;;  %v146_v3 = vld [vmem:[%s192_s0 + $0x8] sm:$0xff]  }
   0x2   :  { %144 = vmatprep.subr.msk.bf16.mxu0 %vm44_vm0, %v19_v0  ;;  %v46_v1 = vsel %vm44_vm0, %v19_v0, 0  ;;  %v145_v2 = vld [vmem:[%s192_s0] sm:$0xff]  }
   0x3   :  { %139 = vmatpush3.bf16.msra.mxu0 %v46_v1  ;;  %140 = vmatprep.mubr.msk.bf16.mxu0 %vm37_vm1, %v145_v2  ;;  %v122_v4 = vld [vmem:[%s193_s2] ss:$0 sm:$0xff] }
   0x6   :  { %141 = vmatmul.mubr.msk.bf16.vlgmr.msra.gmra.mxu0 %vm37_vm1, %v146_v3 }
  0xc6   :  { %v142_v5 = vpop.f32.mrf.mxu0 }
  0xc7   :  { %v91_v6 = vadd.f32 %v142_v5, %v122_v4 }
  0xc8   :  { %v82_v7 = vpop.f32.mrf.mxu0 }
  0xc9   :  { %v133_v8 = vpack.c.bf16 %v91_v6, %v91_v6  ;;  %v83_v9 = vadd.f32 %v122_v4, %v82_v7 }
  0xca   :  { %v143_v10 = vpop.f32.mrf.mxu0 }
  0xcb   :  { %116 = vst.msk [vmem:[%s194_s3 + $0x8] sm:$0xf] %vm113_vm2, %v133_v8  ;;  %v131_v11 = vpack.c.bf16 %v83_v9, %v83_v9  ;;  %v94_v12 = vadd.f32 %v143_v10, %v122_v4 }
  0xcc   :  { %v85_v13 = vpop.f32.mrf.mxu0 }
  0xcd   :  { %114 = vst.msk [vmem:[%s194_s3] sm:$0xf] %vm113_vm2, %v131_v11  ;;  %v134_v14 = vpack.c.bf16 %v94_v12, %v94_v12  ;;  %v86_v15 = vadd.f32 %v122_v4, %v85_v13 }
  0xcf   :  { %117 = vst.msk [vmem:[%s194_s3 + $0xc] sm:$0xf] %vm113_vm2, %v134_v14  ;;  %v132_v16 = vpack.c.bf16 %v86_v15, %v86_v15 }
  0xd1   :  { %115 = vst.msk [vmem:[%s194_s3 + $0x4] sm:$0xf] %vm113_vm2, %v132_v16 }

// kernel: _lambda_.43
= control target key start
LH: loop header
LB: loop body
LE: loop exit
PB: predicated region body
PF: predicated region fallthrough
CT: control target
= control target key end

     0   :  { %vm79_vm0 = vcmask 1043456   ;;  %vm72_vm1 = vcmask 588800   ;;  %vm152_vm2 = vcmask 125952   ;;  %s264_s1 = inlined_call_operand.vmem [shape: bf16[72,16], index: 1, kind: input, shape index: {}]   ;;  %s265_s0 = inlined_call_operand.vmem [shape: bf16[32,72], index: 0, kind: input, shape index: {}]   ;;  %s266_s2 = inlined_call_operand.vmem [shape: f32[1,16], index: 2, kind: input, shape index: {}]   ;;  %s267_s3 = inlined_call_operand.vmem [shape: bf16[32,16], index: 3, kind: output, shape index: {}]  }
   0x1   :  { %v201_v0 = vld [vmem:[%s264_s1 + $0x20] ss:$0 sps:$4 sm:$0xff]   ;;  %v202_v1 = vld [vmem:[%s264_s1 + $0x18] sm:$0xff]   ;;  %v203_v3 = vld [vmem:[%s264_s1 + $0x10] sm:$0xff]  }
   0x2   :  { %200 = vmatprep.subr.msk.bf16.mxu0 %vm79_vm0, %v201_v0  ;;  %v81_v2 = vsel %vm79_vm0, %v201_v0, 0  ;;  %v206_v4 = vld [vmem:[%s265_s0] sm:$0xff]   ;;  %v204_v5 = vld [vmem:[%s264_s1 + $0x8] sm:$0xff]  }
   0x3   :  { %187 = vmatpush3.bf16.msra.mxu0 %v81_v2  ;;  %196 = vmatprep.mubr.msk.bf16.mxu0 %vm72_vm1, %v206_v4  ;;  %v205_v6 = vld [vmem:[%s264_s1] sm:$0xff]   ;;  %v207_v7 = vld [vmem:[%s265_s0 + $0x8] sm:$0xff]  }
   0x4   :  { %188 = vmatprep.subr.bf16.mxu0 %v202_v1  ;;  %v161_v8 = vld [vmem:[%s266_s2] ss:$0 sm:$0xff] }
   0x7   :  { %189 = vmatpush3.bf16.msra.mxu0 %v202_v1 }
   0x8   :  { %190 = vmatprep.subr.bf16.mxu0 %v203_v3 }
   0xb   :  { %191 = vmatpush3.bf16.msra.mxu0 %v203_v3 }
   0xc   :  { %192 = vmatprep.subr.bf16.mxu0 %v204_v5 }
   0xf   :  { %193 = vmatpush3.bf16.msra.mxu0 %v204_v5 }
  0x10   :  { %194 = vmatprep.subr.bf16.mxu0 %v205_v6 }
  0x13   :  { %195 = vmatpush3.bf16.msra.mxu0 %v205_v6 }
  0x16   :  { %197 = vmatmul.mubr.msk.bf16.vlgmr.msra.gmra.mxu0 %vm72_vm1, %v207_v7 }
  0xd6   :  { %v198_v9 = vpop.f32.mrf.mxu0 }
  0xd7   :  { %v126_v10 = vadd.f32 %v198_v9, %v161_v8 }
  0xd8   :  { %v117_v11 = vpop.f32.mrf.mxu0 }
  0xd9   :  { %v134_v12 = vmax.f32 %v126_v10, 0.0  ;;  %v118_v13 = vadd.f32 %v161_v8, %v117_v11 }
  0xda   :  { %v199_v14 = vpop.f32.mrf.mxu0 }
  0xdb   :  { %v177_v15 = vpack.c.bf16 %v134_v12, %v134_v12  ;;  %v132_v16 = vmax.f32 %v118_v13, 0.0  ;;  %v129_v17 = vadd.f32 %v199_v14, %v161_v8 }
  0xdc   :  { %v120_v18 = vpop.f32.mrf.mxu0 }
  0xdd   :  { %155 = vst.msk [vmem:[%s267_s3 + $0x8] sm:$0xf] %vm152_vm2, %v177_v15  ;;  %v175_v19 = vpack.c.bf16 %v132_v16, %v132_v16  ;;  %v135_v20 = vmax.f32 %v129_v17, 0.0  ;;  %v121_v21 = vadd.f32 %v161_v8, %v120_v18 }
  0xdf   :  { %153 = vst.msk [vmem:[%s267_s3] sm:$0xf] %vm152_vm2, %v175_v19  ;;  %v178_v22 = vpack.c.bf16 %v135_v20, %v135_v20  ;;  %v133_v23 = vmax.f32 %v121_v21, 0.0 }
  0xe1   :  { %156 = vst.msk [vmem:[%s267_s3 + $0xc] sm:$0xf] %vm152_vm2, %v178_v22  ;;  %v176_v24 = vpack.c.bf16 %v133_v23, %v133_v23 }
  0xe3   :  { %154 = vst.msk [vmem:[%s267_s3 + $0x4] sm:$0xf] %vm152_vm2, %v176_v24 }

// kernel: _lambda_.44
= control target key start
LH: loop header
LB: loop body
LE: loop exit
PB: predicated region body
PF: predicated region fallthrough
CT: control target
= control target key end

     0   :  { %v283_v0 = vmov 0   ;;  %vm119_vm0 = vcmask 130048   ;;  %vm207_vm1 = vcmask 125952   ;;  %s369_s1 = inlined_call_operand.vmem [shape: bf16[144,16], index: 1, kind: input, shape index: {}]   ;;  %s370_s0 = inlined_call_operand.vmem [shape: bf16[32,144], index: 0, kind: input, shape index: {}]   ;;  %s371_s3 = inlined_call_operand.vmem [shape: bf16[32,16], index: 3, kind: input, shape index: {}]   ;;  %s372_s2 = inlined_call_operand.vmem [shape: f32[1,16], index: 2, kind: input, shape index: {}]   ;;  %s373_s4 = inlined_call_operand.vmem [shape: bf16[32,16], index: 4, kind: output, shape index: {}]  }
   0x1   :  { %126 = vmatprep.subr.bf16.mxu0 %v283_v0  ;;  %249 = vmatprep.subr.bf16.mxu1 %v283_v0  ;;  %v268_v1 = vld [vmem:[%s369_s1 + $0x38] sm:$0xff]   ;;  %v269_v2 = vld [vmem:[%s369_s1 + $0x30] sm:$0xff]   ;;  %v270_v3 = vld [vmem:[%s369_s1 + $0x28] sm:$0xff]  }
   0x2   :  { %127 = vmatpush1.bf16.msra.mxu0 %v268_v1  ;;  %258 = vmatpush1.bf16.msra.mxu1 %v268_v1  ;;  %v271_v4 = vld [vmem:[%s369_s1 + $0x20] sm:$0xff]   ;;  %v282_v6 = vld [vmem:[%s370_s0 + $0x14] ss:$8 sps:$4 sm:$0xff]   ;;  %v274_v9 = vld [vmem:[%s369_s1 + $0x8] sm:$0xff]  }
   0x3   :  { %128 = vmatprep.subr.bf16.mxu0 %v283_v0  ;;  %250 = vmatprep.subr.bf16.mxu1 %v283_v0  ;;  %v279_v5 = vld [vmem:[%s370_s0 + $0x4] ss:$8 sps:$4 sm:$0xff]   ;;  %v272_v7 = vld [vmem:[%s369_s1 + $0x18] sm:$0xff]   ;;  %v273_v8 = vld [vmem:[%s369_s1 + $0x10] sm:$0xff]  }
   0x4   :  { %230 = vmatprep.mubr.msk.bf16.mxu0 %vm119_vm0, %v279_v5  ;;  %231 = vmatprep.mubr.msk.bf16.mxu1 %vm119_vm0, %v282_v6  ;;  %v275_v10 = vld [vmem:[%s369_s1] sm:$0xff]   ;;  %v280_v13 = vld [vmem:[%s370_s0 + $0x10] ss:$8 sps:$4 sm:$0xff]   ;;  %v248_v15 = vld [vmem:[%s371_s3 + $0x8] sm:$0xff]  }
   0x5   :  { %v276_v11 = vld [vmem:[%s369_s1 + $0x40] sm:$0xff]   ;;  %v246_v18 = vunpack.c.l.bf16 %v248_v15  ;;  %v247_v28 = vunpack.c.h.bf16 %v248_v15 }
   0x6   :  { %129 = vmatpush1.bf16.msra.mxu0 %v269_v2  ;;  %259 = vmatpush1.bf16.msra.mxu1 %v269_v2  ;;  %v277_v12 = vld [vmem:[%s370_s0] ss:$8 sps:$4 sm:$0xff]  }
   0x7   :  { %130 = vmatprep.subr.bf16.mxu0 %v283_v0  ;;  %251 = vmatprep.subr.bf16.mxu1 %v283_v0  ;;  %v241_v14 = vld [vmem:[%s371_s3] sm:$0xff]  }
   0x8   :  { %v216_v16 = vld [vmem:[%s372_s2] ss:$0 sm:$0xff]  ;;  %v242_v17 = vunpack.c.l.bf16 %v241_v14  ;;  %v243_v27 = vunpack.c.h.bf16 %v241_v14 }
   0xa   :  { %131 = vmatpush1.bf16.msra.mxu0 %v270_v3  ;;  %260 = vmatpush1.bf16.msra.mxu1 %v270_v3 }
   0xb   :  { %132 = vmatprep.subr.bf16.mxu0 %v283_v0  ;;  %252 = vmatprep.subr.bf16.mxu1 %v283_v0 }
   0xe   :  { %133 = vmatpush1.bf16.msra.mxu0 %v271_v4  ;;  %261 = vmatpush1.bf16.msra.mxu1 %v271_v4 }
   0xf   :  { %134 = vmatprep.subr.bf16.mxu0 %v283_v0  ;;  %253 = vmatprep.subr.bf16.mxu1 %v283_v0 }
  0x12   :  { %135 = vmatpush1.bf16.msra.mxu0 %v272_v7  ;;  %262 = vmatpush1.bf16.msra.mxu1 %v272_v7 }
  0x13   :  { %136 = vmatprep.subr.bf16.mxu0 %v283_v0  ;;  %254 = vmatprep.subr.bf16.mxu1 %v283_v0 }
  0x16   :  { %137 = vmatpush1.bf16.msra.mxu0 %v273_v8  ;;  %263 = vmatpush1.bf16.msra.mxu1 %v273_v8 }
  0x17   :  { %138 = vmatprep.subr.bf16.mxu0 %v283_v0  ;;  %255 = vmatprep.subr.bf16.mxu1 %v283_v0 }
  0x1a   :  { %139 = vmatpush1.bf16.msra.mxu0 %v274_v9  ;;  %264 = vmatpush1.bf16.msra.mxu1 %v274_v9 }
  0x1b   :  { %140 = vmatprep.subr.bf16.mxu0 %v283_v0  ;;  %256 = vmatprep.subr.bf16.mxu1 %v283_v0 }
  0x1e   :  { %141 = vmatpush1.bf16.msra.mxu0 %v275_v10  ;;  %265 = vmatpush1.bf16.msra.mxu1 %v275_v10 }
  0x1f   :  { %156 = vmatprep.subr.bf16.mxu0 %v283_v0  ;;  %257 = vmatprep.subr.bf16.mxu1 %v283_v0 }
  0x22   :  { %157 = vmatpush2.bf16.msra.mxu0 %v276_v11  ;;  %266 = vmatpush2.bf16.msra.mxu1 %v276_v11 }
  0x25   :  { %159 = vmatmul.mubr.bf16.vlgmr.msra.gmra.mxu0 %v277_v12  ;;  %167 = vmatmul.mubr.bf16.vlgmr.msra.gmra.mxu1 %v280_v13 }
  0xe5   :  { %v160_v19 = vpop.f32.mrf.mxu0  ;;  %v168_v20 = vpop.f32.mrf.mxu1 }
  0xe6   :  { %v161_v21 = vadd.f32 %v216_v16, %v160_v19  ;;  %v169_v22 = vadd.f32 %v216_v16, %v168_v20 }
  0xe7   :  { %v162_v23 = vpop.f32.mrf.mxu0  ;;  %v170_v24 = vpop.f32.mrf.mxu1 }
  0xe8   :  { %v183_v25 = vadd.f32 %v242_v17, %v161_v21  ;;  %v185_v26 = vadd.f32 %v246_v18, %v169_v22 }
  0xe9   :  { %v163_v29 = vpop.f32.mrf.mxu0  ;;  %v171_v30 = vpop.f32.mrf.mxu1 }
  0xea   :  { %v187_v31 = vmax.f32 %v183_v25, 0.0  ;;  %v189_v32 = vmax.f32 %v185_v26, 0.0  ;;  %v164_v33 = vadd.f32 %v216_v16, %v163_v29  ;;  %v172_v34 = vadd.f32 %v216_v16, %v171_v30 }
  0xeb   :  { %v165_v35 = vpop.f32.mrf.mxu0  ;;  %v173_v36 = vpop.f32.mrf.mxu1 }
  0xec   :  { %v236_v37 = vpack.c.bf16 %v187_v31, %v187_v31  ;;  %v238_v38 = vpack.c.bf16 %v189_v32, %v189_v32  ;;  %v184_v39 = vadd.f32 %v243_v27, %v164_v33  ;;  %v186_v40 = vadd.f32 %v247_v28, %v172_v34 }
  0xee   :  { %208 = vst.msk [vmem:[%s373_s4] sm:$0xf] %vm207_vm1, %v236_v37  ;;  %210 = vst.msk [vmem:[%s373_s4 + $0x8] sm:$0xf] %vm207_vm1, %v238_v38  ;;  %v188_v41 = vmax.f32 %v184_v39, 0.0  ;;  %v190_v42 = vmax.f32 %v186_v40, 0.0 }
  0xf0   :  { %v237_v43 = vpack.c.bf16 %v188_v41, %v188_v41  ;;  %v239_v44 = vpack.c.bf16 %v190_v42, %v190_v42 }
  0xf2   :  { %209 = vst.msk [vmem:[%s373_s4 + $0x4] sm:$0xf] %vm207_vm1, %v237_v43  ;;  %211 = vst.msk [vmem:[%s373_s4 + $0xc] sm:$0xf] %vm207_vm1, %v239_v44 }

// kernel: _lambda_.45
= control target key start
LH: loop header
LB: loop body
LE: loop exit
PB: predicated region body
PF: predicated region fallthrough
CT: control target
= control target key end

     0   :  { %v259_v0 = vmov 0   ;;  %vm116_vm0 = vcmask 130048   ;;  %vm192_vm1 = vcmask 125952   ;;  %s338_s1 = inlined_call_operand.vmem [shape: bf16[144,16], index: 1, kind: input, shape index: {}]   ;;  %s339_s0 = inlined_call_operand.vmem [shape: bf16[32,144], index: 0, kind: input, shape index: {}]   ;;  %s340_s2 = inlined_call_operand.vmem [shape: f32[1,16], index: 2, kind: input, shape index: {}]   ;;  %s341_s3 = inlined_call_operand.vmem [shape: bf16[32,16], index: 3, kind: output, shape index: {}]  }
   0x1   :  { %123 = vmatprep.subr.bf16.mxu0 %v259_v0  ;;  %225 = vmatprep.subr.bf16.mxu1 %v259_v0  ;;  %v244_v1 = vld [vmem:[%s338_s1 + $0x38] sm:$0xff]   ;;  %v245_v2 = vld [vmem:[%s338_s1 + $0x30] sm:$0xff]   ;;  %v246_v3 = vld [vmem:[%s338_s1 + $0x28] sm:$0xff]  }
   0x2   :  { %124 = vmatpush1.bf16.msra.mxu0 %v244_v1  ;;  %234 = vmatpush1.bf16.msra.mxu1 %v244_v1  ;;  %v247_v4 = vld [vmem:[%s338_s1 + $0x20] sm:$0xff]   ;;  %v258_v6 = vld [vmem:[%s339_s0 + $0x14] ss:$8 sps:$4 sm:$0xff]   ;;  %v250_v9 = vld [vmem:[%s338_s1 + $0x8] sm:$0xff]  }
   0x3   :  { %125 = vmatprep.subr.bf16.mxu0 %v259_v0  ;;  %226 = vmatprep.subr.bf16.mxu1 %v259_v0  ;;  %v255_v5 = vld [vmem:[%s339_s0 + $0x4] ss:$8 sps:$4 sm:$0xff]   ;;  %v248_v7 = vld [vmem:[%s338_s1 + $0x18] sm:$0xff]   ;;  %v249_v8 = vld [vmem:[%s338_s1 + $0x10] sm:$0xff]  }
   0x4   :  { %215 = vmatprep.mubr.msk.bf16.mxu0 %vm116_vm0, %v255_v5  ;;  %216 = vmatprep.mubr.msk.bf16.mxu1 %vm116_vm0, %v258_v6  ;;  %v251_v10 = vld [vmem:[%s338_s1] sm:$0xff]   ;;  %v256_v13 = vld [vmem:[%s339_s0 + $0x10] ss:$8 sps:$4 sm:$0xff]  }
   0x5   :  { %v252_v11 = vld [vmem:[%s338_s1 + $0x40] sm:$0xff]  }
   0x6   :  { %126 = vmatpush1.bf16.msra.mxu0 %v245_v2  ;;  %235 = vmatpush1.bf16.msra.mxu1 %v245_v2  ;;  %v253_v12 = vld [vmem:[%s339_s0] ss:$8 sps:$4 sm:$0xff]  }
   0x7   :  { %127 = vmatprep.subr.bf16.mxu0 %v259_v0  ;;  %227 = vmatprep.subr.bf16.mxu1 %v259_v0  ;;  %v201_v14 = vld [vmem:[%s340_s2] ss:$0 sm:$0xff] }
   0xa   :  { %128 = vmatpush1.bf16.msra.mxu0 %v246_v3  ;;  %236 = vmatpush1.bf16.msra.mxu1 %v246_v3 }
   0xb   :  { %129 = vmatprep.subr.bf16.mxu0 %v259_v0  ;;  %228 = vmatprep.subr.bf16.mxu1 %v259_v0 }
   0xe   :  { %130 = vmatpush1.bf16.msra.mxu0 %v247_v4  ;;  %237 = vmatpush1.bf16.msra.mxu1 %v247_v4 }
   0xf   :  { %131 = vmatprep.subr.bf16.mxu0 %v259_v0  ;;  %229 = vmatprep.subr.bf16.mxu1 %v259_v0 }
  0x12   :  { %132 = vmatpush1.bf16.msra.mxu0 %v248_v7  ;;  %238 = vmatpush1.bf16.msra.mxu1 %v248_v7 }
  0x13   :  { %133 = vmatprep.subr.bf16.mxu0 %v259_v0  ;;  %230 = vmatprep.subr.bf16.mxu1 %v259_v0 }
  0x16   :  { %134 = vmatpush1.bf16.msra.mxu0 %v249_v8  ;;  %239 = vmatpush1.bf16.msra.mxu1 %v249_v8 }
  0x17   :  { %135 = vmatprep.subr.bf16.mxu0 %v259_v0  ;;  %231 = vmatprep.subr.bf16.mxu1 %v259_v0 }
  0x1a   :  { %136 = vmatpush1.bf16.msra.mxu0 %v250_v9  ;;  %240 = vmatpush1.bf16.msra.mxu1 %v250_v9 }
  0x1b   :  { %137 = vmatprep.subr.bf16.mxu0 %v259_v0  ;;  %232 = vmatprep.subr.bf16.mxu1 %v259_v0 }
  0x1e   :  { %138 = vmatpush1.bf16.msra.mxu0 %v251_v10  ;;  %241 = vmatpush1.bf16.msra.mxu1 %v251_v10 }
  0x1f   :  { %153 = vmatprep.subr.bf16.mxu0 %v259_v0  ;;  %233 = vmatprep.subr.bf16.mxu1 %v259_v0 }
  0x22   :  { %154 = vmatpush2.bf16.msra.mxu0 %v252_v11  ;;  %242 = vmatpush2.bf16.msra.mxu1 %v252_v11 }
  0x25   :  { %156 = vmatmul.mubr.bf16.vlgmr.msra.gmra.mxu0 %v253_v12  ;;  %164 = vmatmul.mubr.bf16.vlgmr.msra.gmra.mxu1 %v256_v13 }
  0xe5   :  { %v157_v15 = vpop.f32.mrf.mxu0  ;;  %v165_v16 = vpop.f32.mrf.mxu1 }
  0xe6   :  { %v158_v17 = vadd.f32 %v201_v14, %v157_v15  ;;  %v166_v18 = vadd.f32 %v201_v14, %v165_v16 }
  0xe7   :  { %v159_v19 = vpop.f32.mrf.mxu0  ;;  %v167_v20 = vpop.f32.mrf.mxu1 }
  0xe8   :  { %v172_v21 = vmax.f32 %v158_v17, 0.0  ;;  %v174_v22 = vmax.f32 %v166_v18, 0.0 }
  0xe9   :  { %v160_v23 = vpop.f32.mrf.mxu0  ;;  %v168_v24 = vpop.f32.mrf.mxu1 }
  0xea   :  { %v221_v25 = vpack.c.bf16 %v172_v21, %v172_v21  ;;  %v223_v26 = vpack.c.bf16 %v174_v22, %v174_v22  ;;  %v161_v27 = vadd.f32 %v201_v14, %v160_v23  ;;  %v169_v28 = vadd.f32 %v201_v14, %v168_v24 }
  0xeb   :  { %v162_v29 = vpop.f32.mrf.mxu0  ;;  %v170_v30 = vpop.f32.mrf.mxu1 }
  0xec   :  { %193 = vst.msk [vmem:[%s341_s3] sm:$0xf] %vm192_vm1, %v221_v25  ;;  %195 = vst.msk [vmem:[%s341_s3 + $0x8] sm:$0xf] %vm192_vm1, %v223_v26  ;;  %v173_v31 = vmax.f32 %v161_v27, 0.0  ;;  %v175_v32 = vmax.f32 %v169_v28, 0.0 }
  0xee   :  { %v222_v33 = vpack.c.bf16 %v173_v31, %v173_v31  ;;  %v224_v34 = vpack.c.bf16 %v175_v32, %v175_v32 }
  0xf0   :  { %194 = vst.msk [vmem:[%s341_s3 + $0x4] sm:$0xf] %vm192_vm1, %v222_v33  ;;  %196 = vst.msk [vmem:[%s341_s3 + $0xc] sm:$0xf] %vm192_vm1, %v224_v34 }

// kernel: _lambda_.48
= control target key start
LH: loop header
LB: loop body
LE: loop exit
PB: predicated region body
PF: predicated region fallthrough
CT: control target
= control target key end

     0   :  { %vm31_vm0 = vcmask 650240   ;;  %s93_s0 = inlined_call_operand.vmem [shape: bf16[16,80], index: 0, kind: input, shape index: {}]   ;;  %s94_s1 = inlined_call_operand.vmem [shape: bf16[16,80], index: 1, kind: input, shape index: {}]   ;;  %s95_s2 = inlined_call_operand.vmem [shape: bf16[16,80], index: 2, kind: input, shape index: {}]   ;;  %s96_s3 = inlined_call_operand.vmem [shape: bf16[16,80], index: 3, kind: input, shape index: {}]   ;;  %s97_s4 = inlined_call_operand.vmem [shape: bf16[16,80], index: 4, kind: output, shape index: {}]  }
   0x1   :  { %v17_v0 = vld [vmem:[%s93_s0] sm:$0xf]  ;;  %v18_v4 = vld [vmem:[%s93_s0 + $0x4] sm:$0xf] }
   0x2   :  { %v19_v1 = vld [vmem:[%s94_s1] sm:$0xf]  ;;  %v20_v5 = vld [vmem:[%s94_s1 + $0x4] sm:$0xf] }
   0x3   :  { %v23_v2 = vld [vmem:[%s95_s2] sm:$0xf]  ;;  %v21_v3 = vmax.bf16 %v19_v1, %v17_v0  ;;  %v22_v7 = vmax.bf16 %v20_v5, %v18_v4  ;;  %v24_v8 = vld [vmem:[%s95_s2 + $0x4] sm:$0xf] }
   0x4   :  { %v27_v6 = vld [vmem:[%s96_s3] sm:$0xf]  ;;  %v28_v10 = vld [vmem:[%s96_s3 + $0x4] sm:$0xf] }
   0x5   :  { %v25_v9 = vmax.bf16 %v23_v2, %v21_v3  ;;  %v26_v11 = vmax.bf16 %v24_v8, %v22_v7 }
   0x7   :  { %v29_v12 = vmax.bf16 %v27_v6, %v25_v9  ;;  %v30_v13 = vmax.bf16 %v28_v10, %v26_v11 }
   0x9   :  { %32 = vst.msk [vmem:[%s97_s4] sm:$0xf] %vm31_vm0, %v29_v12  ;;  %33 = vst.msk [vmem:[%s97_s4 + $0x4] sm:$0xf] %vm31_vm0, %v30_v13 }

// kernel: _lambda_.49
= control target key start
LH: loop header
LB: loop body
LE: loop exit
PB: predicated region body
PF: predicated region fallthrough
CT: control target
= control target key end

     0   :  { %vm44_vm0 = vcmask 130048   ;;  %vm116_vm1 = vcmask 257024   ;;  %s195_s1 = inlined_call_operand.vmem [shape: bf16[16,32], index: 1, kind: input, shape index: {}]   ;;  %s196_s0 = inlined_call_operand.vmem [shape: bf16[32,16], index: 0, kind: input, shape index: {}]   ;;  %s197_s2 = inlined_call_operand.vmem [shape: f32[1,32], index: 2, kind: input, shape index: {}]   ;;  %s198_s3 = inlined_call_operand.vmem [shape: bf16[32,32], index: 3, kind: output, shape index: {}]  }
   0x1   :  { %v148_v0 = vld [vmem:[%s195_s1] sm:$0xff]   ;;  %v150_v2 = vld [vmem:[%s196_s0 + $0x8] sm:$0xff]  }
   0x2   :  { %v149_v1 = vld [vmem:[%s196_s0] sm:$0xff]   ;;  %142 = vmatprep.subr.bf16.mxu0 %v148_v0 }
   0x3   :  { %143 = vmatpush3.bf16.msra.mxu0 %v148_v0  ;;  %144 = vmatprep.mubr.msk.bf16.mxu0 %vm44_vm0, %v149_v1  ;;  %v125_v3 = vld [vmem:[%s197_s2] ss:$0 sm:$0xff] }
   0x6   :  { %145 = vmatmul.mubr.msk.bf16.vlgmr.msra.gmra.mxu0 %vm44_vm0, %v150_v2 }
  0xc6   :  { %v146_v4 = vpop.f32.mrf.mxu0 }
  0xc7   :  { %v94_v5 = vadd.f32 %v146_v4, %v125_v3 }
  0xc8   :  { %v85_v6 = vpop.f32.mrf.mxu0 }
  0xc9   :  { %v137_v7 = vpack.c.bf16 %v94_v5, %v94_v5  ;;  %v86_v8 = vadd.f32 %v125_v3, %v85_v6 }
  0xca   :  { %v147_v9 = vpop.f32.mrf.mxu0 }
  0xcb   :  { %119 = vst.msk [vmem:[%s198_s3 + $0x8] sm:$0xf] %vm116_vm1, %v137_v7  ;;  %v135_v10 = vpack.c.bf16 %v86_v8, %v86_v8  ;;  %v97_v11 = vadd.f32 %v147_v9, %v125_v3 }
  0xcc   :  { %v88_v12 = vpop.f32.mrf.mxu0 }
  0xcd   :  { %117 = vst.msk [vmem:[%s198_s3] sm:$0xf] %vm116_vm1, %v135_v10  ;;  %v138_v13 = vpack.c.bf16 %v97_v11, %v97_v11  ;;  %v89_v14 = vadd.f32 %v125_v3, %v88_v12 }
  0xcf   :  { %120 = vst.msk [vmem:[%s198_s3 + $0xc] sm:$0xf] %vm116_vm1, %v138_v13  ;;  %v136_v15 = vpack.c.bf16 %v89_v14, %v89_v14 }
  0xd1   :  { %118 = vst.msk [vmem:[%s198_s3 + $0x4] sm:$0xf] %vm116_vm1, %v136_v15 }

// kernel: _lambda_.50
= control target key start
LH: loop header
LB: loop body
LE: loop exit
PB: predicated region body
PF: predicated region fallthrough
CT: control target
= control target key end

     0   :  { %v259_v0 = vmov 0   ;;  %vm116_vm0 = vcmask 130048   ;;  %vm192_vm1 = vcmask 257024   ;;  %s338_s1 = inlined_call_operand.vmem [shape: bf16[144,32], index: 1, kind: input, shape index: {}]   ;;  %s339_s0 = inlined_call_operand.vmem [shape: bf16[32,144], index: 0, kind: input, shape index: {}]   ;;  %s340_s2 = inlined_call_operand.vmem [shape: f32[1,32], index: 2, kind: input, shape index: {}]   ;;  %s341_s3 = inlined_call_operand.vmem [shape: bf16[32,32], index: 3, kind: output, shape index: {}]  }
   0x1   :  { %123 = vmatprep.subr.bf16.mxu0 %v259_v0  ;;  %225 = vmatprep.subr.bf16.mxu1 %v259_v0  ;;  %v244_v1 = vld [vmem:[%s338_s1 + $0x38] sm:$0xff]   ;;  %v245_v2 = vld [vmem:[%s338_s1 + $0x30] sm:$0xff]   ;;  %v246_v3 = vld [vmem:[%s338_s1 + $0x28] sm:$0xff]  }
   0x2   :  { %124 = vmatpush1.bf16.msra.mxu0 %v244_v1  ;;  %234 = vmatpush1.bf16.msra.mxu1 %v244_v1  ;;  %v247_v4 = vld [vmem:[%s338_s1 + $0x20] sm:$0xff]   ;;  %v258_v6 = vld [vmem:[%s339_s0 + $0x14] ss:$8 sps:$4 sm:$0xff]   ;;  %v250_v9 = vld [vmem:[%s338_s1 + $0x8] sm:$0xff]  }
   0x3   :  { %125 = vmatprep.subr.bf16.mxu0 %v259_v0  ;;  %226 = vmatprep.subr.bf16.mxu1 %v259_v0  ;;  %v255_v5 = vld [vmem:[%s339_s0 + $0x4] ss:$8 sps:$4 sm:$0xff]   ;;  %v248_v7 = vld [vmem:[%s338_s1 + $0x18] sm:$0xff]   ;;  %v249_v8 = vld [vmem:[%s338_s1 + $0x10] sm:$0xff]  }
   0x4   :  { %215 = vmatprep.mubr.msk.bf16.mxu0 %vm116_vm0, %v255_v5  ;;  %216 = vmatprep.mubr.msk.bf16.mxu1 %vm116_vm0, %v258_v6  ;;  %v251_v10 = vld [vmem:[%s338_s1] sm:$0xff]   ;;  %v256_v13 = vld [vmem:[%s339_s0 + $0x10] ss:$8 sps:$4 sm:$0xff]  }
   0x5   :  { %v252_v11 = vld [vmem:[%s338_s1 + $0x40] sm:$0xff]  }
   0x6   :  { %126 = vmatpush1.bf16.msra.mxu0 %v245_v2  ;;  %235 = vmatpush1.bf16.msra.mxu1 %v245_v2  ;;  %v253_v12 = vld [vmem:[%s339_s0] ss:$8 sps:$4 sm:$0xff]  }
   0x7   :  { %127 = vmatprep.subr.bf16.mxu0 %v259_v0  ;;  %227 = vmatprep.subr.bf16.mxu1 %v259_v0  ;;  %v201_v14 = vld [vmem:[%s340_s2] ss:$0 sm:$0xff] }
   0xa   :  { %128 = vmatpush1.bf16.msra.mxu0 %v246_v3  ;;  %236 = vmatpush1.bf16.msra.mxu1 %v246_v3 }
   0xb   :  { %129 = vmatprep.subr.bf16.mxu0 %v259_v0  ;;  %228 = vmatprep.subr.bf16.mxu1 %v259_v0 }
   0xe   :  { %130 = vmatpush1.bf16.msra.mxu0 %v247_v4  ;;  %237 = vmatpush1.bf16.msra.mxu1 %v247_v4 }
   0xf   :  { %131 = vmatprep.subr.bf16.mxu0 %v259_v0  ;;  %229 = vmatprep.subr.bf16.mxu1 %v259_v0 }
  0x12   :  { %132 = vmatpush1.bf16.msra.mxu0 %v248_v7  ;;  %238 = vmatpush1.bf16.msra.mxu1 %v248_v7 }
  0x13   :  { %133 = vmatprep.subr.bf16.mxu0 %v259_v0  ;;  %230 = vmatprep.subr.bf16.mxu1 %v259_v0 }
  0x16   :  { %134 = vmatpush1.bf16.msra.mxu0 %v249_v8  ;;  %239 = vmatpush1.bf16.msra.mxu1 %v249_v8 }
  0x17   :  { %135 = vmatprep.subr.bf16.mxu0 %v259_v0  ;;  %231 = vmatprep.subr.bf16.mxu1 %v259_v0 }
  0x1a   :  { %136 = vmatpush1.bf16.msra.mxu0 %v250_v9  ;;  %240 = vmatpush1.bf16.msra.mxu1 %v250_v9 }
  0x1b   :  { %137 = vmatprep.subr.bf16.mxu0 %v259_v0  ;;  %232 = vmatprep.subr.bf16.mxu1 %v259_v0 }
  0x1e   :  { %138 = vmatpush1.bf16.msra.mxu0 %v251_v10  ;;  %241 = vmatpush1.bf16.msra.mxu1 %v251_v10 }
  0x1f   :  { %153 = vmatprep.subr.bf16.mxu0 %v259_v0  ;;  %233 = vmatprep.subr.bf16.mxu1 %v259_v0 }
  0x22   :  { %154 = vmatpush2.bf16.msra.mxu0 %v252_v11  ;;  %242 = vmatpush2.bf16.msra.mxu1 %v252_v11 }
  0x25   :  { %156 = vmatmul.mubr.bf16.vlgmr.msra.gmra.mxu0 %v253_v12  ;;  %164 = vmatmul.mubr.bf16.vlgmr.msra.gmra.mxu1 %v256_v13 }
  0xe5   :  { %v157_v15 = vpop.f32.mrf.mxu0  ;;  %v165_v16 = vpop.f32.mrf.mxu1 }
  0xe6   :  { %v158_v17 = vadd.f32 %v201_v14, %v157_v15  ;;  %v166_v18 = vadd.f32 %v201_v14, %v165_v16 }
  0xe7   :  { %v159_v19 = vpop.f32.mrf.mxu0  ;;  %v167_v20 = vpop.f32.mrf.mxu1 }
  0xe8   :  { %v172_v21 = vmax.f32 %v158_v17, 0.0  ;;  %v174_v22 = vmax.f32 %v166_v18, 0.0 }
  0xe9   :  { %v160_v23 = vpop.f32.mrf.mxu0  ;;  %v168_v24 = vpop.f32.mrf.mxu1 }
  0xea   :  { %v221_v25 = vpack.c.bf16 %v172_v21, %v172_v21  ;;  %v223_v26 = vpack.c.bf16 %v174_v22, %v174_v22  ;;  %v161_v27 = vadd.f32 %v201_v14, %v160_v23  ;;  %v169_v28 = vadd.f32 %v201_v14, %v168_v24 }
  0xeb   :  { %v162_v29 = vpop.f32.mrf.mxu0  ;;  %v170_v30 = vpop.f32.mrf.mxu1 }
  0xec   :  { %193 = vst.msk [vmem:[%s341_s3] sm:$0xf] %vm192_vm1, %v221_v25  ;;  %195 = vst.msk [vmem:[%s341_s3 + $0x8] sm:$0xf] %vm192_vm1, %v223_v26  ;;  %v173_v31 = vmax.f32 %v161_v27, 0.0  ;;  %v175_v32 = vmax.f32 %v169_v28, 0.0 }
  0xee   :  { %v222_v33 = vpack.c.bf16 %v173_v31, %v173_v31  ;;  %v224_v34 = vpack.c.bf16 %v175_v32, %v175_v32 }
  0xf0   :  { %194 = vst.msk [vmem:[%s341_s3 + $0x4] sm:$0xf] %vm192_vm1, %v222_v33  ;;  %196 = vst.msk [vmem:[%s341_s3 + $0xc] sm:$0xf] %vm192_vm1, %v224_v34 }

// kernel: _lambda_.52
= control target key start
LH: loop header
LB: loop body
LE: loop exit
PB: predicated region body
PF: predicated region fallthrough
CT: control target
= control target key end

     0   :  { %vm204_vm0 = vcmask 261120   ;;  %vm329_vm1 = vcmask 257024   ;;  %s550_s1 = inlined_call_operand.vmem [shape: bf16[288,32], index: 1, kind: input, shape index: {}]   ;;  %s551_s0 = inlined_call_operand.vmem [shape: bf16[32,288], index: 0, kind: input, shape index: {}]   ;;  %s552_s2 = inlined_call_operand.vmem [shape: f32[1,32], index: 2, kind: input, shape index: {}]   ;;  %s553_s3 = inlined_call_operand.vmem [shape: bf16[32,32], index: 3, kind: output, shape index: {}]  }
   0x1   :  { %v413_v0 = vld [vmem:[%s550_s1 + $0x78] sm:$0xff]   ;;  %v415_v2 = vld [vmem:[%s550_s1 + $0x70] sm:$0xff]   ;;  %v417_v4 = vld [vmem:[%s550_s1 + $0x68] sm:$0xff]  }
   0x2   :  { %v414_v1 = vld [vmem:[%s550_s1 + $0x38] sm:$0xff]   ;;  %373 = vmatprep.subr.bf16.mxu0 %v413_v0  ;;  %v416_v3 = vld [vmem:[%s550_s1 + $0x30] sm:$0xff]   ;;  %v418_v5 = vld [vmem:[%s550_s1 + $0x28] sm:$0xff]  }
   0x3   :  { %374 = vmatpush3.bf16.msra.mxu0 %v414_v1  ;;  %v419_v6 = vld [vmem:[%s550_s1 + $0x60] sm:$0xff]   ;;  %v421_v8 = vld [vmem:[%s550_s1 + $0x58] sm:$0xff]   ;;  %v428_v10 = vld [vmem:[%s550_s1 + $0x88] sm:$0xff]  }
   0x4   :  { %375 = vmatprep.subr.bf16.mxu0 %v415_v2  ;;  %v420_v7 = vld [vmem:[%s550_s1 + $0x20] sm:$0xff]   ;;  %v422_v9 = vld [vmem:[%s550_s1 + $0x18] sm:$0xff]   ;;  %v423_v11 = vld [vmem:[%s550_s1 + $0x50] sm:$0xff]   ;;  %405 = vmatprep.subr.bf16.mxu1 %v428_v10 }
   0x5   :  { %v424_v12 = vld [vmem:[%s550_s1 + $0x10] sm:$0xff]   ;;  %v425_v13 = vld [vmem:[%s550_s1 + $0x48] sm:$0xff]   ;;  %406 = vmatpush3.bf16.msra.mxu1 %v428_v10  ;;  %v433_v15 = vld [vmem:[%s550_s1 + $0x80] sm:$0xff]  }
   0x6   :  { %v432_v14 = vld [vmem:[%s551_s0 + $0x4] ss:$12 sps:$4 sm:$0xff]   ;;  %v434_v16 = vld [vmem:[%s551_s0 + $0x8] ss:$12 sps:$4 sm:$0xff]   ;;  %407 = vmatprep.subr.bf16.mxu1 %v433_v15  ;;  %v435_v17 = vld [vmem:[%s551_s0 + $0x20] ss:$12 sps:$4 sm:$0xff]  }
   0x7   :  { %376 = vmatpush3.bf16.msra.mxu0 %v416_v3  ;;  %243 = vmatprep.mubr.bf16.mxu0 %v432_v14  ;;  %v426_v18 = vld [vmem:[%s550_s1 + $0x8] sm:$0xff]   ;;  %v427_v19 = vld [vmem:[%s550_s1 + $0x40] sm:$0xff]  }
   0x8   :  { %377 = vmatprep.subr.bf16.mxu0 %v417_v4  ;;  %409 = vmatprep.mubr.msk.bf16.mxu1 %vm204_vm0, %v434_v16  ;;  %v429_v20 = vld [vmem:[%s550_s1] sm:$0xff]   ;;  %v436_v22 = vld [vmem:[%s551_s0 + $0x1c] ss:$12 sps:$4 sm:$0xff]  }
   0x9   :  { %408 = vmatpush3.bf16.msra.mxu1 %v433_v15  ;;  %v430_v21 = vld [vmem:[%s551_s0] ss:$12 sps:$4 sm:$0xff]   ;;  %v438_v23 = vld [vmem:[%s551_s0 + $0x18] ss:$12 sps:$4 sm:$0xff]  }
   0xa   :  { %v338_v28 = vld [vmem:[%s552_s2] ss:$0 sm:$0xff] }
   0xb   :  { %378 = vmatpush3.bf16.msra.mxu0 %v418_v5 }
   0xc   :  { %379 = vmatprep.subr.bf16.mxu0 %v419_v6  ;;  %410 = vmatmul.mubr.msk.bf16.vlgmr.msra.gmra.mxu1 %vm204_vm0, %v435_v17 }
   0xf   :  { %380 = vmatpush3.bf16.msra.mxu0 %v420_v7 }
  0x10   :  { %381 = vmatprep.subr.bf16.mxu0 %v421_v8 }
  0x13   :  { %382 = vmatpush3.bf16.msra.mxu0 %v422_v9 }
  0x14   :  { %383 = vmatprep.subr.bf16.mxu0 %v423_v11 }
  0x17   :  { %384 = vmatpush3.bf16.msra.mxu0 %v424_v12 }
  0x18   :  { %385 = vmatprep.subr.bf16.mxu0 %v425_v13 }
  0x1b   :  { %386 = vmatpush3.bf16.msra.mxu0 %v426_v18 }
  0x1c   :  { %387 = vmatprep.subr.bf16.mxu0 %v427_v19 }
  0x1f   :  { %388 = vmatpush3.bf16.msra.mxu0 %v429_v20 }
  0x22   :  { %244 = vmatmul.mubr.bf16.vlgmr.msra.gmra.mxu0 %v430_v21 }
  0x23   :  { %251 = vmatprep.mubr.bf16.mxu0 %v436_v22 }
  0x2a   :  { %252 = vmatmul.mubr.bf16.gmra.mxu0 %v438_v23 }
  0xcc   :  { %v411_v24 = vpop.f32.mrf.mxu1 }
  0xce   :  { %v294_v26 = vpop.f32.mrf.mxu1 }
  0xd0   :  { %v412_v31 = vpop.f32.mrf.mxu1 }
  0xd2   :  { %v297_v37 = vpop.f32.mrf.mxu1 }
  0xe2   :  { %v389_v25 = vpop.f32.mrf.mxu0 }
  0xe4   :  { %v390_v27 = vpop.f32.mrf.mxu0 }
  0xe5   :  { %v391_v29 = vadd.f32 %v390_v27, %v389_v25 }
  0xe6   :  { %v392_v30 = vpop.f32.mrf.mxu0 }
  0xe7   :  { %v246_v32 = vadd.f32 %v391_v29, %v338_v28 }
  0xe8   :  { %v393_v33 = vpop.f32.mrf.mxu0 }
  0xe9   :  { %v394_v34 = vadd.f32 %v393_v33, %v392_v30  ;;  %v295_v35 = vadd.f32 %v294_v26, %v246_v32 }
  0xea   :  { %v395_v36 = vpop.f32.mrf.mxu0 }
  0xeb   :  { %v309_v38 = vmax.f32 %v295_v35, 0.0  ;;  %v249_v39 = vadd.f32 %v394_v34, %v338_v28 }
  0xec   :  { %v396_v40 = vpop.f32.mrf.mxu0 }
  0xed   :  { %v369_v41 = vpack.c.bf16 %v309_v38, %v309_v38  ;;  %v397_v42 = vadd.f32 %v396_v40, %v395_v36  ;;  %v298_v43 = vadd.f32 %v297_v37, %v249_v39 }
  0xee   :  { %v398_v44 = vpop.f32.mrf.mxu0 }
  0xef   :  { %330 = vst.msk [vmem:[%s553_s3] sm:$0xf] %vm329_vm1, %v369_v41  ;;  %v254_v45 = vadd.f32 %v397_v42, %v338_v28  ;;  %v310_v46 = vmax.f32 %v298_v43, 0.0 }
  0xf0   :  { %v399_v47 = vpop.f32.mrf.mxu0 }
  0xf1   :  { %v303_v48 = vadd.f32 %v411_v24, %v254_v45  ;;  %v370_v49 = vpack.c.bf16 %v310_v46, %v310_v46  ;;  %v400_v50 = vadd.f32 %v399_v47, %v398_v44 }
  0xf3   :  { %v311_v51 = vmax.f32 %v303_v48, 0.0  ;;  %331 = vst.msk [vmem:[%s553_s3 + $0x4] sm:$0xf] %vm329_vm1, %v370_v49  ;;  %v257_v52 = vadd.f32 %v400_v50, %v338_v28 }
  0xf5   :  { %v371_v53 = vpack.c.bf16 %v311_v51, %v311_v51  ;;  %v306_v54 = vadd.f32 %v412_v31, %v257_v52 }
  0xf7   :  { %332 = vst.msk [vmem:[%s553_s3 + $0x8] sm:$0xf] %vm329_vm1, %v371_v53  ;;  %v312_v55 = vmax.f32 %v306_v54, 0.0 }
  0xf9   :  { %v372_v56 = vpack.c.bf16 %v312_v55, %v312_v55 }
  0xfb   :  { %333 = vst.msk [vmem:[%s553_s3 + $0xc] sm:$0xf] %vm329_vm1, %v372_v56 }

// kernel: _lambda_.51
= control target key start
LH: loop header
LB: loop body
LE: loop exit
PB: predicated region body
PF: predicated region fallthrough
CT: control target
= control target key end

     0   :  { %vm207_vm0 = vcmask 261120   ;;  %vm344_vm1 = vcmask 257024   ;;  %s585_s1 = inlined_call_operand.vmem [shape: bf16[288,32], index: 1, kind: input, shape index: {}]   ;;  %s586_s0 = inlined_call_operand.vmem [shape: bf16[32,288], index: 0, kind: input, shape index: {}]   ;;  %s587_s2 = inlined_call_operand.vmem [shape: f32[1,32], index: 2, kind: input, shape index: {}]   ;;  %s588_s3 = inlined_call_operand.vmem [shape: bf16[32,32], index: 3, kind: input, shape index: {}]   ;;  %s589_s4 = inlined_call_operand.vmem [shape: bf16[32,32], index: 4, kind: output, shape index: {}]  }
   0x1   :  { %v437_v0 = vld [vmem:[%s585_s1 + $0x78] sm:$0xff]   ;;  %v439_v2 = vld [vmem:[%s585_s1 + $0x70] sm:$0xff]   ;;  %v441_v4 = vld [vmem:[%s585_s1 + $0x68] sm:$0xff]  }
   0x2   :  { %v438_v1 = vld [vmem:[%s585_s1 + $0x38] sm:$0xff]   ;;  %397 = vmatprep.subr.bf16.mxu0 %v437_v0  ;;  %v440_v3 = vld [vmem:[%s585_s1 + $0x30] sm:$0xff]   ;;  %v442_v5 = vld [vmem:[%s585_s1 + $0x28] sm:$0xff]  }
   0x3   :  { %398 = vmatpush3.bf16.msra.mxu0 %v438_v1  ;;  %v443_v6 = vld [vmem:[%s585_s1 + $0x60] sm:$0xff]   ;;  %v445_v8 = vld [vmem:[%s585_s1 + $0x58] sm:$0xff]   ;;  %v452_v10 = vld [vmem:[%s585_s1 + $0x88] sm:$0xff]  }
   0x4   :  { %399 = vmatprep.subr.bf16.mxu0 %v439_v2  ;;  %v444_v7 = vld [vmem:[%s585_s1 + $0x20] sm:$0xff]   ;;  %v446_v9 = vld [vmem:[%s585_s1 + $0x18] sm:$0xff]   ;;  %v447_v11 = vld [vmem:[%s585_s1 + $0x50] sm:$0xff]   ;;  %429 = vmatprep.subr.bf16.mxu1 %v452_v10 }
   0x5   :  { %v448_v12 = vld [vmem:[%s585_s1 + $0x10] sm:$0xff]   ;;  %v449_v13 = vld [vmem:[%s585_s1 + $0x48] sm:$0xff]   ;;  %430 = vmatpush3.bf16.msra.mxu1 %v452_v10  ;;  %v457_v15 = vld [vmem:[%s585_s1 + $0x80] sm:$0xff]  }
   0x6   :  { %v456_v14 = vld [vmem:[%s586_s0 + $0x4] ss:$12 sps:$4 sm:$0xff]   ;;  %v458_v16 = vld [vmem:[%s586_s0 + $0x8] ss:$12 sps:$4 sm:$0xff]   ;;  %431 = vmatprep.subr.bf16.mxu1 %v457_v15  ;;  %v459_v17 = vld [vmem:[%s586_s0 + $0x20] ss:$12 sps:$4 sm:$0xff]  }
   0x7   :  { %400 = vmatpush3.bf16.msra.mxu0 %v440_v3  ;;  %246 = vmatprep.mubr.bf16.mxu0 %v456_v14  ;;  %v450_v18 = vld [vmem:[%s585_s1 + $0x8] sm:$0xff]   ;;  %v451_v19 = vld [vmem:[%s585_s1 + $0x40] sm:$0xff]  }
   0x8   :  { %401 = vmatprep.subr.bf16.mxu0 %v441_v4  ;;  %433 = vmatprep.mubr.msk.bf16.mxu1 %vm207_vm0, %v458_v16  ;;  %v453_v20 = vld [vmem:[%s585_s1] sm:$0xff]   ;;  %v460_v22 = vld [vmem:[%s586_s0 + $0x1c] ss:$12 sps:$4 sm:$0xff]  }
   0x9   :  { %432 = vmatpush3.bf16.msra.mxu1 %v457_v15  ;;  %v454_v21 = vld [vmem:[%s586_s0] ss:$12 sps:$4 sm:$0xff]   ;;  %v462_v23 = vld [vmem:[%s586_s0 + $0x18] ss:$12 sps:$4 sm:$0xff]  }
   0xa   :  { %v353_v28 = vld [vmem:[%s587_s2] ss:$0 sm:$0xff]  ;;  %v396_v43 = vld [vmem:[%s588_s3 + $0x8] sm:$0xff]  }
   0xb   :  { %402 = vmatpush3.bf16.msra.mxu0 %v442_v5  ;;  %v389_v29 = vld [vmem:[%s588_s3] sm:$0xff]   ;;  %v394_v51 = vunpack.c.l.bf16 %v396_v43  ;;  %v395_v60 = vunpack.c.h.bf16 %v396_v43 }
   0xc   :  { %403 = vmatprep.subr.bf16.mxu0 %v443_v6  ;;  %434 = vmatmul.mubr.msk.bf16.vlgmr.msra.gmra.mxu1 %vm207_vm0, %v459_v17  ;;  %v390_v34 = vunpack.c.l.bf16 %v389_v29  ;;  %v391_v42 = vunpack.c.h.bf16 %v389_v29 }
   0xf   :  { %404 = vmatpush3.bf16.msra.mxu0 %v444_v7 }
  0x10   :  { %405 = vmatprep.subr.bf16.mxu0 %v445_v8 }
  0x13   :  { %406 = vmatpush3.bf16.msra.mxu0 %v446_v9 }
  0x14   :  { %407 = vmatprep.subr.bf16.mxu0 %v447_v11 }
  0x17   :  { %408 = vmatpush3.bf16.msra.mxu0 %v448_v12 }
  0x18   :  { %409 = vmatprep.subr.bf16.mxu0 %v449_v13 }
  0x1b   :  { %410 = vmatpush3.bf16.msra.mxu0 %v450_v18 }
  0x1c   :  { %411 = vmatprep.subr.bf16.mxu0 %v451_v19 }
  0x1f   :  { %412 = vmatpush3.bf16.msra.mxu0 %v453_v20 }
  0x22   :  { %247 = vmatmul.mubr.bf16.vlgmr.msra.gmra.mxu0 %v454_v21 }
  0x23   :  { %254 = vmatprep.mubr.bf16.mxu0 %v460_v22 }
  0x2a   :  { %255 = vmatmul.mubr.bf16.gmra.mxu0 %v462_v23 }
  0xcc   :  { %v435_v24 = vpop.f32.mrf.mxu1 }
  0xce   :  { %v297_v26 = vpop.f32.mrf.mxu1 }
  0xd0   :  { %v436_v32 = vpop.f32.mrf.mxu1 }
  0xd2   :  { %v300_v39 = vpop.f32.mrf.mxu1 }
  0xe2   :  { %v413_v25 = vpop.f32.mrf.mxu0 }
  0xe4   :  { %v414_v27 = vpop.f32.mrf.mxu0 }
  0xe5   :  { %v415_v30 = vadd.f32 %v414_v27, %v413_v25 }
  0xe6   :  { %v416_v31 = vpop.f32.mrf.mxu0 }
  0xe7   :  { %v249_v33 = vadd.f32 %v415_v30, %v353_v28 }
  0xe8   :  { %v417_v35 = vpop.f32.mrf.mxu0 }
  0xe9   :  { %v418_v36 = vadd.f32 %v417_v35, %v416_v31  ;;  %v298_v37 = vadd.f32 %v297_v26, %v249_v33 }
  0xea   :  { %v419_v38 = vpop.f32.mrf.mxu0 }
  0xeb   :  { %v320_v40 = vadd.f32 %v390_v34, %v298_v37  ;;  %v252_v41 = vadd.f32 %v418_v36, %v353_v28 }
  0xec   :  { %v420_v44 = vpop.f32.mrf.mxu0 }
  0xed   :  { %v324_v45 = vmax.f32 %v320_v40, 0.0  ;;  %v421_v46 = vadd.f32 %v420_v44, %v419_v38  ;;  %v301_v47 = vadd.f32 %v300_v39, %v252_v41 }
  0xee   :  { %v422_v48 = vpop.f32.mrf.mxu0 }
  0xef   :  { %v384_v49 = vpack.c.bf16 %v324_v45, %v324_v45  ;;  %v257_v50 = vadd.f32 %v421_v46, %v353_v28  ;;  %v321_v52 = vadd.f32 %v391_v42, %v301_v47 }
  0xf0   :  { %v423_v53 = vpop.f32.mrf.mxu0 }
  0xf1   :  { %345 = vst.msk [vmem:[%s589_s4] sm:$0xf] %vm344_vm1, %v384_v49  ;;  %v306_v54 = vadd.f32 %v435_v24, %v257_v50  ;;  %v325_v55 = vmax.f32 %v321_v52, 0.0  ;;  %v424_v56 = vadd.f32 %v423_v53, %v422_v48 }
  0xf3   :  { %v322_v57 = vadd.f32 %v394_v51, %v306_v54  ;;  %v385_v58 = vpack.c.bf16 %v325_v55, %v325_v55  ;;  %v260_v59 = vadd.f32 %v424_v56, %v353_v28 }
  0xf5   :  { %v326_v61 = vmax.f32 %v322_v57, 0.0  ;;  %346 = vst.msk [vmem:[%s589_s4 + $0x4] sm:$0xf] %vm344_vm1, %v385_v58  ;;  %v309_v62 = vadd.f32 %v436_v32, %v260_v59 }
  0xf7   :  { %v386_v63 = vpack.c.bf16 %v326_v61, %v326_v61  ;;  %v323_v0 = vadd.f32 %v395_v60, %v309_v62 }
  0xf9   :  { %347 = vst.msk [vmem:[%s589_s4 + $0x8] sm:$0xf] %vm344_vm1, %v386_v63  ;;  %v327_v1 = vmax.f32 %v323_v0, 0.0 }
  0xfb   :  { %v387_v2 = vpack.c.bf16 %v327_v1, %v327_v1 }
  0xfd   :  { %348 = vst.msk [vmem:[%s589_s4 + $0xc] sm:$0xf] %vm344_vm1, %v387_v2 }

// kernel: _lambda_.67
= control target key start
LH: loop header
LB: loop body
LE: loop exit
PB: predicated region body
PF: predicated region fallthrough
CT: control target
= control target key end

     0   :  { %v206_v0 = vmov 0.0   ;;  %vm207_vm0 = vmmov 0   ;;  %vm145_vm1 = vcmask 257024   ;;  %s264_s1 = inlined_call_operand.vmem [shape: bf16[128,32], index: 1, kind: input, shape index: {}]   ;;  %s265_s0 = inlined_call_operand.vmem [shape: bf16[16,128], index: 0, kind: input, shape index: {}]   ;;  %s266_s2 = inlined_call_operand.vmem [shape: f32[1,32], index: 2, kind: input, shape index: {}]   ;;  %s267_s3 = inlined_call_operand.vmem [shape: bf16[16,32], index: 3, kind: output, shape index: {}]  }
   0x1   :  { %175 = vmatprep.subr.bf16.mxu0 %v206_v0  ;;  %v197_v1 = vld [vmem:[%s264_s1 + $0x38] sm:$0xff]   ;;  %191 = vmatprep.mubr.msk.bf16.mxu0 %vm207_vm0, %v206_v0  ;;  %v198_v2 = vld [vmem:[%s264_s1 + $0x30] sm:$0xff]   ;;  %v199_v3 = vld [vmem:[%s264_s1 + $0x28] sm:$0xff]  }
   0x2   :  { %176 = vmatpush3.bf16.msra.mxu0 %v197_v1  ;;  %v200_v4 = vld [vmem:[%s264_s1 + $0x20] sm:$0xff]   ;;  %v201_v5 = vld [vmem:[%s264_s1 + $0x18] sm:$0xff]   ;;  %v202_v6 = vld [vmem:[%s264_s1 + $0x10] sm:$0xff]  }
   0x3   :  { %177 = vmatprep.subr.bf16.mxu0 %v206_v0  ;;  %v203_v7 = vld [vmem:[%s264_s1 + $0x8] sm:$0xff]   ;;  %v204_v8 = vld [vmem:[%s264_s1] sm:$0xff]  }
   0x4   :  { %v205_v9 = vld [vmem:[%s265_s0] sm:$0xff]  }
   0x5   :  { %v152_v10 = vld [vmem:[%s266_s2] ss:$0 sm:$0xff] }
   0x6   :  { %178 = vmatpush3.bf16.msra.mxu0 %v198_v2 }
   0x7   :  { %179 = vmatprep.subr.bf16.mxu0 %v206_v0 }
   0xa   :  { %180 = vmatpush3.bf16.msra.mxu0 %v199_v3 }
   0xb   :  { %181 = vmatprep.subr.bf16.mxu0 %v206_v0 }
   0xe   :  { %182 = vmatpush3.bf16.msra.mxu0 %v200_v4 }
   0xf   :  { %183 = vmatprep.subr.bf16.mxu0 %v206_v0 }
  0x12   :  { %184 = vmatpush3.bf16.msra.mxu0 %v201_v5 }
  0x13   :  { %185 = vmatprep.subr.bf16.mxu0 %v206_v0 }
  0x16   :  { %186 = vmatpush3.bf16.msra.mxu0 %v202_v6 }
  0x17   :  { %187 = vmatprep.subr.bf16.mxu0 %v206_v0 }
  0x1a   :  { %188 = vmatpush3.bf16.msra.mxu0 %v203_v7 }
  0x1b   :  { %189 = vmatprep.subr.bf16.mxu0 %v206_v0 }
  0x1e   :  { %190 = vmatpush3.bf16.msra.mxu0 %v204_v8 }
  0x21   :  { %192 = vmatmul.mubr.bf16.vlgmr.msra.gmra.mxu0 %v205_v9 }
  0xe1   :  { %v128_v11 = vpop.f32.mrf.mxu0 }
  0xe2   :  { %v129_v12 = vadd.f32 %v152_v10, %v128_v11 }
  0xe3   :  { %v193_v13 = vpop.f32.mrf.mxu0 }
  0xe4   :  { %v135_v14 = vmax.f32 %v129_v12, 0.0 }
  0xe5   :  { %v131_v15 = vpop.f32.mrf.mxu0 }
  0xe6   :  { %v164_v16 = vpack.c.bf16 %v135_v14, %v135_v14  ;;  %v132_v17 = vadd.f32 %v152_v10, %v131_v15 }
  0xe7   :  { %v194_v18 = vpop.f32.mrf.mxu0 }
  0xe8   :  { %146 = vst.msk [vmem:[%s267_s3] sm:$0xf] %vm145_vm1, %v164_v16  ;;  %v136_v19 = vmax.f32 %v132_v17, 0.0 }
  0xea   :  { %v165_v20 = vpack.c.bf16 %v136_v19, %v136_v19 }
  0xec   :  { %147 = vst.msk [vmem:[%s267_s3 + $0x4] sm:$0xf] %vm145_vm1, %v165_v20 }

</bundles_post_ra>
